<compile_context>
chip_gen: v7x
topology: tpu7x:2x2x1
jax: 0.10.0
libtpu: 0.0.40
codegen_flags: <defaults>
</compile_context>

<pallas_src>
import functools

import numpy as np
import jax
import jax.numpy as jnp
from jax import lax
from jax.experimental import pallas as pl
from jax.experimental.pallas import tpu as pltpu


# --------------------------- config (the ViT args) ---------------------------
IMG_H = 32          # args.img_h
PATCH = 16          # patch_size (fixed in the spec)
DIM = 128           # args.vit_dim
MLP_DIM = 256       # args.mlp_dim
HEADS = 12
DIM_HEAD = 64       # vit-pytorch default
DHP = 128           # head dim padded to one full lane tile
N_CLASS = 16
CHANNELS = 3
LN_EPS = 1e-5

NUM_PATCHES = (IMG_H // PATCH) ** 2      # 4
SEQ = NUM_PATCHES + 1                    # 5 (cls + patches)
PATCH_DIM = CHANNELS * PATCH * PATCH     # 768
INNER = HEADS * DIM_HEAD                 # 768
INNER_P = HEADS * DHP                    # 1536 (lane-padded per head)
NCLS_P = 128                             # padded class dim (lane-dense output)


def _round_up(x, m):
    return (x + m - 1) // m * m


# ------------------------- single-block pallas helper ------------------------
def _zeros_map(ndim, i):
    return (0,) * ndim


def _call_single(kernel, out_shape, out_dtype, *args):
    """One-grid-step pallas_call; every operand is a full-array VMEM block."""
    in_specs = [pl.BlockSpec(a.shape, functools.partial(_zeros_map, a.ndim))
                for a in args]
    out_specs = pl.BlockSpec(out_shape, functools.partial(_zeros_map, len(out_shape)))
    return pl.pallas_call(
        kernel,
        out_shape=jax.ShapeDtypeStruct(out_shape, out_dtype),
        grid=(1,),
        in_specs=in_specs,
        out_specs=out_specs,
        compiler_params=pltpu.CompilerParams(dimension_semantics=("arbitrary",)),
    )(*args)


def _layernorm_f32(x, g, b):
    mean = jnp.mean(x, axis=-1, keepdims=True)
    var = jnp.mean((x - mean) ** 2, axis=-1, keepdims=True)
    return (x - mean) * lax.rsqrt(var + LN_EPS) * g + b


# ------------------------------ kernel bodies --------------------------------
def _patch_embed_kernel(x_ref, w_ref, add_ref, o_ref):
    # x:(B*n, patch_dim) bf16, w:(patch_dim, DIM) bf16, add = bias + pos (f32)
    acc = jnp.dot(x_ref[...], w_ref[...], preferred_element_type=jnp.float32)
    o_ref[...] = (acc + add_ref[...]).astype(o_ref.dtype)


def _attn_block_kernel(x_ref, g_ref, b_ref, wqkv_ref, wo_ref, bo_ref, mask_ref,
                       o_ref, *, scale):
    # Fused: LN1 -> QKV -> multi-head softmax attention -> Wo + bo -> +residual
    x = x_ref[...].astype(jnp.float32)                       # (Mp, DIM)
    xn = _layernorm_f32(x, g_ref[...], b_ref[...]).astype(jnp.bfloat16)

    # QKV projection (to_qkv has no bias); per-head slabs are 128-lane padded.
    qkv = jnp.dot(xn, wqkv_ref[...],
                  preferred_element_type=jnp.float32).astype(jnp.bfloat16)

    mask = mask_ref[...]                                     # (Mp, Mp) f32
    outs = []
    for h in range(HEADS):
        q_h = qkv[:, h * DHP:(h + 1) * DHP]
        k_h = qkv[:, INNER_P + h * DHP:INNER_P + (h + 1) * DHP]
        v_h = qkv[:, 2 * INNER_P + h * DHP:2 * INNER_P + (h + 1) * DHP]
        s = lax.dot_general(q_h, k_h, (((1,), (1,)), ((), ())),
                            preferred_element_type=jnp.float32) * scale + mask
        m = jnp.max(s, axis=-1, keepdims=True)
        p = jnp.exp(s - m)
        l = jnp.sum(p, axis=-1, keepdims=True)
        o_h = jnp.dot(p.astype(jnp.bfloat16), v_h,
                      preferred_element_type=jnp.float32)
        outs.append(o_h * pl.reciprocal(l, approx=True))
    attn = jnp.concatenate(outs, axis=1).astype(jnp.bfloat16)   # (Mp, INNER_P)

    y = jnp.dot(attn, wo_ref[...], preferred_element_type=jnp.float32) + bo_ref[...]
    o_ref[...] = (x + y).astype(o_ref.dtype)


def _mlp_block_kernel(x_ref, g_ref, b_ref, w1_ref, b1_ref, w2_ref, b2_ref, o_ref):
    # Fused: LN2 -> W1 + b1 + GELU -> W2 + b2 -> +residual
    x = x_ref[...].astype(jnp.float32)
    xn = _layernorm_f32(x, g_ref[...], b_ref[...]).astype(jnp.bfloat16)
    h = jnp.dot(xn, w1_ref[...], preferred_element_type=jnp.float32) + b1_ref[...]
    # TODO(synk): tanh-approximate GELU (torch nn.GELU default is exact erf)
    c = 0.7978845608028654
    h = 0.5 * h * (1.0 + jnp.tanh(c * (h + 0.044715 * h * h * h)))
    y = jnp.dot(h.astype(jnp.bfloat16), w2_ref[...],
                preferred_element_type=jnp.float32) + b2_ref[...]
    o_ref[...] = (x + y).astype(o_ref.dtype)


def _head_kernel(x_ref, g_ref, b_ref, w_ref, bias_ref, o_ref):
    # Fused: LNh -> classifier matmul + bias (f32 lane-dense output)
    x = x_ref[...].astype(jnp.float32)
    xn = _layernorm_f32(x, g_ref[...], b_ref[...]).astype(jnp.bfloat16)
    y = jnp.dot(xn, w_ref[...], preferred_element_type=jnp.float32) + bias_ref[...]
    o_ref[...] = y.astype(o_ref.dtype)


# ------------------------------ parameter init -------------------------------
def init_params(key):
    ks = iter(jax.random.split(key, 10))

    def lin(k, fan_in, shape):
        return jax.random.normal(k, shape, jnp.float32) * (1.0 / fan_in) ** 0.5

    p = {}
    p["cls_token"] = jax.random.normal(next(ks), (1, 1, DIM), jnp.float32)
    p["pos_embedding"] = jax.random.normal(next(ks), (1, SEQ, DIM), jnp.float32)
    p["patch_w"] = lin(next(ks), PATCH_DIM, (PATCH_DIM, DIM))
    p["patch_b"] = jnp.zeros((DIM,), jnp.float32)
    p["ln1_g"] = jnp.ones((DIM,), jnp.float32)
    p["ln1_b"] = jnp.zeros((DIM,), jnp.float32)
    p["wqkv"] = lin(next(ks), DIM, (DIM, 3 * INNER))          # to_qkv, bias=False
    p["wo"] = lin(next(ks), INNER, (INNER, DIM))
    p["bo"] = jnp.zeros((DIM,), jnp.float32)
    p["ln2_g"] = jnp.ones((DIM,), jnp.float32)
    p["ln2_b"] = jnp.zeros((DIM,), jnp.float32)
    p["w1"] = lin(next(ks), DIM, (DIM, MLP_DIM))
    p["b1"] = jnp.zeros((MLP_DIM,), jnp.float32)
    p["w2"] = lin(next(ks), MLP_DIM, (MLP_DIM, DIM))
    p["b2"] = jnp.zeros((DIM,), jnp.float32)
    p["lnh_g"] = jnp.ones((DIM,), jnp.float32)
    p["lnh_b"] = jnp.zeros((DIM,), jnp.float32)
    p["head_w"] = lin(next(ks), DIM, (DIM, N_CLASS))
    p["head_b"] = jnp.zeros((N_CLASS,), jnp.float32)
    return p


def prepare_params(p, batch):
    """One-time pad / cast / re-layout of all parameters (perf review item)."""
    mp = _round_up(batch * SEQ, 8)
    f32, bf16 = jnp.float32, jnp.bfloat16

    # Expand per-head q/k/v columns from 64 -> 128 lanes (zero padded) so the
    # in-kernel head slices are 128-lane aligned.
    def expand_cols(w):                               # (DIM, H*64) -> (DIM, H*128)
        w = w.reshape(DIM, HEADS, DIM_HEAD)
        w = jnp.concatenate(
            [w, jnp.zeros((DIM, HEADS, DHP - DIM_HEAD), w.dtype)], axis=-1)
        return w.reshape(DIM, HEADS * DHP)

    wq, wk, wv = jnp.split(p["wqkv"], 3, axis=1)
    wqkv_e = jnp.concatenate([expand_cols(wq), expand_cols(wk), expand_cols(wv)],
                             axis=1)                  # (DIM, 3*INNER_P)

    wo = p["wo"].reshape(HEADS, DIM_HEAD, DIM)
    wo_e = jnp.concatenate(
        [wo, jnp.zeros((HEADS, DHP - DIM_HEAD, DIM), wo.dtype)], axis=1)
    wo_e = wo_e.reshape(HEADS * DHP, DIM)             # (INNER_P, DIM)

    # Fold positional embedding into the patch-embed bias / cls row.
    pos = p["pos_embedding"][0]                                   # (SEQ, DIM)
    add_embed = p["patch_b"][None, :] + jnp.tile(pos[1:], (batch, 1))
    cls_row = (p["cls_token"][0, 0] + pos[0])[None, :]

    # Block-diagonal attention mask: tokens attend only within their own image;
    # padded rows / columns get a large negative (kept finite, rows discarded).
    mask = np.full((mp, mp), -1e9, np.float32)
    for b in range(batch):
        mask[b * SEQ:(b + 1) * SEQ, b * SEQ:(b + 1) * SEQ] = 0.0

    head_w = jnp.pad(p["head_w"], ((0, 0), (0, NCLS_P - N_CLASS)))
    head_b = jnp.pad(p["head_b"], ((0, NCLS_P - N_CLASS),))

    return {
        "patch_w": p["patch_w"].astype(bf16),
        "add_embed": add_embed.astype(f32),           # (batch*num_patches, DIM)
        "cls_row": cls_row.astype(bf16),               # (1, DIM)
        "ln1_g": p["ln1_g"][None, :].astype(f32),
        "ln1_b": p["ln1_b"][None, :].astype(f32),
        "wqkv": wqkv_e.astype(bf16),
        "wo": wo_e.astype(bf16),
        "bo": p["bo"][None, :].astype(f32),
        "mask": jnp.asarray(mask),
        "ln2_g": p["ln2_g"][None, :].astype(f32),
        "ln2_b": p["ln2_b"][None, :].astype(f32),
        "w1": p["w1"].astype(bf16),
        "b1": p["b1"][None, :].astype(f32),
        "w2": p["w2"].astype(bf16),
        "b2": p["b2"][None, :].astype(f32),
        "lnh_g": p["lnh_g"][None, :].astype(f32),
        "lnh_b": p["lnh_b"][None, :].astype(f32),
        "head_w": head_w.astype(bf16),
        "head_b": head_b[None, :].astype(f32),
    }


# --------------------------------- forward -----------------------------------
@jax.jit
def ir_module_forward(params, x):
    B = x.shape[0]
    n = NUM_PATCHES
    mp = _round_up(B * SEQ, 8)

    # ---- patch rearrange 'b c (h p1) (w p2) -> (b h w) (p1 p2 c)' ----
    hh = ww = IMG_H // PATCH
    patches = x.reshape(B, CHANNELS, hh, PATCH, ww, PATCH)
    patches = patches.transpose(0, 2, 4, 3, 5, 1).reshape(B * n, PATCH_DIM)
    patches = patches.astype(jnp.bfloat16)

    # ---- patch embedding (bias + positional embedding fused) ----
    patch_tok = _call_single(_patch_embed_kernel, (B * n, DIM), jnp.bfloat16,
                             patches, params["patch_w"], params["add_embed"])

    # ---- cls token (with its positional embedding) + pad rows ONCE ----
    cls = jnp.broadcast_to(params["cls_row"], (B, 1, DIM))
    tok = jnp.concatenate([cls, patch_tok.reshape(B, n, DIM)], axis=1)  # (B,SEQ,DIM)
    x2d = jnp.pad(tok.reshape(B * SEQ, DIM), ((0, mp - B * SEQ), (0, 0)))
    # emb_dropout: identity (deterministic forward)

    # ---- transformer block (depth = 1): fused attention block ----
    x2d = _call_single(
        functools.partial(_attn_block_kernel, scale=DIM_HEAD ** -0.5),
        (mp, DIM), jnp.bfloat16,
        x2d, params["ln1_g"], params["ln1_b"], params["wqkv"], params["wo"],
        params["bo"], params["mask"])

    # ---- fused MLP block ----
    x2d = _call_single(
        _mlp_block_kernel, (mp, DIM), jnp.bfloat16,
        x2d, params["ln2_g"], params["ln2_b"], params["w1"], params["b1"],
        params["w2"], params["b2"])

    # ---- cls pooling -> LayerNorm -> linear head ----
    cls_tok = x2d[:B * SEQ].reshape(B, SEQ, DIM)[:, 0]          # pool = 'cls'
    bp = _round_up(B, 8)
    cls_tok = jnp.pad(cls_tok, ((0, bp - B), (0, 0)))
    logits = _call_single(_head_kernel, (bp, NCLS_P), jnp.float32,
                          cls_tok, params["lnh_g"], params["lnh_b"],
                          params["head_w"], params["head_b"])
    return logits[:B, :N_CLASS]


# ----------------------------------- main ------------------------------------
if __name__ == "__main__":
    key = jax.random.PRNGKey(0)
    kp, kx = jax.random.split(key)
    raw_params = init_params(kp)
    x = jax.random.normal(kx, (2, CHANNELS, IMG_H, IMG_H), jnp.float32)

    params = prepare_params(raw_params, batch=x.shape[0])   # one-time pad/cast
    logits = ir_module_forward(params, x)
    jax.block_until_ready(logits)

    assert logits.shape == (2, N_CLASS), logits.shape
    assert bool(jnp.all(jnp.isfinite(logits)))
    print("KERNEL_OK")
</pallas_src>

<mosaic_0001>
module attributes {stable_mosaic.version = 11 : i64} {
  func.func @_patch_embed_kernel(%arg0: i32, %arg1: memref<8x768xbf16, #tpu.memory_space<vmem>>, %arg2: memref<768x128xbf16, #tpu.memory_space<vmem>>, %arg3: memref<8x128xf32, #tpu.memory_space<vmem>>, %arg4: memref<8x128xbf16, #tpu.memory_space<vmem>>) attributes {dimension_semantics = [#tpu.dimension_semantics<arbitrary>], iteration_bounds = array<i64: 1>, scalar_prefetch = 0 : i64, scratch_operands = 0 : i64, tpu.core_type = #tpu.core_type<tc>, window_params = [{pipeline_mode = #tpu.pipeline_mode<synchronous>, transform_indices = @transform_0, window_bounds = array<i64: 8, 768>}, {pipeline_mode = #tpu.pipeline_mode<synchronous>, transform_indices = @transform_1, window_bounds = array<i64: 768, 128>}, {pipeline_mode = #tpu.pipeline_mode<synchronous>, transform_indices = @transform_2, window_bounds = array<i64: 8, 128>}, {pipeline_mode = #tpu.pipeline_mode<synchronous>, transform_indices = @transform_3, window_bounds = array<i64: 8, 128>}]} {
    %c0 = arith.constant 0 : index
    %c0_0 = arith.constant 0 : index
    %0 = vector.load %arg1[%c0, %c0_0] : memref<8x768xbf16, #tpu.memory_space<vmem>>, vector<8x768xbf16>
    %c0_1 = arith.constant 0 : index
    %c0_2 = arith.constant 0 : index
    %1 = vector.load %arg2[%c0_1, %c0_2] : memref<768x128xbf16, #tpu.memory_space<vmem>>, vector<768x128xbf16>
    %cst = arith.constant dense<0.000000e+00> : vector<8x128xf32>
    %2 = tpu.matmul %0, %1, %cst {dimension_numbers = #tpu.dot_dimension_numbers<[1], [0], [0], [1], [0, 0, 1, 1], [], []>} : vector<8x768xbf16>, vector<768x128xbf16>, vector<8x128xf32> -> vector<8x128xf32>
    %c0_3 = arith.constant 0 : index
    %c0_4 = arith.constant 0 : index
    %3 = vector.load %arg3[%c0_3, %c0_4] : memref<8x128xf32, #tpu.memory_space<vmem>>, vector<8x128xf32>
    %4 = arith.addf %2, %3 : vector<8x128xf32>
    %5 = arith.truncf %4 : vector<8x128xf32> to vector<8x128xbf16>
    %c0_5 = arith.constant 0 : index
    %c0_6 = arith.constant 0 : index
    %6 = vector.load %arg4[%c0_5, %c0_6] : memref<8x128xbf16, #tpu.memory_space<vmem>>, vector<8x128xbf16>
    tpu.vector_store %arg4[%c0_5, %c0_6], %5 {strides = array<i32>} : memref<8x128xbf16, #tpu.memory_space<vmem>>, vector<8x128xbf16>,
    return
  }
  func.func @transform_0(%arg0: i32) -> (i32, i32) {
    %c0_i32 = arith.constant 0 : i32
    %c0_i32_0 = arith.constant 0 : i32
    %c0_i32_1 = arith.constant 0 : i32
    return %c0_i32, %c0_i32_0 : i32, i32
  }
  func.func @transform_1(%arg0: i32) -> (i32, i32) {
    %c0_i32 = arith.constant 0 : i32
    %c0_i32_0 = arith.constant 0 : i32
    %c0_i32_1 = arith.constant 0 : i32
    return %c0_i32, %c0_i32_0 : i32, i32
  }
  func.func @transform_2(%arg0: i32) -> (i32, i32) {
    %c0_i32 = arith.constant 0 : i32
    %c0_i32_0 = arith.constant 0 : i32
    %c0_i32_1 = arith.constant 0 : i32
    return %c0_i32, %c0_i32_0 : i32, i32
  }
  func.func @transform_3(%arg0: i32) -> (i32, i32) {
    %c0_i32 = arith.constant 0 : i32
    %c0_i32_0 = arith.constant 0 : i32
    %c0_i32_1 = arith.constant 0 : i32
    return %c0_i32, %c0_i32_0 : i32, i32
  }
}

module attributes {stable_mosaic.version = 11 : i64} {
  func.func @_attn_block_kernel(%arg0: i32, %arg1: memref<16x128xbf16, #tpu.memory_space<vmem>>, %arg2: memref<1x128xf32, #tpu.memory_space<vmem>>, %arg3: memref<1x128xf32, #tpu.memory_space<vmem>>, %arg4: memref<128x4608xbf16, #tpu.memory_space<vmem>>, %arg5: memref<1536x128xbf16, #tpu.memory_space<vmem>>, %arg6: memref<1x128xf32, #tpu.memory_space<vmem>>, %arg7: memref<16x16xf32, #tpu.memory_space<vmem>>, %arg8: memref<16x128xbf16, #tpu.memory_space<vmem>>) attributes {dimension_semantics = [#tpu.dimension_semantics<arbitrary>], iteration_bounds = array<i64: 1>, scalar_prefetch = 0 : i64, scratch_operands = 0 : i64, tpu.core_type = #tpu.core_type<tc>, window_params = [{pipeline_mode = #tpu.pipeline_mode<synchronous>, transform_indices = @transform_0, window_bounds = array<i64: 16, 128>}, {pipeline_mode = #tpu.pipeline_mode<synchronous>, transform_indices = @transform_1, window_bounds = array<i64: 1, 128>}, {pipeline_mode = #tpu.pipeline_mode<synchronous>, transform_indices = @transform_2, window_bounds = array<i64: 1, 128>}, {pipeline_mode = #tpu.pipeline_mode<synchronous>, transform_indices = @transform_3, window_bounds = array<i64: 128, 4608>}, {pipeline_mode = #tpu.pipeline_mode<synchronous>, transform_indices = @transform_4, window_bounds = array<i64: 1536, 128>}, {pipeline_mode = #tpu.pipeline_mode<synchronous>, transform_indices = @transform_5, window_bounds = array<i64: 1, 128>}, {pipeline_mode = #tpu.pipeline_mode<synchronous>, transform_indices = @transform_6, window_bounds = array<i64: 16, 16>}, {pipeline_mode = #tpu.pipeline_mode<synchronous>, transform_indices = @transform_7, window_bounds = array<i64: 16, 128>}]} {
    %c0 = arith.constant 0 : index
    %c0_0 = arith.constant 0 : index
    %0 = vector.load %arg1[%c0, %c0_0] : memref<16x128xbf16, #tpu.memory_space<vmem>>, vector<16x128xbf16>
    %1 = arith.extf %0 : vector<16x128xbf16> to vector<16x128xf32>
    %c0_1 = arith.constant 0 : index
    %c0_2 = arith.constant 0 : index
    %2 = vector.load %arg2[%c0_1, %c0_2] : memref<1x128xf32, #tpu.memory_space<vmem>>, vector<1x128xf32>
    %c0_3 = arith.constant 0 : index
    %c0_4 = arith.constant 0 : index
    %3 = vector.load %arg3[%c0_3, %c0_4] : memref<1x128xf32, #tpu.memory_space<vmem>>, vector<1x128xf32>
    %cst = arith.constant dense<0.000000e+00> : vector<16xf32>
    %4 = vector.multi_reduction <add>, %1, %cst [1] : vector<16x128xf32> to vector<16xf32>
    %5 = vector.shape_cast %4 : vector<16xf32> to vector<16x1xf32>
    %cst_5 = arith.constant 1.280000e+02 : f32
    %6 = vector.broadcast %cst_5 : f32 to vector<16x1xf32>
    %7 = arith.divf %5, %6 : vector<16x1xf32>
    %8 = vector.broadcast %7 : vector<16x1xf32> to vector<16x128xf32>
    %9 = arith.subf %1, %8 : vector<16x128xf32>
    %10 = arith.mulf %9, %9 : vector<16x128xf32>
    %cst_6 = arith.constant dense<0.000000e+00> : vector<16xf32>
    %11 = vector.multi_reduction <add>, %10, %cst_6 [1] : vector<16x128xf32> to vector<16xf32>
    %12 = vector.shape_cast %11 : vector<16xf32> to vector<16x1xf32>
    %cst_7 = arith.constant 1.280000e+02 : f32
    %13 = vector.broadcast %cst_7 : f32 to vector<16x1xf32>
    %14 = arith.divf %12, %13 : vector<16x1xf32>
    %15 = vector.broadcast %7 : vector<16x1xf32> to vector<16x128xf32>
    %16 = arith.subf %1, %15 : vector<16x128xf32>
    %cst_8 = arith.constant 9.99999974E-6 : f32
    %17 = vector.broadcast %cst_8 : f32 to vector<16x1xf32>
    %18 = arith.addf %14, %17 : vector<16x1xf32>
    %19 = math.rsqrt %18 : vector<16x1xf32>
    %20 = vector.broadcast %19 : vector<16x1xf32> to vector<16x128xf32>
    %21 = arith.mulf %16, %20 : vector<16x128xf32>
    %22 = vector.broadcast %2 : vector<1x128xf32> to vector<16x128xf32>
    %23 = arith.mulf %21, %22 : vector<16x128xf32>
    %24 = vector.broadcast %3 : vector<1x128xf32> to vector<16x128xf32>
    %25 = arith.addf %23, %24 : vector<16x128xf32>
    %26 = arith.truncf %25 : vector<16x128xf32> to vector<16x128xbf16>
    %c0_9 = arith.constant 0 : index
    %c0_10 = arith.constant 0 : index
    %27 = vector.load %arg4[%c0_9, %c0_10] : memref<128x4608xbf16, #tpu.memory_space<vmem>>, vector<128x4608xbf16>
    %cst_11 = arith.constant dense<0.000000e+00> : vector<16x4608xf32>
    %28 = tpu.matmul %26, %27, %cst_11 {dimension_numbers = #tpu.dot_dimension_numbers<[1], [0], [0], [1], [0, 0, 1, 1], [], []>} : vector<16x128xbf16>, vector<128x4608xbf16>, vector<16x4608xf32> -> vector<16x4608xf32>
    %29 = arith.truncf %28 : vector<16x4608xf32> to vector<16x4608xbf16>
    %c0_12 = arith.constant 0 : index
    %c0_13 = arith.constant 0 : index
    %30 = vector.load %arg7[%c0_12, %c0_13] : memref<16x16xf32, #tpu.memory_space<vmem>>, vector<16x16xf32>
    %31 = vector.extract_strided_slice %29 {offsets = [0, 0], sizes = [16, 128], strides = [1, 1]} : vector<16x4608xbf16> to vector<16x128xbf16>
    %32 = vector.extract_strided_slice %29 {offsets = [0, 1536], sizes = [16, 128], strides = [1, 1]} : vector<16x4608xbf16> to vector<16x128xbf16>
    %33 = vector.extract_strided_slice %29 {offsets = [0, 3072], sizes = [16, 128], strides = [1, 1]} : vector<16x4608xbf16> to vector<16x128xbf16>
    %cst_14 = arith.constant dense<0.000000e+00> : vector<16x16xf32>
    %34 = tpu.matmul %31, %32, %cst_14 {dimension_numbers = #tpu.dot_dimension_numbers<[1], [1], [0], [0], [0, 0, 1, 0], [], []>} : vector<16x128xbf16>, vector<16x128xbf16>, vector<16x16xf32> -> vector<16x16xf32>
    %cst_15 = arith.constant 1.250000e-01 : f32
    %35 = vector.broadcast %cst_15 : f32 to vector<16x16xf32>
    %36 = arith.mulf %34, %35 : vector<16x16xf32>
    %37 = arith.addf %36, %30 : vector<16x16xf32>
    %cst_16 = arith.constant dense<0xFF800000> : vector<16xf32>
    %38 = vector.multi_reduction <maximumf>, %37, %cst_16 [1] : vector<16x16xf32> to vector<16xf32>
    %39 = vector.shape_cast %38 : vector<16xf32> to vector<16x1xf32>
    %40 = vector.broadcast %39 : vector<16x1xf32> to vector<16x16xf32>
    %41 = arith.subf %37, %40 : vector<16x16xf32>
    %42 = math.exp %41 : vector<16x16xf32>
    %cst_17 = arith.constant dense<0.000000e+00> : vector<16xf32>
    %43 = vector.multi_reduction <add>, %42, %cst_17 [1] : vector<16x16xf32> to vector<16xf32>
    %44 = vector.shape_cast %43 : vector<16xf32> to vector<16x1xf32>
    %45 = arith.truncf %42 : vector<16x16xf32> to vector<16x16xbf16>
    %cst_18 = arith.constant dense<0.000000e+00> : vector<16x128xf32>
    %46 = tpu.matmul %45, %33, %cst_18 {dimension_numbers = #tpu.dot_dimension_numbers<[1], [0], [0], [1], [0, 0, 1, 1], [], []>} : vector<16x16xbf16>, vector<16x128xbf16>, vector<16x128xf32> -> vector<16x128xf32>
    %47 = tpu.reciprocal %44 {approx = true} : vector<16x1xf32> -> vector<16x1xf32>
    %48 = vector.broadcast %47 : vector<16x1xf32> to vector<16x128xf32>
    %49 = arith.mulf %46, %48 : vector<16x128xf32>
    %50 = vector.extract_strided_slice %29 {offsets = [0, 128], sizes = [16, 128], strides = [1, 1]} : vector<16x4608xbf16> to vector<16x128xbf16>
    %51 = vector.extract_strided_slice %29 {offsets = [0, 1664], sizes = [16, 128], strides = [1, 1]} : vector<16x4608xbf16> to vector<16x128xbf16>
    %52 = vector.extract_strided_slice %29 {offsets = [0, 3200], sizes = [16, 128], strides = [1, 1]} : vector<16x4608xbf16> to vector<16x128xbf16>
    %cst_19 = arith.constant dense<0.000000e+00> : vector<16x16xf32>
    %53 = tpu.matmul %50, %51, %cst_19 {dimension_numbers = #tpu.dot_dimension_numbers<[1], [1], [0], [0], [0, 0, 1, 0], [], []>} : vector<16x128xbf16>, vector<16x128xbf16>, vector<16x16xf32> -> vector<16x16xf32>
    %cst_20 = arith.constant 1.250000e-01 : f32
    %54 = vector.broadcast %cst_20 : f32 to vector<16x16xf32>
    %55 = arith.mulf %53, %54 : vector<16x16xf32>
    %56 = arith.addf %55, %30 : vector<16x16xf32>
    %cst_21 = arith.constant dense<0xFF800000> : vector<16xf32>
    %57 = vector.multi_reduction <maximumf>, %56, %cst_21 [1] : vector<16x16xf32> to vector<16xf32>
    %58 = vector.shape_cast %57 : vector<16xf32> to vector<16x1xf32>
    %59 = vector.broadcast %58 : vector<16x1xf32> to vector<16x16xf32>
    %60 = arith.subf %56, %59 : vector<16x16xf32>
    %61 = math.exp %60 : vector<16x16xf32>
    %cst_22 = arith.constant dense<0.000000e+00> : vector<16xf32>
    %62 = vector.multi_reduction <add>, %61, %cst_22 [1] : vector<16x16xf32> to vector<16xf32>
    %63 = vector.shape_cast %62 : vector<16xf32> to vector<16x1xf32>
    %64 = arith.truncf %61 : vector<16x16xf32> to vector<16x16xbf16>
    %cst_23 = arith.constant dense<0.000000e+00> : vector<16x128xf32>
    %65 = tpu.matmul %64, %52, %cst_23 {dimension_numbers = #tpu.dot_dimension_numbers<[1], [0], [0], [1], [0, 0, 1, 1], [], []>} : vector<16x16xbf16>, vector<16x128xbf16>, vector<16x128xf32> -> vector<16x128xf32>
    %66 = tpu.reciprocal %63 {approx = true} : vector<16x1xf32> -> vector<16x1xf32>
    %67 = vector.broadcast %66 : vector<16x1xf32> to vector<16x128xf32>
    %68 = arith.mulf %65, %67 : vector<16x128xf32>
    %69 = vector.extract_strided_slice %29 {offsets = [0, 256], sizes = [16, 128], strides = [1, 1]} : vector<16x4608xbf16> to vector<16x128xbf16>
    %70 = vector.extract_strided_slice %29 {offsets = [0, 1792], sizes = [16, 128], strides = [1, 1]} : vector<16x4608xbf16> to vector<16x128xbf16>
    %71 = vector.extract_strided_slice %29 {offsets = [0, 3328], sizes = [16, 128], strides = [1, 1]} : vector<16x4608xbf16> to vector<16x128xbf16>
    %cst_24 = arith.constant dense<0.000000e+00> : vector<16x16xf32>
    %72 = tpu.matmul %69, %70, %cst_24 {dimension_numbers = #tpu.dot_dimension_numbers<[1], [1], [0], [0], [0, 0, 1, 0], [], []>} : vector<16x128xbf16>, vector<16x128xbf16>, vector<16x16xf32> -> vector<16x16xf32>
    %cst_25 = arith.constant 1.250000e-01 : f32
    %73 = vector.broadcast %cst_25 : f32 to vector<16x16xf32>
    %74 = arith.mulf %72, %73 : vector<16x16xf32>
    %75 = arith.addf %74, %30 : vector<16x16xf32>
    %cst_26 = arith.constant dense<0xFF800000> : vector<16xf32>
    %76 = vector.multi_reduction <maximumf>, %75, %cst_26 [1] : vector<16x16xf32> to vector<16xf32>
    %77 = vector.shape_cast %76 : vector<16xf32> to vector<16x1xf32>
    %78 = vector.broadcast %77 : vector<16x1xf32> to vector<16x16xf32>
    %79 = arith.subf %75, %78 : vector<16x16xf32>
    %80 = math.exp %79 : vector<16x16xf32>
    %cst_27 = arith.constant dense<0.000000e+00> : vector<16xf32>
    %81 = vector.multi_reduction <add>, %80, %cst_27 [1] : vector<16x16xf32> to vector<16xf32>
    %82 = vector.shape_cast %81 : vector<16xf32> to vector<16x1xf32>
    %83 = arith.truncf %80 : vector<16x16xf32> to vector<16x16xbf16>
    %cst_28 = arith.constant dense<0.000000e+00> : vector<16x128xf32>
    %84 = tpu.matmul %83, %71, %cst_28 {dimension_numbers = #tpu.dot_dimension_numbers<[1], [0], [0], [1], [0, 0, 1, 1], [], []>} : vector<16x16xbf16>, vector<16x128xbf16>, vector<16x128xf32> -> vector<16x128xf32>
    %85 = tpu.reciprocal %82 {approx = true} : vector<16x1xf32> -> vector<16x1xf32>
    %86 = vector.broadcast %85 : vector<16x1xf32> to vector<16x128xf32>
    %87 = arith.mulf %84, %86 : vector<16x128xf32>
    %88 = vector.extract_strided_slice %29 {offsets = [0, 384], sizes = [16, 128], strides = [1, 1]} : vector<16x4608xbf16> to vector<16x128xbf16>
    %89 = vector.extract_strided_slice %29 {offsets = [0, 1920], sizes = [16, 128], strides = [1, 1]} : vector<16x4608xbf16> to vector<16x128xbf16>
    %90 = vector.extract_strided_slice %29 {offsets = [0, 3456], sizes = [16, 128], strides = [1, 1]} : vector<16x4608xbf16> to vector<16x128xbf16>
    %cst_29 = arith.constant dense<0.000000e+00> : vector<16x16xf32>
    %91 = tpu.matmul %88, %89, %cst_29 {dimension_numbers = #tpu.dot_dimension_numbers<[1], [1], [0], [0], [0, 0, 1, 0], [], []>} : vector<16x128xbf16>, vector<16x128xbf16>, vector<16x16xf32> -> vector<16x16xf32>
    %cst_30 = arith.constant 1.250000e-01 : f32
    %92 = vector.broadcast %cst_30 : f32 to vector<16x16xf32>
    %93 = arith.mulf %91, %92 : vector<16x16xf32>
    %94 = arith.addf %93, %30 : vector<16x16xf32>
    %cst_31 = arith.constant dense<0xFF800000> : vector<16xf32>
    %95 = vector.multi_reduction <maximumf>, %94, %cst_31 [1] : vector<16x16xf32> to vector<16xf32>
    %96 = vector.shape_cast %95 : vector<16xf32> to vector<16x1xf32>
    %97 = vector.broadcast %96 : vector<16x1xf32> to vector<16x16xf32>
    %98 = arith.subf %94, %97 : vector<16x16xf32>
    %99 = math.exp %98 : vector<16x16xf32>
    %cst_32 = arith.constant dense<0.000000e+00> : vector<16xf32>
    %100 = vector.multi_reduction <add>, %99, %cst_32 [1] : vector<16x16xf32> to vector<16xf32>
    %101 = vector.shape_cast %100 : vector<16xf32> to vector<16x1xf32>
    %102 = arith.truncf %99 : vector<16x16xf32> to vector<16x16xbf16>
    %cst_33 = arith.constant dense<0.000000e+00> : vector<16x128xf32>
    %103 = tpu.matmul %102, %90, %cst_33 {dimension_numbers = #tpu.dot_dimension_numbers<[1], [0], [0], [1], [0, 0, 1, 1], [], []>} : vector<16x16xbf16>, vector<16x128xbf16>, vector<16x128xf32> -> vector<16x128xf32>
    %104 = tpu.reciprocal %101 {approx = true} : vector<16x1xf32> -> vector<16x1xf32>
    %105 = vector.broadcast %104 : vector<16x1xf32> to vector<16x128xf32>
    %106 = arith.mulf %103, %105 : vector<16x128xf32>
    %107 = vector.extract_strided_slice %29 {offsets = [0, 512], sizes = [16, 128], strides = [1, 1]} : vector<16x4608xbf16> to vector<16x128xbf16>
    %108 = vector.extract_strided_slice %29 {offsets = [0, 2048], sizes = [16, 128], strides = [1, 1]} : vector<16x4608xbf16> to vector<16x128xbf16>
    %109 = vector.extract_strided_slice %29 {offsets = [0, 3584], sizes = [16, 128], strides = [1, 1]} : vector<16x4608xbf16> to vector<16x128xbf16>
    %cst_34 = arith.constant dense<0.000000e+00> : vector<16x16xf32>
    %110 = tpu.matmul %107, %108, %cst_34 {dimension_numbers = #tpu.dot_dimension_numbers<[1], [1], [0], [0], [0, 0, 1, 0], [], []>} : vector<16x128xbf16>, vector<16x128xbf16>, vector<16x16xf32> -> vector<16x16xf32>
    %cst_35 = arith.constant 1.250000e-01 : f32
    %111 = vector.broadcast %cst_35 : f32 to vector<16x16xf32>
    %112 = arith.mulf %110, %111 : vector<16x16xf32>
    %113 = arith.addf %112, %30 : vector<16x16xf32>
    %cst_36 = arith.constant dense<0xFF800000> : vector<16xf32>
    %114 = vector.multi_reduction <maximumf>, %113, %cst_36 [1] : vector<16x16xf32> to vector<16xf32>
    %115 = vector.shape_cast %114 : vector<16xf32> to vector<16x1xf32>
    %116 = vector.broadcast %115 : vector<16x1xf32> to vector<16x16xf32>
    %117 = arith.subf %113, %116 : vector<16x16xf32>
    %118 = math.exp %117 : vector<16x16xf32>
    %cst_37 = arith.constant dense<0.000000e+00> : vector<16xf32>
    %119 = vector.multi_reduction <add>, %118, %cst_37 [1] : vector<16x16xf32> to vector<16xf32>
    %120 = vector.shape_cast %119 : vector<16xf32> to vector<16x1xf32>
    %121 = arith.truncf %118 : vector<16x16xf32> to vector<16x16xbf16>
    %cst_38 = arith.constant dense<0.000000e+00> : vector<16x128xf32>
    %122 = tpu.matmul %121, %109, %cst_38 {dimension_numbers = #tpu.dot_dimension_numbers<[1], [0], [0], [1], [0, 0, 1, 1], [], []>} : vector<16x16xbf16>, vector<16x128xbf16>, vector<16x128xf32> -> vector<16x128xf32>
    %123 = tpu.reciprocal %120 {approx = true} : vector<16x1xf32> -> vector<16x1xf32>
    %124 = vector.broadcast %123 : vector<16x1xf32> to vector<16x128xf32>
    %125 = arith.mulf %122, %124 : vector<16x128xf32>
    %126 = vector.extract_strided_slice %29 {offsets = [0, 640], sizes = [16, 128], strides = [1, 1]} : vector<16x4608xbf16> to vector<16x128xbf16>
    %127 = vector.extract_strided_slice %29 {offsets = [0, 2176], sizes = [16, 128], strides = [1, 1]} : vector<16x4608xbf16> to vector<16x128xbf16>
    %128 = vector.extract_strided_slice %29 {offsets = [0, 3712], sizes = [16, 128], strides = [1, 1]} : vector<16x4608xbf16> to vector<16x128xbf16>
    %cst_39 = arith.constant dense<0.000000e+00> : vector<16x16xf32>
    %129 = tpu.matmul %126, %127, %cst_39 {dimension_numbers = #tpu.dot_dimension_numbers<[1], [1], [0], [0], [0, 0, 1, 0], [], []>} : vector<16x128xbf16>, vector<16x128xbf16>, vector<16x16xf32> -> vector<16x16xf32>
    %cst_40 = arith.constant 1.250000e-01 : f32
    %130 = vector.broadcast %cst_40 : f32 to vector<16x16xf32>
    %131 = arith.mulf %129, %130 : vector<16x16xf32>
    %132 = arith.addf %131, %30 : vector<16x16xf32>
    %cst_41 = arith.constant dense<0xFF800000> : vector<16xf32>
    %133 = vector.multi_reduction <maximumf>, %132, %cst_41 [1] : vector<16x16xf32> to vector<16xf32>
    %134 = vector.shape_cast %133 : vector<16xf32> to vector<16x1xf32>
    %135 = vector.broadcast %134 : vector<16x1xf32> to vector<16x16xf32>
    %136 = arith.subf %132, %135 : vector<16x16xf32>
    %137 = math.exp %136 : vector<16x16xf32>
    %cst_42 = arith.constant dense<0.000000e+00> : vector<16xf32>
    %138 = vector.multi_reduction <add>, %137, %cst_42 [1] : vector<16x16xf32> to vector<16xf32>
    %139 = vector.shape_cast %138 : vector<16xf32> to vector<16x1xf32>
    %140 = arith.truncf %137 : vector<16x16xf32> to vector<16x16xbf16>
    %cst_43 = arith.constant dense<0.000000e+00> : vector<16x128xf32>
    %141 = tpu.matmul %140, %128, %cst_43 {dimension_numbers = #tpu.dot_dimension_numbers<[1], [0], [0], [1], [0, 0, 1, 1], [], []>} : vector<16x16xbf16>, vector<16x128xbf16>, vector<16x128xf32> -> vector<16x128xf32>
    %142 = tpu.reciprocal %139 {approx = true} : vector<16x1xf32> -> vector<16x1xf32>
    %143 = vector.broadcast %142 : vector<16x1xf32> to vector<16x128xf32>
    %144 = arith.mulf %141, %143 : vector<16x128xf32>
    %145 = vector.extract_strided_slice %29 {offsets = [0, 768], sizes = [16, 128], strides = [1, 1]} : vector<16x4608xbf16> to vector<16x128xbf16>
    %146 = vector.extract_strided_slice %29 {offsets = [0, 2304], sizes = [16, 128], strides = [1, 1]} : vector<16x4608xbf16> to vector<16x128xbf16>
    %147 = vector.extract_strided_slice %29 {offsets = [0, 3840], sizes = [16, 128], strides = [1, 1]} : vector<16x4608xbf16> to vector<16x128xbf16>
    %cst_44 = arith.constant dense<0.000000e+00> : vector<16x16xf32>
    %148 = tpu.matmul %145, %146, %cst_44 {dimension_numbers = #tpu.dot_dimension_numbers<[1], [1], [0], [0], [0, 0, 1, 0], [], []>} : vector<16x128xbf16>, vector<16x128xbf16>, vector<16x16xf32> -> vector<16x16xf32>
    %cst_45 = arith.constant 1.250000e-01 : f32
    %149 = vector.broadcast %cst_45 : f32 to vector<16x16xf32>
    %150 = arith.mulf %148, %149 : vector<16x16xf32>
    %151 = arith.addf %150, %30 : vector<16x16xf32>
    %cst_46 = arith.constant dense<0xFF800000> : vector<16xf32>
    %152 = vector.multi_reduction <maximumf>, %151, %cst_46 [1] : vector<16x16xf32> to vector<16xf32>
    %153 = vector.shape_cast %152 : vector<16xf32> to vector<16x1xf32>
    %154 = vector.broadcast %153 : vector<16x1xf32> to vector<16x16xf32>
    %155 = arith.subf %151, %154 : vector<16x16xf32>
    %156 = math.exp %155 : vector<16x16xf32>
    %cst_47 = arith.constant dense<0.000000e+00> : vector<16xf32>
    %157 = vector.multi_reduction <add>, %156, %cst_47 [1] : vector<16x16xf32> to vector<16xf32>
    %158 = vector.shape_cast %157 : vector<16xf32> to vector<16x1xf32>
    %159 = arith.truncf %156 : vector<16x16xf32> to vector<16x16xbf16>
    %cst_48 = arith.constant dense<0.000000e+00> : vector<16x128xf32>
    %160 = tpu.matmul %159, %147, %cst_48 {dimension_numbers = #tpu.dot_dimension_numbers<[1], [0], [0], [1], [0, 0, 1, 1], [], []>} : vector<16x16xbf16>, vector<16x128xbf16>, vector<16x128xf32> -> vector<16x128xf32>
    %161 = tpu.reciprocal %158 {approx = true} : vector<16x1xf32> -> vector<16x1xf32>
    %162 = vector.broadcast %161 : vector<16x1xf32> to vector<16x128xf32>
    %163 = arith.mulf %160, %162 : vector<16x128xf32>
    %164 = vector.extract_strided_slice %29 {offsets = [0, 896], sizes = [16, 128], strides = [1, 1]} : vector<16x4608xbf16> to vector<16x128xbf16>
    %165 = vector.extract_strided_slice %29 {offsets = [0, 2432], sizes = [16, 128], strides = [1, 1]} : vector<16x4608xbf16> to vector<16x128xbf16>
    %166 = vector.extract_strided_slice %29 {offsets = [0, 3968], sizes = [16, 128], strides = [1, 1]} : vector<16x4608xbf16> to vector<16x128xbf16>
    %cst_49 = arith.constant dense<0.000000e+00> : vector<16x16xf32>
    %167 = tpu.matmul %164, %165, %cst_49 {dimension_numbers = #tpu.dot_dimension_numbers<[1], [1], [0], [0], [0, 0, 1, 0], [], []>} : vector<16x128xbf16>, vector<16x128xbf16>, vector<16x16xf32> -> vector<16x16xf32>
    %cst_50 = arith.constant 1.250000e-01 : f32
    %168 = vector.broadcast %cst_50 : f32 to vector<16x16xf32>
    %169 = arith.mulf %167, %168 : vector<16x16xf32>
    %170 = arith.addf %169, %30 : vector<16x16xf32>
    %cst_51 = arith.constant dense<0xFF800000> : vector<16xf32>
    %171 = vector.multi_reduction <maximumf>, %170, %cst_51 [1] : vector<16x16xf32> to vector<16xf32>
    %172 = vector.shape_cast %171 : vector<16xf32> to vector<16x1xf32>
    %173 = vector.broadcast %172 : vector<16x1xf32> to vector<16x16xf32>
    %174 = arith.subf %170, %173 : vector<16x16xf32>
    %175 = math.exp %174 : vector<16x16xf32>
    %cst_52 = arith.constant dense<0.000000e+00> : vector<16xf32>
    %176 = vector.multi_reduction <add>, %175, %cst_52 [1] : vector<16x16xf32> to vector<16xf32>
    %177 = vector.shape_cast %176 : vector<16xf32> to vector<16x1xf32>
    %178 = arith.truncf %175 : vector<16x16xf32> to vector<16x16xbf16>
    %cst_53 = arith.constant dense<0.000000e+00> : vector<16x128xf32>
    %179 = tpu.matmul %178, %166, %cst_53 {dimension_numbers = #tpu.dot_dimension_numbers<[1], [0], [0], [1], [0, 0, 1, 1], [], []>} : vector<16x16xbf16>, vector<16x128xbf16>, vector<16x128xf32> -> vector<16x128xf32>
    %180 = tpu.reciprocal %177 {approx = true} : vector<16x1xf32> -> vector<16x1xf32>
    %181 = vector.broadcast %180 : vector<16x1xf32> to vector<16x128xf32>
    %182 = arith.mulf %179, %181 : vector<16x128xf32>
    %183 = vector.extract_strided_slice %29 {offsets = [0, 1024], sizes = [16, 128], strides = [1, 1]} : vector<16x4608xbf16> to vector<16x128xbf16>
    %184 = vector.extract_strided_slice %29 {offsets = [0, 2560], sizes = [16, 128], strides = [1, 1]} : vector<16x4608xbf16> to vector<16x128xbf16>
    %185 = vector.extract_strided_slice %29 {offsets = [0, 4096], sizes = [16, 128], strides = [1, 1]} : vector<16x4608xbf16> to vector<16x128xbf16>
    %cst_54 = arith.constant dense<0.000000e+00> : vector<16x16xf32>
    %186 = tpu.matmul %183, %184, %cst_54 {dimension_numbers = #tpu.dot_dimension_numbers<[1], [1], [0], [0], [0, 0, 1, 0], [], []>} : vector<16x128xbf16>, vector<16x128xbf16>, vector<16x16xf32> -> vector<16x16xf32>
    %cst_55 = arith.constant 1.250000e-01 : f32
    %187 = vector.broadcast %cst_55 : f32 to vector<16x16xf32>
    %188 = arith.mulf %186, %187 : vector<16x16xf32>
    %189 = arith.addf %188, %30 : vector<16x16xf32>
    %cst_56 = arith.constant dense<0xFF800000> : vector<16xf32>
    %190 = vector.multi_reduction <maximumf>, %189, %cst_56 [1] : vector<16x16xf32> to vector<16xf32>
    %191 = vector.shape_cast %190 : vector<16xf32> to vector<16x1xf32>
    %192 = vector.broadcast %191 : vector<16x1xf32> to vector<16x16xf32>
    %193 = arith.subf %189, %192 : vector<16x16xf32>
    %194 = math.exp %193 : vector<16x16xf32>
    %cst_57 = arith.constant dense<0.000000e+00> : vector<16xf32>
    %195 = vector.multi_reduction <add>, %194, %cst_57 [1] : vector<16x16xf32> to vector<16xf32>
    %196 = vector.shape_cast %195 : vector<16xf32> to vector<16x1xf32>
    %197 = arith.truncf %194 : vector<16x16xf32> to vector<16x16xbf16>
    %cst_58 = arith.constant dense<0.000000e+00> : vector<16x128xf32>
    %198 = tpu.matmul %197, %185, %cst_58 {dimension_numbers = #tpu.dot_dimension_numbers<[1], [0], [0], [1], [0, 0, 1, 1], [], []>} : vector<16x16xbf16>, vector<16x128xbf16>, vector<16x128xf32> -> vector<16x128xf32>
    %199 = tpu.reciprocal %196 {approx = true} : vector<16x1xf32> -> vector<16x1xf32>
    %200 = vector.broadcast %199 : vector<16x1xf32> to vector<16x128xf32>
    %201 = arith.mulf %198, %200 : vector<16x128xf32>
    %202 = vector.extract_strided_slice %29 {offsets = [0, 1152], sizes = [16, 128], strides = [1, 1]} : vector<16x4608xbf16> to vector<16x128xbf16>
    %203 = vector.extract_strided_slice %29 {offsets = [0, 2688], sizes = [16, 128], strides = [1, 1]} : vector<16x4608xbf16> to vector<16x128xbf16>
    %204 = vector.extract_strided_slice %29 {offsets = [0, 4224], sizes = [16, 128], strides = [1, 1]} : vector<16x4608xbf16> to vector<16x128xbf16>
    %cst_59 = arith.constant dense<0.000000e+00> : vector<16x16xf32>
    %205 = tpu.matmul %202, %203, %cst_59 {dimension_numbers = #tpu.dot_dimension_numbers<[1], [1], [0], [0], [0, 0, 1, 0], [], []>} : vector<16x128xbf16>, vector<16x128xbf16>, vector<16x16xf32> -> vector<16x16xf32>
    %cst_60 = arith.constant 1.250000e-01 : f32
    %206 = vector.broadcast %cst_60 : f32 to vector<16x16xf32>
    %207 = arith.mulf %205, %206 : vector<16x16xf32>
    %208 = arith.addf %207, %30 : vector<16x16xf32>
    %cst_61 = arith.constant dense<0xFF800000> : vector<16xf32>
    %209 = vector.multi_reduction <maximumf>, %208, %cst_61 [1] : vector<16x16xf32> to vector<16xf32>
    %210 = vector.shape_cast %209 : vector<16xf32> to vector<16x1xf32>
    %211 = vector.broadcast %210 : vector<16x1xf32> to vector<16x16xf32>
    %212 = arith.subf %208, %211 : vector<16x16xf32>
    %213 = math.exp %212 : vector<16x16xf32>
    %cst_62 = arith.constant dense<0.000000e+00> : vector<16xf32>
    %214 = vector.multi_reduction <add>, %213, %cst_62 [1] : vector<16x16xf32> to vector<16xf32>
    %215 = vector.shape_cast %214 : vector<16xf32> to vector<16x1xf32>
    %216 = arith.truncf %213 : vector<16x16xf32> to vector<16x16xbf16>
    %cst_63 = arith.constant dense<0.000000e+00> : vector<16x128xf32>
    %217 = tpu.matmul %216, %204, %cst_63 {dimension_numbers = #tpu.dot_dimension_numbers<[1], [0], [0], [1], [0, 0, 1, 1], [], []>} : vector<16x16xbf16>, vector<16x128xbf16>, vector<16x128xf32> -> vector<16x128xf32>
    %218 = tpu.reciprocal %215 {approx = true} : vector<16x1xf32> -> vector<16x1xf32>
    %219 = vector.broadcast %218 : vector<16x1xf32> to vector<16x128xf32>
    %220 = arith.mulf %217, %219 : vector<16x128xf32>
    %221 = vector.extract_strided_slice %29 {offsets = [0, 1280], sizes = [16, 128], strides = [1, 1]} : vector<16x4608xbf16> to vector<16x128xbf16>
    %222 = vector.extract_strided_slice %29 {offsets = [0, 2816], sizes = [16, 128], strides = [1, 1]} : vector<16x4608xbf16> to vector<16x128xbf16>
    %223 = vector.extract_strided_slice %29 {offsets = [0, 4352], sizes = [16, 128], strides = [1, 1]} : vector<16x4608xbf16> to vector<16x128xbf16>
    %cst_64 = arith.constant dense<0.000000e+00> : vector<16x16xf32>
    %224 = tpu.matmul %221, %222, %cst_64 {dimension_numbers = #tpu.dot_dimension_numbers<[1], [1], [0], [0], [0, 0, 1, 0], [], []>} : vector<16x128xbf16>, vector<16x128xbf16>, vector<16x16xf32> -> vector<16x16xf32>
    %cst_65 = arith.constant 1.250000e-01 : f32
    %225 = vector.broadcast %cst_65 : f32 to vector<16x16xf32>
    %226 = arith.mulf %224, %225 : vector<16x16xf32>
    %227 = arith.addf %226, %30 : vector<16x16xf32>
    %cst_66 = arith.constant dense<0xFF800000> : vector<16xf32>
    %228 = vector.multi_reduction <maximumf>, %227, %cst_66 [1] : vector<16x16xf32> to vector<16xf32>
    %229 = vector.shape_cast %228 : vector<16xf32> to vector<16x1xf32>
    %230 = vector.broadcast %229 : vector<16x1xf32> to vector<16x16xf32>
    %231 = arith.subf %227, %230 : vector<16x16xf32>
    %232 = math.exp %231 : vector<16x16xf32>
    %cst_67 = arith.constant dense<0.000000e+00> : vector<16xf32>
    %233 = vector.multi_reduction <add>, %232, %cst_67 [1] : vector<16x16xf32> to vector<16xf32>
    %234 = vector.shape_cast %233 : vector<16xf32> to vector<16x1xf32>
    %235 = arith.truncf %232 : vector<16x16xf32> to vector<16x16xbf16>
    %cst_68 = arith.constant dense<0.000000e+00> : vector<16x128xf32>
    %236 = tpu.matmul %235, %223, %cst_68 {dimension_numbers = #tpu.dot_dimension_numbers<[1], [0], [0], [1], [0, 0, 1, 1], [], []>} : vector<16x16xbf16>, vector<16x128xbf16>, vector<16x128xf32> -> vector<16x128xf32>
    %237 = tpu.reciprocal %234 {approx = true} : vector<16x1xf32> -> vector<16x1xf32>
    %238 = vector.broadcast %237 : vector<16x1xf32> to vector<16x128xf32>
    %239 = arith.mulf %236, %238 : vector<16x128xf32>
    %240 = vector.extract_strided_slice %29 {offsets = [0, 1408], sizes = [16, 128], strides = [1, 1]} : vector<16x4608xbf16> to vector<16x128xbf16>
    %241 = vector.extract_strided_slice %29 {offsets = [0, 2944], sizes = [16, 128], strides = [1, 1]} : vector<16x4608xbf16> to vector<16x128xbf16>
    %242 = vector.extract_strided_slice %29 {offsets = [0, 4480], sizes = [16, 128], strides = [1, 1]} : vector<16x4608xbf16> to vector<16x128xbf16>
    %cst_69 = arith.constant dense<0.000000e+00> : vector<16x16xf32>
    %243 = tpu.matmul %240, %241, %cst_69 {dimension_numbers = #tpu.dot_dimension_numbers<[1], [1], [0], [0], [0, 0, 1, 0], [], []>} : vector<16x128xbf16>, vector<16x128xbf16>, vector<16x16xf32> -> vector<16x16xf32>
    %cst_70 = arith.constant 1.250000e-01 : f32
    %244 = vector.broadcast %cst_70 : f32 to vector<16x16xf32>
    %245 = arith.mulf %243, %244 : vector<16x16xf32>
    %246 = arith.addf %245, %30 : vector<16x16xf32>
    %cst_71 = arith.constant dense<0xFF800000> : vector<16xf32>
    %247 = vector.multi_reduction <maximumf>, %246, %cst_71 [1] : vector<16x16xf32> to vector<16xf32>
    %248 = vector.shape_cast %247 : vector<16xf32> to vector<16x1xf32>
    %249 = vector.broadcast %248 : vector<16x1xf32> to vector<16x16xf32>
    %250 = arith.subf %246, %249 : vector<16x16xf32>
    %251 = math.exp %250 : vector<16x16xf32>
    %cst_72 = arith.constant dense<0.000000e+00> : vector<16xf32>
    %252 = vector.multi_reduction <add>, %251, %cst_72 [1] : vector<16x16xf32> to vector<16xf32>
    %253 = vector.shape_cast %252 : vector<16xf32> to vector<16x1xf32>
    %254 = arith.truncf %251 : vector<16x16xf32> to vector<16x16xbf16>
    %cst_73 = arith.constant dense<0.000000e+00> : vector<16x128xf32>
    %255 = tpu.matmul %254, %242, %cst_73 {dimension_numbers = #tpu.dot_dimension_numbers<[1], [0], [0], [1], [0, 0, 1, 1], [], []>} : vector<16x16xbf16>, vector<16x128xbf16>, vector<16x128xf32> -> vector<16x128xf32>
    %256 = tpu.reciprocal %253 {approx = true} : vector<16x1xf32> -> vector<16x1xf32>
    %257 = vector.broadcast %256 : vector<16x1xf32> to vector<16x128xf32>
    %258 = arith.mulf %255, %257 : vector<16x128xf32>
    %259 = tpu.concatenate %49, %68, %87, %106, %125, %144, %163, %182, %201, %220, %239, %258 in 1 : vector<16x128xf32>, vector<16x128xf32>, vector<16x128xf32>, vector<16x128xf32>, vector<16x128xf32>, vector<16x128xf32>, vector<16x128xf32>, vector<16x128xf32>, vector<16x128xf32>, vector<16x128xf32>, vector<16x128xf32>, vector<16x128xf32> -> vector<16x1536xf32>
    %260 = arith.truncf %259 : vector<16x1536xf32> to vector<16x1536xbf16>
    %c0_74 = arith.constant 0 : index
    %c0_75 = arith.constant 0 : index
    %261 = vector.load %arg5[%c0_74, %c0_75] : memref<1536x128xbf16, #tpu.memory_space<vmem>>, vector<1536x128xbf16>
    %cst_76 = arith.constant dense<0.000000e+00> : vector<16x128xf32>
    %262 = tpu.matmul %260, %261, %cst_76 {dimension_numbers = #tpu.dot_dimension_numbers<[1], [0], [0], [1], [0, 0, 1, 1], [], []>} : vector<16x1536xbf16>, vector<1536x128xbf16>, vector<16x128xf32> -> vector<16x128xf32>
    %c0_77 = arith.constant 0 : index
    %c0_78 = arith.constant 0 : index
    %263 = vector.load %arg6[%c0_77, %c0_78] : memref<1x128xf32, #tpu.memory_space<vmem>>, vector<1x128xf32>
    %264 = vector.broadcast %263 : vector<1x128xf32> to vector<16x128xf32>
    %265 = arith.addf %262, %264 : vector<16x128xf32>
    %266 = arith.addf %1, %265 : vector<16x128xf32>
    %267 = arith.truncf %266 : vector<16x128xf32> to vector<16x128xbf16>
    %c0_79 = arith.constant 0 : index
    %c0_80 = arith.constant 0 : index
    %268 = vector.load %arg8[%c0_79, %c0_80] : memref<16x128xbf16, #tpu.memory_space<vmem>>, vector<16x128xbf16>
    tpu.vector_store %arg8[%c0_79, %c0_80], %267 {strides = array<i32>} : memref<16x128xbf16, #tpu.memory_space<vmem>>, vector<16x128xbf16>,
    return
  }
  func.func @transform_0(%arg0: i32) -> (i32, i32) {
    %c0_i32 = arith.constant 0 : i32
    %c0_i32_0 = arith.constant 0 : i32
    %c0_i32_1 = arith.constant 0 : i32
    return %c0_i32, %c0_i32_0 : i32, i32
  }
  func.func @transform_1(%arg0: i32) -> (i32, i32) {
    %c0_i32 = arith.constant 0 : i32
    %c0_i32_0 = arith.constant 0 : i32
    %c0_i32_1 = arith.constant 0 : i32
    return %c0_i32, %c0_i32_0 : i32, i32
  }
  func.func @transform_2(%arg0: i32) -> (i32, i32) {
    %c0_i32 = arith.constant 0 : i32
    %c0_i32_0 = arith.constant 0 : i32
    %c0_i32_1 = arith.constant 0 : i32
    return %c0_i32, %c0_i32_0 : i32, i32
  }
  func.func @transform_3(%arg0: i32) -> (i32, i32) {
    %c0_i32 = arith.constant 0 : i32
    %c0_i32_0 = arith.constant 0 : i32
    %c0_i32_1 = arith.constant 0 : i32
    return %c0_i32, %c0_i32_0 : i32, i32
  }
  func.func @transform_4(%arg0: i32) -> (i32, i32) {
    %c0_i32 = arith.constant 0 : i32
    %c0_i32_0 = arith.constant 0 : i32
    %c0_i32_1 = arith.constant 0 : i32
    return %c0_i32, %c0_i32_0 : i32, i32
  }
  func.func @transform_5(%arg0: i32) -> (i32, i32) {
    %c0_i32 = arith.constant 0 : i32
    %c0_i32_0 = arith.constant 0 : i32
    %c0_i32_1 = arith.constant 0 : i32
    return %c0_i32, %c0_i32_0 : i32, i32
  }
  func.func @transform_6(%arg0: i32) -> (i32, i32) {
    %c0_i32 = arith.constant 0 : i32
    %c0_i32_0 = arith.constant 0 : i32
    %c0_i32_1 = arith.constant 0 : i32
    return %c0_i32, %c0_i32_0 : i32, i32
  }
  func.func @transform_7(%arg0: i32) -> (i32, i32) {
    %c0_i32 = arith.constant 0 : i32
    %c0_i32_0 = arith.constant 0 : i32
    %c0_i32_1 = arith.constant 0 : i32
    return %c0_i32, %c0_i32_0 : i32, i32
  }
}

module attributes {stable_mosaic.version = 11 : i64} {
  func.func @_mlp_block_kernel(%arg0: i32, %arg1: memref<16x128xbf16, #tpu.memory_space<vmem>>, %arg2: memref<1x128xf32, #tpu.memory_space<vmem>>, %arg3: memref<1x128xf32, #tpu.memory_space<vmem>>, %arg4: memref<128x256xbf16, #tpu.memory_space<vmem>>, %arg5: memref<1x256xf32, #tpu.memory_space<vmem>>, %arg6: memref<256x128xbf16, #tpu.memory_space<vmem>>, %arg7: memref<1x128xf32, #tpu.memory_space<vmem>>, %arg8: memref<16x128xbf16, #tpu.memory_space<vmem>>) attributes {dimension_semantics = [#tpu.dimension_semantics<arbitrary>], iteration_bounds = array<i64: 1>, scalar_prefetch = 0 : i64, scratch_operands = 0 : i64, tpu.core_type = #tpu.core_type<tc>, window_params = [{pipeline_mode = #tpu.pipeline_mode<synchronous>, transform_indices = @transform_0, window_bounds = array<i64: 16, 128>}, {pipeline_mode = #tpu.pipeline_mode<synchronous>, transform_indices = @transform_1, window_bounds = array<i64: 1, 128>}, {pipeline_mode = #tpu.pipeline_mode<synchronous>, transform_indices = @transform_2, window_bounds = array<i64: 1, 128>}, {pipeline_mode = #tpu.pipeline_mode<synchronous>, transform_indices = @transform_3, window_bounds = array<i64: 128, 256>}, {pipeline_mode = #tpu.pipeline_mode<synchronous>, transform_indices = @transform_4, window_bounds = array<i64: 1, 256>}, {pipeline_mode = #tpu.pipeline_mode<synchronous>, transform_indices = @transform_5, window_bounds = array<i64: 256, 128>}, {pipeline_mode = #tpu.pipeline_mode<synchronous>, transform_indices = @transform_6, window_bounds = array<i64: 1, 128>}, {pipeline_mode = #tpu.pipeline_mode<synchronous>, transform_indices = @transform_7, window_bounds = array<i64: 16, 128>}]} {
    %c0 = arith.constant 0 : index
    %c0_0 = arith.constant 0 : index
    %0 = vector.load %arg1[%c0, %c0_0] : memref<16x128xbf16, #tpu.memory_space<vmem>>, vector<16x128xbf16>
    %1 = arith.extf %0 : vector<16x128xbf16> to vector<16x128xf32>
    %c0_1 = arith.constant 0 : index
    %c0_2 = arith.constant 0 : index
    %2 = vector.load %arg2[%c0_1, %c0_2] : memref<1x128xf32, #tpu.memory_space<vmem>>, vector<1x128xf32>
    %c0_3 = arith.constant 0 : index
    %c0_4 = arith.constant 0 : index
    %3 = vector.load %arg3[%c0_3, %c0_4] : memref<1x128xf32, #tpu.memory_space<vmem>>, vector<1x128xf32>
    %cst = arith.constant dense<0.000000e+00> : vector<16xf32>
    %4 = vector.multi_reduction <add>, %1, %cst [1] : vector<16x128xf32> to vector<16xf32>
    %5 = vector.shape_cast %4 : vector<16xf32> to vector<16x1xf32>
    %cst_5 = arith.constant 1.280000e+02 : f32
    %6 = vector.broadcast %cst_5 : f32 to vector<16x1xf32>
    %7 = arith.divf %5, %6 : vector<16x1xf32>
    %8 = vector.broadcast %7 : vector<16x1xf32> to vector<16x128xf32>
    %9 = arith.subf %1, %8 : vector<16x128xf32>
    %10 = arith.mulf %9, %9 : vector<16x128xf32>
    %cst_6 = arith.constant dense<0.000000e+00> : vector<16xf32>
    %11 = vector.multi_reduction <add>, %10, %cst_6 [1] : vector<16x128xf32> to vector<16xf32>
    %12 = vector.shape_cast %11 : vector<16xf32> to vector<16x1xf32>
    %cst_7 = arith.constant 1.280000e+02 : f32
    %13 = vector.broadcast %cst_7 : f32 to vector<16x1xf32>
    %14 = arith.divf %12, %13 : vector<16x1xf32>
    %15 = vector.broadcast %7 : vector<16x1xf32> to vector<16x128xf32>
    %16 = arith.subf %1, %15 : vector<16x128xf32>
    %cst_8 = arith.constant 9.99999974E-6 : f32
    %17 = vector.broadcast %cst_8 : f32 to vector<16x1xf32>
    %18 = arith.addf %14, %17 : vector<16x1xf32>
    %19 = math.rsqrt %18 : vector<16x1xf32>
    %20 = vector.broadcast %19 : vector<16x1xf32> to vector<16x128xf32>
    %21 = arith.mulf %16, %20 : vector<16x128xf32>
    %22 = vector.broadcast %2 : vector<1x128xf32> to vector<16x128xf32>
    %23 = arith.mulf %21, %22 : vector<16x128xf32>
    %24 = vector.broadcast %3 : vector<1x128xf32> to vector<16x128xf32>
    %25 = arith.addf %23, %24 : vector<16x128xf32>
    %26 = arith.truncf %25 : vector<16x128xf32> to vector<16x128xbf16>
    %c0_9 = arith.constant 0 : index
    %c0_10 = arith.constant 0 : index
    %27 = vector.load %arg4[%c0_9, %c0_10] : memref<128x256xbf16, #tpu.memory_space<vmem>>, vector<128x256xbf16>
    %cst_11 = arith.constant dense<0.000000e+00> : vector<16x256xf32>
    %28 = tpu.matmul %26, %27, %cst_11 {dimension_numbers = #tpu.dot_dimension_numbers<[1], [0], [0], [1], [0, 0, 1, 1], [], []>} : vector<16x128xbf16>, vector<128x256xbf16>, vector<16x256xf32> -> vector<16x256xf32>
    %c0_12 = arith.constant 0 : index
    %c0_13 = arith.constant 0 : index
    %29 = vector.load %arg5[%c0_12, %c0_13] : memref<1x256xf32, #tpu.memory_space<vmem>>, vector<1x256xf32>
    %30 = vector.broadcast %29 : vector<1x256xf32> to vector<16x256xf32>
    %31 = arith.addf %28, %30 : vector<16x256xf32>
    %cst_14 = arith.constant 5.000000e-01 : f32
    %32 = vector.broadcast %cst_14 : f32 to vector<16x256xf32>
    %33 = arith.mulf %32, %31 : vector<16x256xf32>
    %cst_15 = arith.constant 4.471500e-02 : f32
    %34 = vector.broadcast %cst_15 : f32 to vector<16x256xf32>
    %35 = arith.mulf %34, %31 : vector<16x256xf32>
    %36 = arith.mulf %35, %31 : vector<16x256xf32>
    %37 = arith.mulf %36, %31 : vector<16x256xf32>
    %38 = arith.addf %31, %37 : vector<16x256xf32>
    %cst_16 = arith.constant 0.797884583 : f32
    %39 = vector.broadcast %cst_16 : f32 to vector<16x256xf32>
    %40 = arith.mulf %39, %38 : vector<16x256xf32>
    %41 = math.tanh %40 : vector<16x256xf32>
    %cst_17 = arith.constant 1.000000e+00 : f32
    %42 = vector.broadcast %cst_17 : f32 to vector<16x256xf32>
    %43 = arith.addf %42, %41 : vector<16x256xf32>
    %44 = arith.mulf %33, %43 : vector<16x256xf32>
    %45 = arith.truncf %44 : vector<16x256xf32> to vector<16x256xbf16>
    %c0_18 = arith.constant 0 : index
    %c0_19 = arith.constant 0 : index
    %46 = vector.load %arg6[%c0_18, %c0_19] : memref<256x128xbf16, #tpu.memory_space<vmem>>, vector<256x128xbf16>
    %cst_20 = arith.constant dense<0.000000e+00> : vector<16x128xf32>
    %47 = tpu.matmul %45, %46, %cst_20 {dimension_numbers = #tpu.dot_dimension_numbers<[1], [0], [0], [1], [0, 0, 1, 1], [], []>} : vector<16x256xbf16>, vector<256x128xbf16>, vector<16x128xf32> -> vector<16x128xf32>
    %c0_21 = arith.constant 0 : index
    %c0_22 = arith.constant 0 : index
    %48 = vector.load %arg7[%c0_21, %c0_22] : memref<1x128xf32, #tpu.memory_space<vmem>>, vector<1x128xf32>
    %49 = vector.broadcast %48 : vector<1x128xf32> to vector<16x128xf32>
    %50 = arith.addf %47, %49 : vector<16x128xf32>
    %51 = arith.addf %1, %50 : vector<16x128xf32>
    %52 = arith.truncf %51 : vector<16x128xf32> to vector<16x128xbf16>
    %c0_23 = arith.constant 0 : index
    %c0_24 = arith.constant 0 : index
    %53 = vector.load %arg8[%c0_23, %c0_24] : memref<16x128xbf16, #tpu.memory_space<vmem>>, vector<16x128xbf16>
    tpu.vector_store %arg8[%c0_23, %c0_24], %52 {strides = array<i32>} : memref<16x128xbf16, #tpu.memory_space<vmem>>, vector<16x128xbf16>,
    return
  }
  func.func @transform_0(%arg0: i32) -> (i32, i32) {
    %c0_i32 = arith.constant 0 : i32
    %c0_i32_0 = arith.constant 0 : i32
    %c0_i32_1 = arith.constant 0 : i32
    return %c0_i32, %c0_i32_0 : i32, i32
  }
  func.func @transform_1(%arg0: i32) -> (i32, i32) {
    %c0_i32 = arith.constant 0 : i32
    %c0_i32_0 = arith.constant 0 : i32
    %c0_i32_1 = arith.constant 0 : i32
    return %c0_i32, %c0_i32_0 : i32, i32
  }
  func.func @transform_2(%arg0: i32) -> (i32, i32) {
    %c0_i32 = arith.constant 0 : i32
    %c0_i32_0 = arith.constant 0 : i32
    %c0_i32_1 = arith.constant 0 : i32
    return %c0_i32, %c0_i32_0 : i32, i32
  }
  func.func @transform_3(%arg0: i32) -> (i32, i32) {
    %c0_i32 = arith.constant 0 : i32
    %c0_i32_0 = arith.constant 0 : i32
    %c0_i32_1 = arith.constant 0 : i32
    return %c0_i32, %c0_i32_0 : i32, i32
  }
  func.func @transform_4(%arg0: i32) -> (i32, i32) {
    %c0_i32 = arith.constant 0 : i32
    %c0_i32_0 = arith.constant 0 : i32
    %c0_i32_1 = arith.constant 0 : i32
    return %c0_i32, %c0_i32_0 : i32, i32
  }
  func.func @transform_5(%arg0: i32) -> (i32, i32) {
    %c0_i32 = arith.constant 0 : i32
    %c0_i32_0 = arith.constant 0 : i32
    %c0_i32_1 = arith.constant 0 : i32
    return %c0_i32, %c0_i32_0 : i32, i32
  }
  func.func @transform_6(%arg0: i32) -> (i32, i32) {
    %c0_i32 = arith.constant 0 : i32
    %c0_i32_0 = arith.constant 0 : i32
    %c0_i32_1 = arith.constant 0 : i32
    return %c0_i32, %c0_i32_0 : i32, i32
  }
  func.func @transform_7(%arg0: i32) -> (i32, i32) {
    %c0_i32 = arith.constant 0 : i32
    %c0_i32_0 = arith.constant 0 : i32
    %c0_i32_1 = arith.constant 0 : i32
    return %c0_i32, %c0_i32_0 : i32, i32
  }
}

module attributes {stable_mosaic.version = 11 : i64} {
  func.func @_head_kernel(%arg0: i32, %arg1: memref<8x128xbf16, #tpu.memory_space<vmem>>, %arg2: memref<1x128xf32, #tpu.memory_space<vmem>>, %arg3: memref<1x128xf32, #tpu.memory_space<vmem>>, %arg4: memref<128x128xbf16, #tpu.memory_space<vmem>>, %arg5: memref<1x128xf32, #tpu.memory_space<vmem>>, %arg6: memref<8x128xf32, #tpu.memory_space<vmem>>) attributes {dimension_semantics = [#tpu.dimension_semantics<arbitrary>], iteration_bounds = array<i64: 1>, scalar_prefetch = 0 : i64, scratch_operands = 0 : i64, tpu.core_type = #tpu.core_type<tc>, window_params = [{pipeline_mode = #tpu.pipeline_mode<synchronous>, transform_indices = @transform_0, window_bounds = array<i64: 8, 128>}, {pipeline_mode = #tpu.pipeline_mode<synchronous>, transform_indices = @transform_1, window_bounds = array<i64: 1, 128>}, {pipeline_mode = #tpu.pipeline_mode<synchronous>, transform_indices = @transform_2, window_bounds = array<i64: 1, 128>}, {pipeline_mode = #tpu.pipeline_mode<synchronous>, transform_indices = @transform_3, window_bounds = array<i64: 128, 128>}, {pipeline_mode = #tpu.pipeline_mode<synchronous>, transform_indices = @transform_4, window_bounds = array<i64: 1, 128>}, {pipeline_mode = #tpu.pipeline_mode<synchronous>, transform_indices = @transform_5, window_bounds = array<i64: 8, 128>}]} {
    %c0 = arith.constant 0 : index
    %c0_0 = arith.constant 0 : index
    %0 = vector.load %arg1[%c0, %c0_0] : memref<8x128xbf16, #tpu.memory_space<vmem>>, vector<8x128xbf16>
    %1 = arith.extf %0 : vector<8x128xbf16> to vector<8x128xf32>
    %c0_1 = arith.constant 0 : index
    %c0_2 = arith.constant 0 : index
    %2 = vector.load %arg2[%c0_1, %c0_2] : memref<1x128xf32, #tpu.memory_space<vmem>>, vector<1x128xf32>
    %c0_3 = arith.constant 0 : index
    %c0_4 = arith.constant 0 : index
    %3 = vector.load %arg3[%c0_3, %c0_4] : memref<1x128xf32, #tpu.memory_space<vmem>>, vector<1x128xf32>
    %cst = arith.constant dense<0.000000e+00> : vector<8xf32>
    %4 = vector.multi_reduction <add>, %1, %cst [1] : vector<8x128xf32> to vector<8xf32>
    %5 = vector.shape_cast %4 : vector<8xf32> to vector<8x1xf32>
    %cst_5 = arith.constant 1.280000e+02 : f32
    %6 = vector.broadcast %cst_5 : f32 to vector<8x1xf32>
    %7 = arith.divf %5, %6 : vector<8x1xf32>
    %8 = vector.broadcast %7 : vector<8x1xf32> to vector<8x128xf32>
    %9 = arith.subf %1, %8 : vector<8x128xf32>
    %10 = arith.mulf %9, %9 : vector<8x128xf32>
    %cst_6 = arith.constant dense<0.000000e+00> : vector<8xf32>
    %11 = vector.multi_reduction <add>, %10, %cst_6 [1] : vector<8x128xf32> to vector<8xf32>
    %12 = vector.shape_cast %11 : vector<8xf32> to vector<8x1xf32>
    %cst_7 = arith.constant 1.280000e+02 : f32
    %13 = vector.broadcast %cst_7 : f32 to vector<8x1xf32>
    %14 = arith.divf %12, %13 : vector<8x1xf32>
    %15 = vector.broadcast %7 : vector<8x1xf32> to vector<8x128xf32>
    %16 = arith.subf %1, %15 : vector<8x128xf32>
    %cst_8 = arith.constant 9.99999974E-6 : f32
    %17 = vector.broadcast %cst_8 : f32 to vector<8x1xf32>
    %18 = arith.addf %14, %17 : vector<8x1xf32>
    %19 = math.rsqrt %18 : vector<8x1xf32>
    %20 = vector.broadcast %19 : vector<8x1xf32> to vector<8x128xf32>
    %21 = arith.mulf %16, %20 : vector<8x128xf32>
    %22 = vector.broadcast %2 : vector<1x128xf32> to vector<8x128xf32>
    %23 = arith.mulf %21, %22 : vector<8x128xf32>
    %24 = vector.broadcast %3 : vector<1x128xf32> to vector<8x128xf32>
    %25 = arith.addf %23, %24 : vector<8x128xf32>
    %26 = arith.truncf %25 : vector<8x128xf32> to vector<8x128xbf16>
    %c0_9 = arith.constant 0 : index
    %c0_10 = arith.constant 0 : index
    %27 = vector.load %arg4[%c0_9, %c0_10] : memref<128x128xbf16, #tpu.memory_space<vmem>>, vector<128x128xbf16>
    %cst_11 = arith.constant dense<0.000000e+00> : vector<8x128xf32>
    %28 = tpu.matmul %26, %27, %cst_11 {dimension_numbers = #tpu.dot_dimension_numbers<[1], [0], [0], [1], [0, 0, 1, 1], [], []>} : vector<8x128xbf16>, vector<128x128xbf16>, vector<8x128xf32> -> vector<8x128xf32>
    %c0_12 = arith.constant 0 : index
    %c0_13 = arith.constant 0 : index
    %29 = vector.load %arg5[%c0_12, %c0_13] : memref<1x128xf32, #tpu.memory_space<vmem>>, vector<1x128xf32>
    %30 = vector.broadcast %29 : vector<1x128xf32> to vector<8x128xf32>
    %31 = arith.addf %28, %30 : vector<8x128xf32>
    %c0_14 = arith.constant 0 : index
    %c0_15 = arith.constant 0 : index
    %32 = vector.load %arg6[%c0_14, %c0_15] : memref<8x128xf32, #tpu.memory_space<vmem>>, vector<8x128xf32>
    tpu.vector_store %arg6[%c0_14, %c0_15], %31 {strides = array<i32>} : memref<8x128xf32, #tpu.memory_space<vmem>>, vector<8x128xf32>,
    return
  }
  func.func @transform_0(%arg0: i32) -> (i32, i32) {
    %c0_i32 = arith.constant 0 : i32
    %c0_i32_0 = arith.constant 0 : i32
    %c0_i32_1 = arith.constant 0 : i32
    return %c0_i32, %c0_i32_0 : i32, i32
  }
  func.func @transform_1(%arg0: i32) -> (i32, i32) {
    %c0_i32 = arith.constant 0 : i32
    %c0_i32_0 = arith.constant 0 : i32
    %c0_i32_1 = arith.constant 0 : i32
    return %c0_i32, %c0_i32_0 : i32, i32
  }
  func.func @transform_2(%arg0: i32) -> (i32, i32) {
    %c0_i32 = arith.constant 0 : i32
    %c0_i32_0 = arith.constant 0 : i32
    %c0_i32_1 = arith.constant 0 : i32
    return %c0_i32, %c0_i32_0 : i32, i32
  }
  func.func @transform_3(%arg0: i32) -> (i32, i32) {
    %c0_i32 = arith.constant 0 : i32
    %c0_i32_0 = arith.constant 0 : i32
    %c0_i32_1 = arith.constant 0 : i32
    return %c0_i32, %c0_i32_0 : i32, i32
  }
  func.func @transform_4(%arg0: i32) -> (i32, i32) {
    %c0_i32 = arith.constant 0 : i32
    %c0_i32_0 = arith.constant 0 : i32
    %c0_i32_1 = arith.constant 0 : i32
    return %c0_i32, %c0_i32_0 : i32, i32
  }
  func.func @transform_5(%arg0: i32) -> (i32, i32) {
    %c0_i32 = arith.constant 0 : i32
    %c0_i32_0 = arith.constant 0 : i32
    %c0_i32_1 = arith.constant 0 : i32
    return %c0_i32, %c0_i32_0 : i32, i32
  }
}

</mosaic_0001>

<bundles_post_ra>
// kernel: ir_module_forward.4
= control target key start
LH: loop header
LB: loop body
LE: loop exit
PB: predicated region body
PF: predicated region fallthrough
CT: control target
= control target key end

     0   :  { %8 = vsyncpa [#allocation3], 0  ;;  %s766_s12 = smov [#allocation2]   ;;  %s816_s0 = inlined_call_operand.vmem [shape: bf16[8,768], index: 0, kind: input, shape index: {}]   ;;  %s817_s1 = inlined_call_operand.hbm [shape: bf16[768,128], index: 1, kind: input, shape index: {}]   ;;  %s818_s2 = inlined_call_operand.vmem [shape: f32[8,128], index: 2, kind: input, shape index: {}]   ;;  %s819_s3 = inlined_call_operand.vmem [shape: bf16[8,128], index: 3, kind: output, shape index: {}]  }
   0x1   :  { %s16_s13 = sshll.u32 %s766_s12, 4  ;;  %s742_s16 = scalar_lea.hbm %s817_s1, 6144  ;;  %s17_s13 = int_to_ptr.vmem [resolvable:$true] %s16_s13 }
   0x2   :  { %p743_p0 = scmp.ne.s32.totalorder %s817_s1, %s742_s16  ;;  %p746_p1 = scmp.lt.u32.totalorder %s742_s16, %s817_s1 }
   0x4   :  { %p748_p2 = pnand %p746_p1, %p743_p0 }
   0x6   :  { %751 = shalt.err (!%p748_p2)
}
   0x7   :  { %s752_s21 = scalar_lea.vmem %s17_s13, 6144  ;;  %p757_p4 = scmp.lt.s32.totalorder %s17_s13, %s17_s13 }
   0x8   :  { %p753_p3 = scmp.ne.s32.totalorder %s17_s13, %s752_s21  ;;  %p758_p5 = scmp.lt.s32.totalorder %s752_s21, %s752_s21 }
   0xa   :  { %p759_p6 = por %p758_p5, %p757_p4 }
   0xc   :  { %p760_p7 = pnand %p759_p6, %p753_p3 }
   0xe   :  { %763 = shalt.err (!%p760_p7)
}
   0xf   :  { %s767_s22 = smov 64   ;;  %s768_s23 = smov 4  }
  0x10   :  { %22 = dma.hbm_to_vmem [thread:$0]  %s817_s1, 6144, %s17_s13, [#allocation3], %s767_s22, %s767_s22, %s768_s23  }
  0x11   :  { %764 = dma.done.wait [#allocation3], 6144  }
  0x12   :  { %765 = vsyncadd [#allocation3], 4294961152  ;;  %v688_v0 = vld [vmem:[#allocation2 + $0x40] sm:$0xff]   ;;  %v692_v4 = vld [vmem:[#allocation2 + $0x48] sm:$0xff]  }
  0x13   :  { %v689_v1 = vld [vmem:[#allocation2] sm:$0xff]   ;;  %619 = vmatprep.subr.bf16.mxu0 %v688_v0  ;;  %v693_v5 = vld [vmem:[#allocation2 + $0x8] sm:$0xff]   ;;  %v696_v8 = vld [vmem:[#allocation2 + $0x50] sm:$0xff]  }
  0x14   :  { %v690_v2 = vld [vmem:[#allocation2 + $0xc0] sm:$0xff]   ;;  %620 = vmatpush3.bf16.msra.mxu0 %v689_v1  ;;  %v694_v6 = vld [vmem:[#allocation2 + $0xc8] sm:$0xff]   ;;  %v697_v9 = vld [vmem:[#allocation2 + $0x10] sm:$0xff]  }
  0x15   :  { %v691_v3 = vld [vmem:[#allocation2 + $0x80] sm:$0xff]   ;;  %641 = vmatprep.subr.bf16.mxu1 %v690_v2  ;;  %621 = vmatprep.subr.bf16.mxu0 %v692_v4  ;;  %v695_v7 = vld [vmem:[#allocation2 + $0x88] sm:$0xff]   ;;  %v698_v10 = vld [vmem:[#allocation2 + $0xd0] sm:$0xff]  }
  0x16   :  { %642 = vmatpush3.bf16.msra.mxu1 %v691_v3  ;;  %v699_v11 = vld [vmem:[#allocation2 + $0x90] sm:$0xff]   ;;  %v700_v12 = vld [vmem:[#allocation2 + $0x58] sm:$0xff]   ;;  %v704_v16 = vld [vmem:[#allocation2 + $0x60] sm:$0xff]  }
  0x17   :  { %643 = vmatprep.subr.bf16.mxu1 %v694_v6  ;;  %v701_v13 = vld [vmem:[#allocation2 + $0x18] sm:$0xff]   ;;  %v705_v17 = vld [vmem:[#allocation2 + $0x20] sm:$0xff]   ;;  %v708_v20 = vld [vmem:[#allocation2 + $0x68] sm:$0xff]  }
  0x18   :  { %622 = vmatpush3.bf16.msra.mxu0 %v693_v5  ;;  %v702_v14 = vld [vmem:[#allocation2 + $0xd8] sm:$0xff]   ;;  %v706_v18 = vld [vmem:[#allocation2 + $0xe0] sm:$0xff]   ;;  %v709_v21 = vld [vmem:[#allocation2 + $0x28] sm:$0xff]  }
  0x19   :  { %623 = vmatprep.subr.bf16.mxu0 %v696_v8  ;;  %v703_v15 = vld [vmem:[#allocation2 + $0x98] sm:$0xff]   ;;  %v707_v19 = vld [vmem:[#allocation2 + $0xa0] sm:$0xff]   ;;  %v710_v22 = vld [vmem:[#allocation2 + $0xe8] sm:$0xff]  }
  0x1a   :  { %644 = vmatpush3.bf16.msra.mxu1 %v695_v7  ;;  %v711_v23 = vld [vmem:[#allocation2 + $0xa8] sm:$0xff]   ;;  %v712_v24 = vld [vmem:[#allocation2 + $0x70] sm:$0xff]   ;;  %v716_v28 = vld [vmem:[#allocation2 + $0x78] sm:$0xff]  }
  0x1b   :  { %645 = vmatprep.subr.bf16.mxu1 %v698_v10  ;;  %v713_v25 = vld [vmem:[#allocation2 + $0x30] sm:$0xff]   ;;  %v717_v29 = vld [vmem:[#allocation2 + $0x38] sm:$0xff]   ;;  %v29_v31 = vld [vmem:[%s816_s0] sm:$0xff] }
  0x1c   :  { %624 = vmatpush3.bf16.msra.mxu0 %v697_v9  ;;  %v714_v26 = vld [vmem:[#allocation2 + $0xf0] sm:$0xff]   ;;  %v718_v30 = vld [vmem:[#allocation2 + $0xf8] sm:$0xff]   ;;  %v565_v32 = vcombine.low %v29_v31, %v29_v31  ;;  %v566_v33 = vcombine.high %v29_v31, %v29_v31  ;;  %v722_v35 = vld [vmem:[#allocation2 + $0x140] sm:$0xff]  }
  0x1d   :  { %625 = vmatprep.subr.bf16.mxu0 %v700_v12  ;;  %v715_v27 = vld [vmem:[#allocation2 + $0xb0] sm:$0xff]   ;;  %v721_v34 = vld [vmem:[#allocation2 + $0xb8] sm:$0xff]   ;;  %v30_v36 = vld [vmem:[%s816_s0 + $0x8] sm:$0xff] }
  0x1e   :  { %646 = vmatpush3.bf16.msra.mxu1 %v699_v11  ;;  %470 = vmatprep.mubr.bf16.mxu0 %v566_v33  ;;  %v567_v37 = vcombine.low %v30_v36, %v30_v36  ;;  %v568_v38 = vcombine.high %v30_v36, %v30_v36  ;;  %v725_v39 = vld [vmem:[#allocation2 + $0x100] sm:$0xff]   ;;  %v726_v40 = vld [vmem:[#allocation2 + $0x148] sm:$0xff]   ;;  %v728_v42 = vld [vmem:[#allocation2 + $0x150] sm:$0xff]  }
  0x1f   :  { %647 = vmatprep.subr.bf16.mxu1 %v702_v14  ;;  %v727_v41 = vld [vmem:[#allocation2 + $0x108] sm:$0xff]   ;;  %v729_v43 = vld [vmem:[#allocation2 + $0x110] sm:$0xff]   ;;  %v730_v44 = vld [vmem:[#allocation2 + $0x158] sm:$0xff]  }
  0x20   :  { %626 = vmatpush3.bf16.msra.mxu0 %v701_v13  ;;  %510 = vmatprep.mubr.bf16.mxu1 %v568_v38  ;;  %v731_v45 = vld [vmem:[#allocation2 + $0x118] sm:$0xff]   ;;  %v732_v46 = vld [vmem:[#allocation2 + $0x160] sm:$0xff]   ;;  %v31_v48 = vld [vmem:[%s816_s0 + $0x10] sm:$0xff] }
  0x21   :  { %627 = vmatprep.subr.bf16.mxu0 %v704_v16  ;;  %v733_v47 = vld [vmem:[#allocation2 + $0x120] sm:$0xff]   ;;  %v734_v49 = vld [vmem:[#allocation2 + $0x168] sm:$0xff]   ;;  %v570_v50 = vcombine.high %v31_v48, %v31_v48  ;;  %v736_v52 = vld [vmem:[#allocation2 + $0x170] sm:$0xff]   ;;  %v569_v56 = vcombine.low %v31_v48, %v31_v48 }
  0x22   :  { %648 = vmatpush3.bf16.msra.mxu1 %v703_v15  ;;  %v735_v51 = vld [vmem:[#allocation2 + $0x128] sm:$0xff]   ;;  %v737_v53 = vld [vmem:[#allocation2 + $0x130] sm:$0xff]   ;;  %v738_v54 = vld [vmem:[#allocation2 + $0x178] sm:$0xff]  }
  0x23   :  { %649 = vmatprep.subr.bf16.mxu1 %v706_v18  ;;  %v739_v55 = vld [vmem:[#allocation2 + $0x138] sm:$0xff]   ;;  %v128_v58 = vld [vmem:[%s818_s2] sm:$0xff] }
  0x24   :  { %628 = vmatpush3.bf16.msra.mxu0 %v705_v17 }
  0x25   :  { %629 = vmatprep.subr.bf16.mxu0 %v708_v20 }
  0x26   :  { %650 = vmatpush3.bf16.msra.mxu1 %v707_v19 }
  0x27   :  { %651 = vmatprep.subr.bf16.mxu1 %v710_v22 }
  0x28   :  { %630 = vmatpush3.bf16.msra.mxu0 %v709_v21 }
  0x29   :  { %631 = vmatprep.subr.bf16.mxu0 %v712_v24 }
  0x2a   :  { %652 = vmatpush3.bf16.msra.mxu1 %v711_v23 }
  0x2b   :  { %653 = vmatprep.subr.bf16.mxu1 %v714_v26 }
  0x2c   :  { %632 = vmatpush3.bf16.msra.mxu0 %v713_v25 }
  0x2d   :  { %633 = vmatprep.subr.bf16.mxu0 %v716_v28 }
  0x2e   :  { %654 = vmatpush3.bf16.msra.mxu1 %v715_v27 }
  0x2f   :  { %655 = vmatprep.subr.bf16.mxu1 %v718_v30 }
  0x30   :  { %634 = vmatpush3.bf16.msra.mxu0 %v717_v29 }
  0x31   :  { %663 = vmatprep.subr.bf16.mxu0 %v722_v35 }
  0x32   :  { %656 = vmatpush3.bf16.msra.mxu1 %v721_v34 }
  0x33   :  { %471 = vmatmul.mubr.bf16.vlgmr.msra.gmra.mrb[0].mxu0 %v565_v32 }
  0x34   :  { %664 = vmatpush3.bf16.msra.mxu0 %v725_v39  ;;  %550 = vmatprep.mubr.bf16.mxu0 %v570_v50 }
  0x35   :  { %511 = vmatmul.mubr.bf16.vlgmr.msra.gmra.mrb[0].mxu1 %v567_v37  ;;  %665 = vmatprep.subr.bf16.mxu0 %v726_v40 }
  0x38   :  { %666 = vmatpush3.bf16.msra.mxu0 %v727_v41 }
  0x39   :  { %667 = vmatprep.subr.bf16.mxu0 %v728_v42 }
  0x3c   :  { %668 = vmatpush3.bf16.msra.mxu0 %v729_v43 }
  0x3d   :  { %669 = vmatprep.subr.bf16.mxu0 %v730_v44 }
  0x40   :  { %670 = vmatpush3.bf16.msra.mxu0 %v731_v45 }
  0x41   :  { %671 = vmatprep.subr.bf16.mxu0 %v732_v46 }
  0x44   :  { %672 = vmatpush3.bf16.msra.mxu0 %v733_v47 }
  0x45   :  { %673 = vmatprep.subr.bf16.mxu0 %v734_v49 }
  0x48   :  { %674 = vmatpush3.bf16.msra.mxu0 %v735_v51 }
  0x49   :  { %675 = vmatprep.subr.bf16.mxu0 %v736_v52 }
  0x4c   :  { %676 = vmatpush3.bf16.msra.mxu0 %v737_v53 }
  0x4d   :  { %677 = vmatprep.subr.bf16.mxu0 %v738_v54 }
  0x50   :  { %678 = vmatpush3.bf16.msra.mxu0 %v739_v55 }
  0x53   :  { %551 = vmatmul.mubr.bf16.vlgmr.msra.gmra.mrb[4].mxu0 %v569_v56 }
 0x106   :  { %v635_v57 = vpop.f32.mrb[0].mxu0 }
 0x107   :  { %v636_v59 = vpop.f32.mrb[1].mxu0 }
 0x108   :  { %v637_v60 = vadd.f32 %v636_v59, %v635_v57  ;;  %v638_v61 = vpop.f32.mrb[2].mxu0  ;;  %v657_v62 = vpop.f32.mrb[0].mxu1 }
 0x109   :  { %v639_v63 = vpop.f32.mrb[3].mxu0  ;;  %v658_v0 = vpop.f32.mrb[1].mxu1 }
 0x10a   :  { %v473_v1 = vadd.f32 %v637_v60, %v128_v58  ;;  %v659_v2 = vadd.f32 %v658_v0, %v657_v62  ;;  %v660_v3 = vpop.f32.mrb[2].mxu1 }
 0x10b   :  { %v661_v4 = vpop.f32.mrb[3].mxu1 }
 0x10c   :  { %v513_v5 = vadd.f32 %v659_v2, %v473_v1 }
 0x126   :  { %v679_v6 = vpop.f32.mrb[4].mxu0 }
 0x127   :  { %v680_v7 = vpop.f32.mrb[5].mxu0 }
 0x128   :  { %v681_v8 = vadd.f32 %v680_v7, %v679_v6  ;;  %v682_v9 = vpop.f32.mrb[6].mxu0 }
 0x129   :  { %v683_v10 = vpop.f32.mrb[7].mxu0 }
 0x12a   :  { %v553_v11 = vadd.f32 %v681_v8, %v513_v5 }
 0x12c   :  { %v558_v12 = vpack.c.bf16 %v553_v11, %v553_v11 }
 0x12e   :  { %559 = vst [vmem:[%s819_s3] sm:$0xf] %v558_v12 }
 0x12f   :  { %564 = vsyncpa [#allocation3], 1 }

// kernel: ir_module_forward.6
= control target key start
LH: loop header
LB: loop body
LE: loop exit
PB: predicated region body
PF: predicated region fallthrough
CT: control target
= control target key end

     0   :  { %v577_v22 = vmov 0   ;;  %v91_v61 = vlaneseq  ;;  %s742_s0 = inlined_call_operand.vmem [shape: bf16[16,128], index: 0, kind: input, shape index: {}]   ;;  %s743_s3 = inlined_call_operand.vmem [shape: bf16[128,256], index: 3, kind: input, shape index: {}]   ;;  %s744_s1 = inlined_call_operand.vmem [shape: f32[1,128], index: 1, kind: input, shape index: {}]   ;;  %s745_s2 = inlined_call_operand.vmem [shape: f32[1,128], index: 2, kind: input, shape index: {}]   ;;  %s746_s5 = inlined_call_operand.vmem [shape: bf16[256,128], index: 5, kind: input, shape index: {}]   ;;  %s747_s4 = inlined_call_operand.vmem [shape: f32[1,256], index: 4, kind: input, shape index: {}]   ;;  %s748_s6 = inlined_call_operand.vmem [shape: f32[1,128], index: 6, kind: input, shape index: {}]   ;;  %s749_s7 = inlined_call_operand.vmem [shape: bf16[16,128], index: 7, kind: output, shape index: {}]  }
   0x1   :  { %v494_v0 = vld [vmem:[%s742_s0] sm:$0xff]   ;;  %v528_v5 = vld [vmem:[%s743_s3 + $0x14] ss:$8 sps:$4 sm:$0xff]   ;;  %v530_v14 = vld [vmem:[%s743_s3 + $0x10] ss:$8 sps:$4 sm:$0xff]   ;;  %213 = vmatprep.mubr.bf16.mxu0 %v577_v22 }
   0x2   :  { %v621_v1 = vunpack.c.l.bf16 %v494_v0  ;;  %v624_v2 = vunpack.c.h.bf16 %v494_v0  ;;  %v525_v3 = vld [vmem:[%s743_s3 + $0x4] ss:$8 sps:$4 sm:$0xff]   ;;  %v527_v4 = vld [vmem:[%s743_s3] ss:$8 sps:$4 sm:$0xff]   ;;  %v534_v17 = vld [vmem:[%s743_s3 + $0x34] ss:$8 sps:$4 sm:$0xff]  }
   0x3   :  { %181 = vmatprep.subr.bf16.mxu0 %v525_v3  ;;  %v531_v15 = vld [vmem:[%s743_s3 + $0x24] ss:$8 sps:$4 sm:$0xff]   ;;  %v533_v16 = vld [vmem:[%s743_s3 + $0x20] ss:$8 sps:$4 sm:$0xff]   ;;  %v536_v18 = vld [vmem:[%s743_s3 + $0x30] ss:$8 sps:$4 sm:$0xff]  }
   0x4   :  { %33 = vadd.xlane.f32.xlu0 %v621_v1  ;;  %182 = vmatpush1.bf16.msra.mxu0 %v527_v4  ;;  %v537_v19 = vld [vmem:[%s743_s3 + $0x44] ss:$8 sps:$4 sm:$0xff]   ;;  %v539_v20 = vld [vmem:[%s743_s3 + $0x40] ss:$8 sps:$4 sm:$0xff]   ;;  %v540_v21 = vld [vmem:[%s743_s3 + $0x54] ss:$8 sps:$4 sm:$0xff]  }
   0x5   :  { %183 = vmatprep.subr.bf16.mxu0 %v528_v5  ;;  %v542_v23 = vld [vmem:[%s743_s3 + $0x50] ss:$8 sps:$4 sm:$0xff]   ;;  %v543_v24 = vld [vmem:[%s743_s3 + $0x64] ss:$8 sps:$4 sm:$0xff]   ;;  %v545_v25 = vld [vmem:[%s743_s3 + $0x60] ss:$8 sps:$4 sm:$0xff]  }
   0x6   :  { %v546_v26 = vld [vmem:[%s743_s3 + $0x74] ss:$8 sps:$4 sm:$0xff]   ;;  %v548_v27 = vld [vmem:[%s743_s3 + $0x70] ss:$8 sps:$4 sm:$0xff]   ;;  %v454_v36 = vld [vmem:[%s744_s1] ss:$0 sm:$0xff] }
   0x7   :  { %v455_v40 = vld [vmem:[%s745_s2] ss:$0 sm:$0xff]  ;;  %v551_v47 = vld [vmem:[%s746_s5 + $0x48] sm:$0xff]   ;;  %v553_v49 = vld [vmem:[%s746_s5 + $0x50] sm:$0xff]   ;;  %v92_v62 = vshrl.u32 %v91_v61, 7 }
   0x8   :  { %35 = vadd.xlane.f32.xlu0 %v624_v2  ;;  %184 = vmatpush1.bf16.msra.mxu0 %v530_v14  ;;  %v549_v45 = vld [vmem:[%s746_s5 + $0x40] sm:$0xff]   ;;  %v552_v48 = vld [vmem:[%s746_s5 + $0x8] sm:$0xff]   ;;  %v554_v50 = vld [vmem:[%s746_s5 + $0x10] sm:$0xff]  }
   0x9   :  { %185 = vmatprep.subr.bf16.mxu0 %v531_v15  ;;  %v550_v46 = vld [vmem:[%s746_s5] sm:$0xff]   ;;  %502 = vmatprep.subr.bf16.mxu1 %v549_v45  ;;  %v555_v51 = vld [vmem:[%s746_s5 + $0x58] sm:$0xff]   ;;  %v559_v55 = vld [vmem:[%s746_s5 + $0x68] sm:$0xff]   ;;  %v93_v63 = vsub.s32 0, %v92_v62  ;;  %v97_v3 = vsub.s32 1, %v92_v62 }
   0xa   :  { %503 = vmatpush3.bf16.msra.mxu1 %v550_v46  ;;  %v556_v52 = vld [vmem:[%s746_s5 + $0x18] sm:$0xff]   ;;  %v557_v53 = vld [vmem:[%s746_s5 + $0x60] sm:$0xff]   ;;  %v560_v56 = vld [vmem:[%s746_s5 + $0x28] sm:$0xff]  }
   0xb   :  { %504 = vmatprep.subr.bf16.mxu1 %v551_v47  ;;  %v558_v54 = vld [vmem:[%s746_s5 + $0x20] sm:$0xff]   ;;  %v561_v57 = vld [vmem:[%s746_s5 + $0x70] sm:$0xff]   ;;  %v563_v59 = vld [vmem:[%s746_s5 + $0x78] sm:$0xff]  }
   0xc   :  { %186 = vmatpush1.bf16.msra.mxu0 %v533_v16  ;;  %v562_v58 = vld [vmem:[%s746_s5 + $0x30] sm:$0xff]   ;;  %v564_v60 = vld [vmem:[%s746_s5 + $0x38] sm:$0xff]   ;;  %v89_v0 = vld [vmem:[%s747_s4] sm:$0x3] }
   0xd   :  { %187 = vmatprep.subr.bf16.mxu0 %v534_v17  ;;  %v94_v4 = vrot.slane %v89_v0, %v93_v63  ;;  %v98_v5 = vrot.slane %v89_v0, %v97_v3 }
   0xe   :  { %505 = vmatpush3.bf16.msra.mxu1 %v552_v48 }
   0xf   :  { %506 = vmatprep.subr.bf16.mxu1 %v553_v49 }
  0x10   :  { %188 = vmatpush1.bf16.msra.mxu0 %v536_v18 }
  0x11   :  { %189 = vmatprep.subr.bf16.mxu0 %v537_v19 }
  0x12   :  { %507 = vmatpush3.bf16.msra.mxu1 %v554_v50 }
  0x13   :  { %508 = vmatprep.subr.bf16.mxu1 %v555_v51 }
  0x14   :  { %190 = vmatpush1.bf16.msra.mxu0 %v539_v20 }
  0x15   :  { %191 = vmatprep.subr.bf16.mxu0 %v540_v21 }
  0x16   :  { %509 = vmatpush3.bf16.msra.mxu1 %v556_v52 }
  0x17   :  { %510 = vmatprep.subr.bf16.mxu1 %v557_v53  ;;  %v472_v53 = vld [vmem:[%s748_s6] ss:$0 sm:$0xff] }
  0x18   :  { %192 = vmatpush1.bf16.msra.mxu0 %v542_v23 }
  0x19   :  { %193 = vmatprep.subr.bf16.mxu0 %v543_v24 }
  0x1a   :  { %511 = vmatpush3.bf16.msra.mxu1 %v558_v54 }
  0x1b   :  { %512 = vmatprep.subr.bf16.mxu1 %v559_v55 }
  0x1c   :  { %194 = vmatpush1.bf16.msra.mxu0 %v545_v25 }
  0x1d   :  { %195 = vmatprep.subr.bf16.mxu0 %v546_v26 }
  0x1e   :  { %513 = vmatpush3.bf16.msra.mxu1 %v560_v56 }
  0x1f   :  { %514 = vmatprep.subr.bf16.mxu1 %v561_v57 }
  0x20   :  { %196 = vmatpush1.bf16.msra.mxu0 %v548_v27 }
  0x22   :  { %515 = vmatpush3.bf16.msra.mxu1 %v562_v58 }
  0x23   :  { %516 = vmatprep.subr.bf16.mxu1 %v563_v59 }
  0x26   :  { %517 = vmatpush3.bf16.msra.mxu1 %v564_v60 }
  0x91   :  { %v34_v6 = vpop.xlane.xlu0 %33 }
  0x92   :  { %v38_v7 = vmul.f32 0.0078125, %v34_v6 }
  0x94   :  { %v40_v8 = vsub.f32 %v621_v1, %v38_v7 }
  0x95   :  { %v36_v9 = vpop.xlane.xlu0 %35 }
  0x96   :  { %v39_v10 = vmul.f32 0.0078125, %v36_v9  ;;  %v42_v11 = vmul.f32 %v40_v8, %v40_v8 }
  0x98   :  { %v41_v12 = vsub.f32 %v624_v2, %v39_v10  ;;  %44 = vadd.xlane.f32.xlu1 %v42_v11 }
  0x9a   :  { %v43_v13 = vmul.f32 %v41_v12, %v41_v12 }
  0x9c   :  { %46 = vadd.xlane.f32.xlu1 %v43_v13 }
 0x125   :  { %v45_v28 = vpop.xlane.xlu1 %44 }
 0x126   :  { %v48_v29 = vmul.f32 0.0078125, %v45_v28 }
 0x128   :  { %v50_v30 = vadd.f32 1e-05, %v48_v29 }
 0x129   :  { %v47_v31 = vpop.xlane.xlu1 %46 }
 0x12a   :  { %565 = vrsqrt.f32 %v50_v30  ;;  %v49_v32 = vmul.f32 0.0078125, %v47_v31 }
 0x12c   :  { %v51_v33 = vadd.f32 1e-05, %v49_v32 }
 0x12e   :  { %567 = vrsqrt.f32 %v51_v33 }
 0x134   :  { %v566_v34 = vpop.eup %565 }
 0x135   :  { %v54_v35 = vmul.f32 %v566_v34, %v40_v8 }
 0x137   :  { %v62_v39 = vmul.f32 %v454_v36, %v54_v35 }
 0x138   :  { %v568_v37 = vpop.eup %567 }
 0x139   :  { %v55_v38 = vmul.f32 %v568_v37, %v41_v12  ;;  %v70_v42 = vadd.f32 %v455_v40, %v62_v39 }
 0x13b   :  { %v63_v41 = vmul.f32 %v454_v36, %v55_v38 }
 0x13d   :  { %v71_v43 = vadd.f32 %v455_v40, %v63_v41 }
 0x13f   :  { %v72_v44 = vpack.c.bf16 %v71_v43, %v70_v42 }
 0x141   :  { %214 = vmatmul.mubr.bf16.vlgmr.msra.gmra.mrb[0].mxu0 %v72_v44 }
 0x214   :  { %v215_v6 = vpop.f32.mrb[0].mxu0 }
 0x215   :  { %v216_v7 = vadd.f32 %v215_v6, %v94_v4  ;;  %v217_v8 = vpop.f32.mrb[1].mxu0 }
 0x216   :  { %v218_v9 = vadd.f32 %v217_v8, %v98_v5  ;;  %v219_v10 = vpop.f32.mrb[2].mxu0 }
 0x217   :  { %v228_v11 = vmul.f32 0.044715, %v216_v7  ;;  %v220_v12 = vadd.f32 %v219_v10, %v94_v4  ;;  %v221_v13 = vpop.f32.mrb[3].mxu0  ;;  %v224_v40 = vmul.f32 0.5, %v216_v7 }
 0x218   :  { %v229_v14 = vmul.f32 0.044715, %v218_v9  ;;  %v222_v15 = vadd.f32 %v221_v13, %v98_v5  ;;  %v225_v43 = vmul.f32 0.5, %v218_v9 }
 0x219   :  { %v232_v16 = vmul.f32 %v228_v11, %v216_v7  ;;  %v230_v17 = vmul.f32 0.044715, %v220_v12  ;;  %v226_v41 = vmul.f32 0.5, %v220_v12 }
 0x21a   :  { %v231_v18 = vmul.f32 0.044715, %v222_v15  ;;  %v233_v19 = vmul.f32 %v229_v14, %v218_v9  ;;  %v227_v44 = vmul.f32 0.5, %v222_v15 }
 0x21b   :  { %v236_v20 = vmul.f32 %v232_v16, %v216_v7  ;;  %v234_v21 = vmul.f32 %v230_v17, %v220_v12 }
 0x21c   :  { %v235_v22 = vmul.f32 %v231_v18, %v222_v15  ;;  %v237_v23 = vmul.f32 %v233_v19, %v218_v9 }
 0x21d   :  { %v238_v24 = vmul.f32 %v234_v21, %v220_v12  ;;  %v240_v25 = vadd.f32 %v236_v20, %v216_v7 }
 0x21e   :  { %v239_v26 = vmul.f32 %v235_v22, %v222_v15  ;;  %v241_v27 = vadd.f32 %v237_v23, %v218_v9 }
 0x21f   :  { %v242_v28 = vadd.f32 %v238_v24, %v220_v12  ;;  %v244_v29 = vmul.f32 0.7978846, %v240_v25 }
 0x220   :  { %v243_v30 = vadd.f32 %v239_v26, %v222_v15  ;;  %v245_v31 = vmul.f32 0.7978846, %v241_v27 }
 0x221   :  { %v246_v32 = vmul.f32 0.7978846, %v242_v28  ;;  %569 = vtanh.f32 %v244_v29 }
 0x222   :  { %v247_v33 = vmul.f32 0.7978846, %v243_v30  ;;  %571 = vtanh.f32 %v245_v31 }
 0x223   :  { %573 = vtanh.f32 %v246_v32 }
 0x224   :  { %575 = vtanh.f32 %v247_v33 }
 0x22b   :  { %v570_v34 = vpop.eup %569 }
 0x22c   :  { %v572_v35 = vpop.eup %571  ;;  %v252_v36 = vadd.f32 1.0, %v570_v34 }
 0x22d   :  { %v574_v37 = vpop.eup %573  ;;  %v253_v38 = vadd.f32 1.0, %v572_v35 }
 0x22e   :  { %v576_v39 = vpop.eup %575  ;;  %v254_v42 = vadd.f32 1.0, %v574_v37  ;;  %v256_v46 = vmul.f32 %v252_v36, %v224_v40 }
 0x22f   :  { %v255_v45 = vadd.f32 1.0, %v576_v39  ;;  %v257_v48 = vmul.f32 %v253_v38, %v225_v43 }
 0x230   :  { %v258_v47 = vmul.f32 %v254_v42, %v226_v41 }
 0x231   :  { %v259_v49 = vmul.f32 %v255_v45, %v227_v44 }
 0x232   :  { %v260_v50 = vpack.c.bf16 %v258_v47, %v256_v46 }
 0x233   :  { %v261_v51 = vpack.c.bf16 %v259_v49, %v257_v48 }
 0x235   :  { %429 = vmatprep.mubr.bf16.mxu1 %v261_v51 }
 0x236   :  { %430 = vmatmul.mubr.bf16.vlgmr.msra.gmra.mrb[0].mxu1 %v260_v50 }
 0x309   :  { %v518_v52 = vpop.f32.mrb[0].mxu1 }
 0x30a   :  { %v519_v54 = vpop.f32.mrb[1].mxu1 }
 0x30b   :  { %v520_v55 = vadd.f32 %v519_v54, %v518_v52  ;;  %v521_v56 = vpop.f32.mrb[2].mxu1 }
 0x30c   :  { %v522_v57 = vpop.f32.mrb[3].mxu1 }
 0x30d   :  { %v432_v58 = vadd.f32 %v520_v55, %v472_v53  ;;  %v523_v59 = vadd.f32 %v522_v57, %v521_v56 }
 0x30f   :  { %v435_v60 = vadd.f32 %v523_v59, %v472_v53  ;;  %v438_v61 = vadd.f32 %v621_v1, %v432_v58 }
 0x311   :  { %v439_v62 = vadd.f32 %v624_v2, %v435_v60 }
 0x313   :  { %v500_v63 = vpack.c.bf16 %v439_v62, %v438_v61 }
 0x315   :  { %501 = vst [vmem:[%s749_s7] sm:$0xff] %v500_v63  }

// kernel: ir_module_forward.7
= control target key start
LH: loop header
LB: loop body
LE: loop exit
PB: predicated region body
PF: predicated region fallthrough
CT: control target
= control target key end

     0   :  { %v220_v2 = vmov 0.0   ;;  %vm221_vm0 = vmmov 0   ;;  %s291_s0 = inlined_call_operand.vmem [shape: bf16[8,128], index: 0, kind: input, shape index: {}]   ;;  %s292_s3 = inlined_call_operand.vmem [shape: bf16[128,128], index: 3, kind: input, shape index: {}]   ;;  %s293_s1 = inlined_call_operand.vmem [shape: f32[1,128], index: 1, kind: input, shape index: {}]   ;;  %s294_s2 = inlined_call_operand.vmem [shape: f32[1,128], index: 2, kind: input, shape index: {}]   ;;  %s295_s4 = inlined_call_operand.vmem [shape: f32[1,128], index: 4, kind: input, shape index: {}]   ;;  %s296_s5 = inlined_call_operand.vmem [shape: f32[8,128], index: 5, kind: output, shape index: {}]  }
   0x1   :  { %v21_v0 = vld [vmem:[%s291_s0] sm:$0xf]  ;;  %188 = vmatprep.subr.bf16.mxu0 %v220_v2  ;;  %v211_v4 = vld [vmem:[%s292_s3 + $0x8] sm:$0xff]   ;;  %v212_v9 = vld [vmem:[%s292_s3 + $0x10] sm:$0xff]   ;;  %204 = vmatprep.mubr.msk.bf16.mxu0 %vm221_vm0, %v220_v2 }
   0x2   :  { %v22_v1 = vunpack.c.l.bf16 %v21_v0  ;;  %v210_v3 = vld [vmem:[%s292_s3] sm:$0xff]   ;;  %v213_v10 = vld [vmem:[%s292_s3 + $0x18] sm:$0xff]   ;;  %v215_v12 = vld [vmem:[%s292_s3 + $0x28] sm:$0xff]  }
   0x3   :  { %189 = vmatpush3.bf16.msra.mxu0 %v210_v3  ;;  %v214_v11 = vld [vmem:[%s292_s3 + $0x20] sm:$0xff]   ;;  %v216_v13 = vld [vmem:[%s292_s3 + $0x30] sm:$0xff]   ;;  %v217_v14 = vld [vmem:[%s292_s3 + $0x38] sm:$0xff]  }
   0x4   :  { %25 = vadd.xlane.f32.xlu0 %v22_v1  ;;  %190 = vmatprep.subr.bf16.mxu0 %v220_v2  ;;  %v168_v19 = vld [vmem:[%s293_s1] ss:$0 sm:$0xff] }
   0x5   :  { %v169_v21 = vld [vmem:[%s294_s2] ss:$0 sm:$0xff] }
   0x6   :  { %v170_v25 = vld [vmem:[%s295_s4] ss:$0 sm:$0xff] }
   0x7   :  { %191 = vmatpush3.bf16.msra.mxu0 %v211_v4 }
   0x8   :  { %192 = vmatprep.subr.bf16.mxu0 %v220_v2 }
   0xb   :  { %193 = vmatpush3.bf16.msra.mxu0 %v212_v9 }
   0xc   :  { %194 = vmatprep.subr.bf16.mxu0 %v220_v2 }
   0xf   :  { %195 = vmatpush3.bf16.msra.mxu0 %v213_v10 }
  0x10   :  { %196 = vmatprep.subr.bf16.mxu0 %v220_v2 }
  0x13   :  { %197 = vmatpush3.bf16.msra.mxu0 %v214_v11 }
  0x14   :  { %198 = vmatprep.subr.bf16.mxu0 %v220_v2 }
  0x17   :  { %199 = vmatpush3.bf16.msra.mxu0 %v215_v12 }
  0x18   :  { %200 = vmatprep.subr.bf16.mxu0 %v220_v2 }
  0x1b   :  { %201 = vmatpush3.bf16.msra.mxu0 %v216_v13 }
  0x1c   :  { %202 = vmatprep.subr.bf16.mxu0 %v220_v2 }
  0x1f   :  { %203 = vmatpush3.bf16.msra.mxu0 %v217_v14 }
  0x91   :  { %v26_v5 = vpop.xlane.xlu0 %25 }
  0x92   :  { %v28_v6 = vmul.f32 0.0078125, %v26_v5 }
  0x94   :  { %v29_v7 = vsub.f32 %v22_v1, %v28_v6 }
  0x96   :  { %v30_v8 = vmul.f32 %v29_v7, %v29_v7 }
  0x98   :  { %31 = vadd.xlane.f32.xlu0 %v30_v8 }
 0x125   :  { %v32_v15 = vpop.xlane.xlu0 %31 }
 0x126   :  { %v33_v16 = vmul.f32 0.0078125, %v32_v15 }
 0x128   :  { %v34_v17 = vadd.f32 1e-05, %v33_v16 }
 0x12a   :  { %218 = vrsqrt.f32 %v34_v17 }
 0x134   :  { %v219_v18 = vpop.eup %218 }
 0x135   :  { %v36_v20 = vmul.f32 %v219_v18, %v29_v7 }
 0x137   :  { %v43_v22 = vmul.f32 %v168_v19, %v36_v20 }
 0x139   :  { %v50_v23 = vadd.f32 %v169_v21, %v43_v22 }
 0x13b   :  { %v51_v24 = vpack.c.bf16 %v50_v23, %v50_v23 }
 0x13d   :  { %205 = vmatmul.mubr.bf16.vlgmr.msra.gmra.mrb[0].mxu0 %v51_v24 }
 0x210   :  { %v157_v26 = vpop.f32.mrb[0].mxu0 }
 0x211   :  { %v158_v27 = vadd.f32 %v170_v25, %v157_v26  ;;  %v206_v28 = vpop.f32.mrb[1].mxu0 }
 0x212   :  { %v160_v29 = vpop.f32.mrb[2].mxu0 }
 0x213   :  { %163 = vst [vmem:[%s296_s5] sm:$0xff] %v158_v27  ;;  %v207_v30 = vpop.f32.mrb[3].mxu0 }

// kernel: ir_module_forward.5
= control target key start
LH: loop header
LB: loop body
LE: loop exit
PB: predicated region body
PF: predicated region fallthrough
CT: control target
= control target key end

     0   :  { %v6374_v45 = vmov 0   ;;  %vm6376_vm0 = vmmov 0   ;;  %vm2658_vm1 = vcmask 130048   ;;  %s8111_s0 = inlined_call_operand.vmem [shape: bf16[16,128], index: 0, kind: input, shape index: {}]   ;;  %s8112_s3 = inlined_call_operand.vmem [shape: bf16[128,4608], index: 3, kind: input, shape index: {}]   ;;  %s8113_s1 = inlined_call_operand.vmem [shape: f32[1,128], index: 1, kind: input, shape index: {}]   ;;  %s8114_s2 = inlined_call_operand.vmem [shape: f32[1,128], index: 2, kind: input, shape index: {}]   ;;  %s8115_s6 = inlined_call_operand.vmem [shape: f32[16,16], index: 6, kind: input, shape index: {}]   ;;  %s8116_s4 = inlined_call_operand.vmem [shape: bf16[1536,128], index: 4, kind: input, shape index: {}]   ;;  %s8117_s5 = inlined_call_operand.vmem [shape: f32[1,128], index: 5, kind: input, shape index: {}]   ;;  %s8118_s7 = inlined_call_operand.vmem [shape: bf16[16,128], index: 7, kind: output, shape index: {}]  }
   0x1   :  { %v5411_v0 = vld [vmem:[%s8111_s0] sm:$0xff]   ;;  %v5748_v4 = vld [vmem:[%s8112_s3 + $0xc] ss:$144 sps:$4 sm:$0xff]   ;;  %v5751_v6 = vld [vmem:[%s8112_s3 + $0x8] ss:$144 sps:$4 sm:$0xff]   ;;  %1833 = vmatprep.mubr.bf16.mxu0 %v6374_v45  ;;  %1876 = vmatprep.mubr.bf16.mxu1 %v6374_v45 }
   0x2   :  { %v6420_v1 = vunpack.c.l.bf16 %v5411_v0  ;;  %v6423_v2 = vunpack.c.h.bf16 %v5411_v0  ;;  %v5746_v3 = vld [vmem:[%s8112_s3 + $0x4] ss:$144 sps:$4 sm:$0xff]   ;;  %v5750_v5 = vld [vmem:[%s8112_s3] ss:$144 sps:$4 sm:$0xff]   ;;  %1844 = vmatprep.subr.bf16.mxu1 %v5748_v4  ;;  %v5754_v8 = vld [vmem:[%s8112_s3 + $0x12c] ss:$144 sps:$4 sm:$0xff]  }
   0x3   :  { %1801 = vmatprep.subr.bf16.mxu0 %v5746_v3  ;;  %v5752_v7 = vld [vmem:[%s8112_s3 + $0x124] ss:$144 sps:$4 sm:$0xff]   ;;  %1845 = vmatpush1.bf16.msra.mxu1 %v5751_v6  ;;  %v5756_v9 = vld [vmem:[%s8112_s3 + $0x120] ss:$144 sps:$4 sm:$0xff]   ;;  %v5757_v10 = vld [vmem:[%s8112_s3 + $0x128] ss:$144 sps:$4 sm:$0xff]  }
   0x4   :  { %33 = vadd.xlane.f32.xlu0 %v6420_v1  ;;  %1802 = vmatpush1.bf16.msra.mxu0 %v5750_v5  ;;  %v5758_v19 = vld [vmem:[%s8112_s3 + $0x244] ss:$144 sps:$4 sm:$0xff]   ;;  %v5760_v20 = vld [vmem:[%s8112_s3 + $0x24c] ss:$144 sps:$4 sm:$0xff]   ;;  %v5762_v21 = vld [vmem:[%s8112_s3 + $0x240] ss:$144 sps:$4 sm:$0xff]  }
   0x5   :  { %1803 = vmatprep.subr.bf16.mxu0 %v5752_v7  ;;  %1846 = vmatprep.subr.bf16.mxu1 %v5754_v8  ;;  %v5763_v22 = vld [vmem:[%s8112_s3 + $0x248] ss:$144 sps:$4 sm:$0xff]   ;;  %v5764_v23 = vld [vmem:[%s8112_s3 + $0x364] ss:$144 sps:$4 sm:$0xff]   ;;  %v5766_v24 = vld [vmem:[%s8112_s3 + $0x36c] ss:$144 sps:$4 sm:$0xff]  }
   0x6   :  { %v5768_v25 = vld [vmem:[%s8112_s3 + $0x360] ss:$144 sps:$4 sm:$0xff]   ;;  %v5769_v26 = vld [vmem:[%s8112_s3 + $0x368] ss:$144 sps:$4 sm:$0xff]   ;;  %v5770_v27 = vld [vmem:[%s8112_s3 + $0x484] ss:$144 sps:$4 sm:$0xff]  }
   0x7   :  { %1847 = vmatpush1.bf16.msra.mxu1 %v5757_v10  ;;  %v5772_v28 = vld [vmem:[%s8112_s3 + $0x48c] ss:$144 sps:$4 sm:$0xff]   ;;  %v5774_v29 = vld [vmem:[%s8112_s3 + $0x480] ss:$144 sps:$4 sm:$0xff]   ;;  %v5775_v30 = vld [vmem:[%s8112_s3 + $0x488] ss:$144 sps:$4 sm:$0xff]  }
   0x8   :  { %35 = vadd.xlane.f32.xlu0 %v6423_v2  ;;  %1804 = vmatpush1.bf16.msra.mxu0 %v5756_v9  ;;  %v5776_v31 = vld [vmem:[%s8112_s3 + $0x5a4] ss:$144 sps:$4 sm:$0xff]   ;;  %v5778_v32 = vld [vmem:[%s8112_s3 + $0x5ac] ss:$144 sps:$4 sm:$0xff]   ;;  %v5780_v33 = vld [vmem:[%s8112_s3 + $0x5a0] ss:$144 sps:$4 sm:$0xff]  }
   0x9   :  { %1805 = vmatprep.subr.bf16.mxu0 %v5758_v19  ;;  %1848 = vmatprep.subr.bf16.mxu1 %v5760_v20  ;;  %v5781_v34 = vld [vmem:[%s8112_s3 + $0x5a8] ss:$144 sps:$4 sm:$0xff]   ;;  %v5782_v35 = vld [vmem:[%s8112_s3 + $0x6c4] ss:$144 sps:$4 sm:$0xff]   ;;  %v5784_v36 = vld [vmem:[%s8112_s3 + $0x6cc] ss:$144 sps:$4 sm:$0xff]  }
   0xa   :  { %v5786_v37 = vld [vmem:[%s8112_s3 + $0x6c0] ss:$144 sps:$4 sm:$0xff]   ;;  %v5787_v38 = vld [vmem:[%s8112_s3 + $0x6c8] ss:$144 sps:$4 sm:$0xff]   ;;  %v5788_v39 = vld [vmem:[%s8112_s3 + $0x7e4] ss:$144 sps:$4 sm:$0xff]  }
   0xb   :  { %1849 = vmatpush1.bf16.msra.mxu1 %v5763_v22  ;;  %v5790_v40 = vld [vmem:[%s8112_s3 + $0x7ec] ss:$144 sps:$4 sm:$0xff]   ;;  %v5792_v41 = vld [vmem:[%s8112_s3 + $0x7e0] ss:$144 sps:$4 sm:$0xff]   ;;  %v5793_v42 = vld [vmem:[%s8112_s3 + $0x7e8] ss:$144 sps:$4 sm:$0xff]  }
   0xc   :  { %1806 = vmatpush1.bf16.msra.mxu0 %v5762_v21  ;;  %1850 = vmatprep.subr.bf16.mxu1 %v5766_v24  ;;  %v5796_v43 = vld [vmem:[%s8112_s3 + $0x14] ss:$144 sps:$4 sm:$0xff]   ;;  %v5799_v44 = vld [vmem:[%s8112_s3 + $0x1c] ss:$144 sps:$4 sm:$0xff]   ;;  %v5007_v54 = vld [vmem:[%s8113_s1] ss:$0 sm:$0xff] }
   0xd   :  { %1807 = vmatprep.subr.bf16.mxu0 %v5764_v23  ;;  %v5008_v58 = vld [vmem:[%s8114_s2] ss:$0 sm:$0xff]  ;;  %v5797_v63 = vld [vmem:[%s8112_s3 + $0x18] ss:$144 sps:$4 sm:$0xff]   ;;  %v5802_v3 = vld [vmem:[%s8112_s3 + $0x134] ss:$144 sps:$4 sm:$0xff]  }
   0xe   :  { %v5794_v62 = vld [vmem:[%s8112_s3 + $0x10] ss:$144 sps:$4 sm:$0xff]   ;;  %v5805_v4 = vld [vmem:[%s8112_s3 + $0x13c] ss:$144 sps:$4 sm:$0xff]   ;;  %v5803_v6 = vld [vmem:[%s8112_s3 + $0x138] ss:$144 sps:$4 sm:$0xff]  }
   0xf   :  { %1851 = vmatpush1.bf16.msra.mxu1 %v5769_v26  ;;  %v5800_v5 = vld [vmem:[%s8112_s3 + $0x130] ss:$144 sps:$4 sm:$0xff]   ;;  %v5808_v7 = vld [vmem:[%s8112_s3 + $0x254] ss:$144 sps:$4 sm:$0xff]   ;;  %v5811_v8 = vld [vmem:[%s8112_s3 + $0x25c] ss:$144 sps:$4 sm:$0xff]  }
  0x10   :  { %1808 = vmatpush1.bf16.msra.mxu0 %v5768_v25  ;;  %1852 = vmatprep.subr.bf16.mxu1 %v5772_v28  ;;  %v5806_v9 = vld [vmem:[%s8112_s3 + $0x250] ss:$144 sps:$4 sm:$0xff]   ;;  %v5809_v10 = vld [vmem:[%s8112_s3 + $0x258] ss:$144 sps:$4 sm:$0xff]   ;;  %v5826_v19 = vld [vmem:[%s8112_s3 + $0x5b4] ss:$144 sps:$4 sm:$0xff]  }
  0x11   :  { %1809 = vmatprep.subr.bf16.mxu0 %v5770_v27  ;;  %v5829_v20 = vld [vmem:[%s8112_s3 + $0x5bc] ss:$144 sps:$4 sm:$0xff]   ;;  %v5824_v21 = vld [vmem:[%s8112_s3 + $0x5b0] ss:$144 sps:$4 sm:$0xff]   ;;  %v5827_v22 = vld [vmem:[%s8112_s3 + $0x5b8] ss:$144 sps:$4 sm:$0xff]  }
  0x12   :  { %v5832_v23 = vld [vmem:[%s8112_s3 + $0x6d4] ss:$144 sps:$4 sm:$0xff]   ;;  %v5835_v24 = vld [vmem:[%s8112_s3 + $0x6dc] ss:$144 sps:$4 sm:$0xff]   ;;  %v5830_v25 = vld [vmem:[%s8112_s3 + $0x6d0] ss:$144 sps:$4 sm:$0xff]  }
  0x13   :  { %1853 = vmatpush1.bf16.msra.mxu1 %v5775_v30  ;;  %v5833_v26 = vld [vmem:[%s8112_s3 + $0x6d8] ss:$144 sps:$4 sm:$0xff]   ;;  %v5838_v27 = vld [vmem:[%s8112_s3 + $0x7f4] ss:$144 sps:$4 sm:$0xff]   ;;  %v5841_v28 = vld [vmem:[%s8112_s3 + $0x7fc] ss:$144 sps:$4 sm:$0xff]  }
  0x14   :  { %1810 = vmatpush1.bf16.msra.mxu0 %v5774_v29  ;;  %1854 = vmatprep.subr.bf16.mxu1 %v5778_v32  ;;  %v5836_v29 = vld [vmem:[%s8112_s3 + $0x7f0] ss:$144 sps:$4 sm:$0xff]   ;;  %v5839_v30 = vld [vmem:[%s8112_s3 + $0x7f8] ss:$144 sps:$4 sm:$0xff]   ;;  %v5847_v32 = vld [vmem:[%s8112_s3 + $0x2c] ss:$144 sps:$4 sm:$0xff]  }
  0x15   :  { %1811 = vmatprep.subr.bf16.mxu0 %v5776_v31  ;;  %v5844_v31 = vld [vmem:[%s8112_s3 + $0x24] ss:$144 sps:$4 sm:$0xff]  }
  0x17   :  { %1855 = vmatpush1.bf16.msra.mxu1 %v5781_v34  ;;  %v5845_v34 = vld [vmem:[%s8112_s3 + $0x28] ss:$144 sps:$4 sm:$0xff]  }
  0x18   :  { %1812 = vmatpush1.bf16.msra.mxu0 %v5780_v33  ;;  %1856 = vmatprep.subr.bf16.mxu1 %v5784_v36  ;;  %v5842_v33 = vld [vmem:[%s8112_s3 + $0x20] ss:$144 sps:$4 sm:$0xff]   ;;  %v5853_v36 = vld [vmem:[%s8112_s3 + $0x14c] ss:$144 sps:$4 sm:$0xff]  }
  0x19   :  { %1813 = vmatprep.subr.bf16.mxu0 %v5782_v35  ;;  %v5850_v35 = vld [vmem:[%s8112_s3 + $0x144] ss:$144 sps:$4 sm:$0xff]  }
  0x1b   :  { %1857 = vmatpush1.bf16.msra.mxu1 %v5787_v38  ;;  %v5851_v38 = vld [vmem:[%s8112_s3 + $0x148] ss:$144 sps:$4 sm:$0xff]  }
  0x1c   :  { %1814 = vmatpush1.bf16.msra.mxu0 %v5786_v37  ;;  %1858 = vmatprep.subr.bf16.mxu1 %v5790_v40  ;;  %v5848_v37 = vld [vmem:[%s8112_s3 + $0x140] ss:$144 sps:$4 sm:$0xff]   ;;  %v5859_v40 = vld [vmem:[%s8112_s3 + $0x26c] ss:$144 sps:$4 sm:$0xff]  }
  0x1d   :  { %1815 = vmatprep.subr.bf16.mxu0 %v5788_v39  ;;  %v5856_v39 = vld [vmem:[%s8112_s3 + $0x264] ss:$144 sps:$4 sm:$0xff]  }
  0x1f   :  { %1859 = vmatpush1.bf16.msra.mxu1 %v5793_v42  ;;  %v5857_v42 = vld [vmem:[%s8112_s3 + $0x268] ss:$144 sps:$4 sm:$0xff]  }
  0x20   :  { %1816 = vmatpush1.bf16.msra.mxu0 %v5792_v41  ;;  %1930 = vmatprep.subr.bf16.mxu1 %v5799_v44  ;;  %v5854_v41 = vld [vmem:[%s8112_s3 + $0x260] ss:$144 sps:$4 sm:$0xff]   ;;  %v5865_v44 = vld [vmem:[%s8112_s3 + $0x38c] ss:$144 sps:$4 sm:$0xff]  }
  0x21   :  { %1887 = vmatprep.subr.bf16.mxu0 %v5796_v43  ;;  %v5862_v43 = vld [vmem:[%s8112_s3 + $0x384] ss:$144 sps:$4 sm:$0xff]  }
  0x91   :  { %v34_v11 = vpop.xlane.xlu0 %33 }
  0x92   :  { %v38_v12 = vmul.f32 0.0078125, %v34_v11  ;;  %v5814_v11 = vld [vmem:[%s8112_s3 + $0x374] ss:$144 sps:$4 sm:$0xff]  }
  0x94   :  { %v6451_v13 = vsub.f32 %v6420_v1, %v38_v12  ;;  %v5817_v12 = vld [vmem:[%s8112_s3 + $0x37c] ss:$144 sps:$4 sm:$0xff]  }
  0x95   :  { %v36_v14 = vpop.xlane.xlu0 %35 }
  0x96   :  { %v39_v15 = vmul.f32 0.0078125, %v36_v14  ;;  %v42_v16 = vmul.f32 %v6451_v13, %v6451_v13  ;;  %v5815_v14 = vld [vmem:[%s8112_s3 + $0x378] ss:$144 sps:$4 sm:$0xff]  }
  0x98   :  { %v6456_v17 = vsub.f32 %v6423_v2, %v39_v15  ;;  %44 = vadd.xlane.f32.xlu1 %v42_v16  ;;  %v5820_v15 = vld [vmem:[%s8112_s3 + $0x494] ss:$144 sps:$4 sm:$0xff]   ;;  %v5823_v16 = vld [vmem:[%s8112_s3 + $0x49c] ss:$144 sps:$4 sm:$0xff]  }
  0x9a   :  { %v43_v18 = vmul.f32 %v6456_v17, %v6456_v17 }
  0x9c   :  { %46 = vadd.xlane.f32.xlu1 %v43_v18  ;;  %v5821_v18 = vld [vmem:[%s8112_s3 + $0x498] ss:$144 sps:$4 sm:$0xff]  }
 0x125   :  { %v45_v46 = vpop.xlane.xlu1 %44 }
 0x126   :  { %v48_v47 = vmul.f32 0.0078125, %v45_v46  ;;  %v5860_v46 = vld [vmem:[%s8112_s3 + $0x380] ss:$144 sps:$4 sm:$0xff]  }
 0x128   :  { %v50_v48 = vadd.f32 1e-05, %v48_v47  ;;  %v5863_v47 = vld [vmem:[%s8112_s3 + $0x388] ss:$144 sps:$4 sm:$0xff]  }
 0x129   :  { %v47_v49 = vpop.xlane.xlu1 %46 }
 0x12a   :  { %6274 = vrsqrt.f32 %v50_v48  ;;  %v49_v50 = vmul.f32 0.0078125, %v47_v49  ;;  %v5868_v48 = vld [vmem:[%s8112_s3 + $0x4a4] ss:$144 sps:$4 sm:$0xff]   ;;  %v5871_v49 = vld [vmem:[%s8112_s3 + $0x4ac] ss:$144 sps:$4 sm:$0xff]  }
 0x12c   :  { %v51_v51 = vadd.f32 1e-05, %v49_v50  ;;  %v5866_v50 = vld [vmem:[%s8112_s3 + $0x4a0] ss:$144 sps:$4 sm:$0xff]  }
 0x12e   :  { %6276 = vrsqrt.f32 %v51_v51  ;;  %v5869_v51 = vld [vmem:[%s8112_s3 + $0x4a8] ss:$144 sps:$4 sm:$0xff]  }
 0x134   :  { %v6275_v52 = vpop.eup %6274 }
 0x135   :  { %v54_v53 = vmul.f32 %v6275_v52, %v6451_v13  ;;  %v5812_v13 = vld [vmem:[%s8112_s3 + $0x370] ss:$144 sps:$4 sm:$0xff]   ;;  %v5874_v52 = vld [vmem:[%s8112_s3 + $0x5c4] ss:$144 sps:$4 sm:$0xff]  }
 0x137   :  { %v62_v56 = vmul.f32 %v5007_v54, %v54_v53  ;;  %v5877_v53 = vld [vmem:[%s8112_s3 + $0x5cc] ss:$144 sps:$4 sm:$0xff]  }
 0x138   :  { %v6277_v55 = vpop.eup %6276 }
 0x139   :  { %v55_v57 = vmul.f32 %v6277_v55, %v6456_v17  ;;  %v70_v60 = vadd.f32 %v5008_v58, %v62_v56  ;;  %v5818_v17 = vld [vmem:[%s8112_s3 + $0x490] ss:$144 sps:$4 sm:$0xff]   ;;  %v5875_v55 = vld [vmem:[%s8112_s3 + $0x5c8] ss:$144 sps:$4 sm:$0xff]   ;;  %v5880_v56 = vld [vmem:[%s8112_s3 + $0x6e4] ss:$144 sps:$4 sm:$0xff]  }
 0x13b   :  { %v63_v59 = vmul.f32 %v5007_v54, %v55_v57  ;;  %v5872_v54 = vld [vmem:[%s8112_s3 + $0x5c0] ss:$144 sps:$4 sm:$0xff]   ;;  %v5883_v57 = vld [vmem:[%s8112_s3 + $0x6ec] ss:$144 sps:$4 sm:$0xff]  }
 0x13d   :  { %v71_v61 = vadd.f32 %v5008_v58, %v63_v59  ;;  %v5878_v58 = vld [vmem:[%s8112_s3 + $0x6e0] ss:$144 sps:$4 sm:$0xff]   ;;  %v5881_v59 = vld [vmem:[%s8112_s3 + $0x6e8] ss:$144 sps:$4 sm:$0xff]  }
 0x13f   :  { %v6554_v0 = vpack.c.bf16 %v71_v61, %v70_v60  ;;  %v5886_v60 = vld [vmem:[%s8112_s3 + $0x804] ss:$144 sps:$4 sm:$0xff]   ;;  %v5889_v61 = vld [vmem:[%s8112_s3 + $0x80c] ss:$144 sps:$4 sm:$0xff]  }
 0x141   :  { %1834 = vmatmul.mubr.bf16.vlgmr.msra.gmra.mrb[0].mxu0 %v6554_v0  ;;  %1877 = vmatmul.mubr.bf16.vlgmr.msra.gmra.mrb[0].mxu1 %v6554_v0 }
 0x142   :  { %1888 = vmatpush1.bf16.msra.mxu0 %v5794_v62  ;;  %1931 = vmatpush1.bf16.msra.mxu1 %v5797_v63  ;;  %v5884_v62 = vld [vmem:[%s8112_s3 + $0x800] ss:$144 sps:$4 sm:$0xff]   ;;  %v5887_v63 = vld [vmem:[%s8112_s3 + $0x808] ss:$144 sps:$4 sm:$0xff]  }
 0x143   :  { %1889 = vmatprep.subr.bf16.mxu0 %v5802_v3  ;;  %1932 = vmatprep.subr.bf16.mxu1 %v5805_v4  ;;  %v5892_v3 = vld [vmem:[%s8112_s3 + $0x34] ss:$144 sps:$4 sm:$0xff]   ;;  %v5895_v4 = vld [vmem:[%s8112_s3 + $0x3c] ss:$144 sps:$4 sm:$0xff]  }
 0x144   :  { %1919 = vmatprep.mubr.bf16.mxu0 %v6374_v45  ;;  %1962 = vmatprep.mubr.bf16.mxu1 %v6374_v45 }
 0x146   :  { %1890 = vmatpush1.bf16.msra.mxu0 %v5800_v5  ;;  %1933 = vmatpush1.bf16.msra.mxu1 %v5803_v6  ;;  %v5890_v5 = vld [vmem:[%s8112_s3 + $0x30] ss:$144 sps:$4 sm:$0xff]   ;;  %v5893_v6 = vld [vmem:[%s8112_s3 + $0x38] ss:$144 sps:$4 sm:$0xff]  }
 0x147   :  { %1891 = vmatprep.subr.bf16.mxu0 %v5808_v7  ;;  %1934 = vmatprep.subr.bf16.mxu1 %v5811_v8  ;;  %v5898_v7 = vld [vmem:[%s8112_s3 + $0x154] ss:$144 sps:$4 sm:$0xff]   ;;  %v5901_v8 = vld [vmem:[%s8112_s3 + $0x15c] ss:$144 sps:$4 sm:$0xff]  }
 0x14a   :  { %1892 = vmatpush1.bf16.msra.mxu0 %v5806_v9  ;;  %1935 = vmatpush1.bf16.msra.mxu1 %v5809_v10  ;;  %v5896_v9 = vld [vmem:[%s8112_s3 + $0x150] ss:$144 sps:$4 sm:$0xff]   ;;  %v5899_v10 = vld [vmem:[%s8112_s3 + $0x158] ss:$144 sps:$4 sm:$0xff]  }
 0x14b   :  { %1893 = vmatprep.subr.bf16.mxu0 %v5814_v11  ;;  %1936 = vmatprep.subr.bf16.mxu1 %v5817_v12  ;;  %v5904_v11 = vld [vmem:[%s8112_s3 + $0x274] ss:$144 sps:$4 sm:$0xff]   ;;  %v5907_v12 = vld [vmem:[%s8112_s3 + $0x27c] ss:$144 sps:$4 sm:$0xff]  }
 0x14e   :  { %1894 = vmatpush1.bf16.msra.mxu0 %v5812_v13  ;;  %1937 = vmatpush1.bf16.msra.mxu1 %v5815_v14  ;;  %v5902_v13 = vld [vmem:[%s8112_s3 + $0x270] ss:$144 sps:$4 sm:$0xff]   ;;  %v5905_v14 = vld [vmem:[%s8112_s3 + $0x278] ss:$144 sps:$4 sm:$0xff]  }
 0x14f   :  { %1895 = vmatprep.subr.bf16.mxu0 %v5820_v15  ;;  %1938 = vmatprep.subr.bf16.mxu1 %v5823_v16  ;;  %v5910_v15 = vld [vmem:[%s8112_s3 + $0x394] ss:$144 sps:$4 sm:$0xff]   ;;  %v5913_v16 = vld [vmem:[%s8112_s3 + $0x39c] ss:$144 sps:$4 sm:$0xff]  }
 0x152   :  { %1896 = vmatpush1.bf16.msra.mxu0 %v5818_v17  ;;  %1939 = vmatpush1.bf16.msra.mxu1 %v5821_v18  ;;  %v5908_v17 = vld [vmem:[%s8112_s3 + $0x390] ss:$144 sps:$4 sm:$0xff]   ;;  %v5911_v18 = vld [vmem:[%s8112_s3 + $0x398] ss:$144 sps:$4 sm:$0xff]  }
 0x153   :  { %1897 = vmatprep.subr.bf16.mxu0 %v5826_v19  ;;  %1940 = vmatprep.subr.bf16.mxu1 %v5829_v20  ;;  %v5916_v19 = vld [vmem:[%s8112_s3 + $0x4b4] ss:$144 sps:$4 sm:$0xff]   ;;  %v5919_v20 = vld [vmem:[%s8112_s3 + $0x4bc] ss:$144 sps:$4 sm:$0xff]  }
 0x156   :  { %1898 = vmatpush1.bf16.msra.mxu0 %v5824_v21  ;;  %1941 = vmatpush1.bf16.msra.mxu1 %v5827_v22  ;;  %v5914_v21 = vld [vmem:[%s8112_s3 + $0x4b0] ss:$144 sps:$4 sm:$0xff]   ;;  %v5917_v22 = vld [vmem:[%s8112_s3 + $0x4b8] ss:$144 sps:$4 sm:$0xff]  }
 0x157   :  { %1899 = vmatprep.subr.bf16.mxu0 %v5832_v23  ;;  %1942 = vmatprep.subr.bf16.mxu1 %v5835_v24  ;;  %v5922_v23 = vld [vmem:[%s8112_s3 + $0x5d4] ss:$144 sps:$4 sm:$0xff]   ;;  %v5925_v24 = vld [vmem:[%s8112_s3 + $0x5dc] ss:$144 sps:$4 sm:$0xff]  }
 0x15a   :  { %1900 = vmatpush1.bf16.msra.mxu0 %v5830_v25  ;;  %1943 = vmatpush1.bf16.msra.mxu1 %v5833_v26  ;;  %v5920_v25 = vld [vmem:[%s8112_s3 + $0x5d0] ss:$144 sps:$4 sm:$0xff]   ;;  %v5923_v26 = vld [vmem:[%s8112_s3 + $0x5d8] ss:$144 sps:$4 sm:$0xff]  }
 0x15b   :  { %1901 = vmatprep.subr.bf16.mxu0 %v5838_v27  ;;  %1944 = vmatprep.subr.bf16.mxu1 %v5841_v28  ;;  %v5928_v27 = vld [vmem:[%s8112_s3 + $0x6f4] ss:$144 sps:$4 sm:$0xff]   ;;  %v5931_v28 = vld [vmem:[%s8112_s3 + $0x6fc] ss:$144 sps:$4 sm:$0xff]  }
 0x15e   :  { %1902 = vmatpush1.bf16.msra.mxu0 %v5836_v29  ;;  %1945 = vmatpush1.bf16.msra.mxu1 %v5839_v30  ;;  %v5926_v29 = vld [vmem:[%s8112_s3 + $0x6f0] ss:$144 sps:$4 sm:$0xff]   ;;  %v5929_v30 = vld [vmem:[%s8112_s3 + $0x6f8] ss:$144 sps:$4 sm:$0xff]  }
 0x15f   :  { %1973 = vmatprep.subr.bf16.mxu0 %v5844_v31  ;;  %2016 = vmatprep.subr.bf16.mxu1 %v5847_v32  ;;  %v5934_v31 = vld [vmem:[%s8112_s3 + $0x814] ss:$144 sps:$4 sm:$0xff]   ;;  %v5937_v32 = vld [vmem:[%s8112_s3 + $0x81c] ss:$144 sps:$4 sm:$0xff]  }
 0x161   :  { %1920 = vmatmul.mubr.bf16.vlgmr.msra.gmra.mrb[4].mxu0 %v6554_v0  ;;  %1963 = vmatmul.mubr.bf16.vlgmr.msra.gmra.mrb[4].mxu1 %v6554_v0 }
 0x162   :  { %1974 = vmatpush1.bf16.msra.mxu0 %v5842_v33  ;;  %2017 = vmatpush1.bf16.msra.mxu1 %v5845_v34  ;;  %v5932_v33 = vld [vmem:[%s8112_s3 + $0x810] ss:$144 sps:$4 sm:$0xff]   ;;  %v5935_v34 = vld [vmem:[%s8112_s3 + $0x818] ss:$144 sps:$4 sm:$0xff]  }
 0x163   :  { %1975 = vmatprep.subr.bf16.mxu0 %v5850_v35  ;;  %2018 = vmatprep.subr.bf16.mxu1 %v5853_v36  ;;  %v5940_v35 = vld [vmem:[%s8112_s3 + $0x44] ss:$144 sps:$4 sm:$0xff]   ;;  %v5943_v36 = vld [vmem:[%s8112_s3 + $0x4c] ss:$144 sps:$4 sm:$0xff]  }
 0x164   :  { %2005 = vmatprep.mubr.bf16.mxu0 %v6374_v45  ;;  %2048 = vmatprep.mubr.bf16.mxu1 %v6374_v45 }
 0x166   :  { %1976 = vmatpush1.bf16.msra.mxu0 %v5848_v37  ;;  %2019 = vmatpush1.bf16.msra.mxu1 %v5851_v38  ;;  %v5938_v37 = vld [vmem:[%s8112_s3 + $0x40] ss:$144 sps:$4 sm:$0xff]   ;;  %v5941_v38 = vld [vmem:[%s8112_s3 + $0x48] ss:$144 sps:$4 sm:$0xff]  }
 0x167   :  { %1977 = vmatprep.subr.bf16.mxu0 %v5856_v39  ;;  %2020 = vmatprep.subr.bf16.mxu1 %v5859_v40  ;;  %v5946_v39 = vld [vmem:[%s8112_s3 + $0x164] ss:$144 sps:$4 sm:$0xff]   ;;  %v5949_v40 = vld [vmem:[%s8112_s3 + $0x16c] ss:$144 sps:$4 sm:$0xff]  }
 0x16a   :  { %1978 = vmatpush1.bf16.msra.mxu0 %v5854_v41  ;;  %2021 = vmatpush1.bf16.msra.mxu1 %v5857_v42  ;;  %v5944_v41 = vld [vmem:[%s8112_s3 + $0x160] ss:$144 sps:$4 sm:$0xff]   ;;  %v5947_v42 = vld [vmem:[%s8112_s3 + $0x168] ss:$144 sps:$4 sm:$0xff]  }
 0x16b   :  { %1979 = vmatprep.subr.bf16.mxu0 %v5862_v43  ;;  %2022 = vmatprep.subr.bf16.mxu1 %v5865_v44  ;;  %v5952_v43 = vld [vmem:[%s8112_s3 + $0x284] ss:$144 sps:$4 sm:$0xff]   ;;  %v5955_v44 = vld [vmem:[%s8112_s3 + $0x28c] ss:$144 sps:$4 sm:$0xff]  }
 0x16e   :  { %1980 = vmatpush1.bf16.msra.mxu0 %v5860_v46  ;;  %2023 = vmatpush1.bf16.msra.mxu1 %v5863_v47  ;;  %v5950_v46 = vld [vmem:[%s8112_s3 + $0x280] ss:$144 sps:$4 sm:$0xff]   ;;  %v5953_v47 = vld [vmem:[%s8112_s3 + $0x288] ss:$144 sps:$4 sm:$0xff]  }
 0x16f   :  { %1981 = vmatprep.subr.bf16.mxu0 %v5868_v48  ;;  %2024 = vmatprep.subr.bf16.mxu1 %v5871_v49  ;;  %v5958_v48 = vld [vmem:[%s8112_s3 + $0x3a4] ss:$144 sps:$4 sm:$0xff]   ;;  %v5961_v49 = vld [vmem:[%s8112_s3 + $0x3ac] ss:$144 sps:$4 sm:$0xff]  }
 0x172   :  { %1982 = vmatpush1.bf16.msra.mxu0 %v5866_v50  ;;  %2025 = vmatpush1.bf16.msra.mxu1 %v5869_v51  ;;  %v5956_v50 = vld [vmem:[%s8112_s3 + $0x3a0] ss:$144 sps:$4 sm:$0xff]   ;;  %v5959_v51 = vld [vmem:[%s8112_s3 + $0x3a8] ss:$144 sps:$4 sm:$0xff]  }
 0x173   :  { %1983 = vmatprep.subr.bf16.mxu0 %v5874_v52  ;;  %2026 = vmatprep.subr.bf16.mxu1 %v5877_v53  ;;  %v5964_v52 = vld [vmem:[%s8112_s3 + $0x4c4] ss:$144 sps:$4 sm:$0xff]   ;;  %v5967_v53 = vld [vmem:[%s8112_s3 + $0x4cc] ss:$144 sps:$4 sm:$0xff]  }
 0x176   :  { %1984 = vmatpush1.bf16.msra.mxu0 %v5872_v54  ;;  %2027 = vmatpush1.bf16.msra.mxu1 %v5875_v55  ;;  %v5962_v54 = vld [vmem:[%s8112_s3 + $0x4c0] ss:$144 sps:$4 sm:$0xff]   ;;  %v5965_v55 = vld [vmem:[%s8112_s3 + $0x4c8] ss:$144 sps:$4 sm:$0xff]  }
 0x177   :  { %1985 = vmatprep.subr.bf16.mxu0 %v5880_v56  ;;  %2028 = vmatprep.subr.bf16.mxu1 %v5883_v57  ;;  %v5970_v56 = vld [vmem:[%s8112_s3 + $0x5e4] ss:$144 sps:$4 sm:$0xff]   ;;  %v5973_v57 = vld [vmem:[%s8112_s3 + $0x5ec] ss:$144 sps:$4 sm:$0xff]  }
 0x17a   :  { %1986 = vmatpush1.bf16.msra.mxu0 %v5878_v58  ;;  %2029 = vmatpush1.bf16.msra.mxu1 %v5881_v59  ;;  %v5968_v58 = vld [vmem:[%s8112_s3 + $0x5e0] ss:$144 sps:$4 sm:$0xff]   ;;  %v5971_v59 = vld [vmem:[%s8112_s3 + $0x5e8] ss:$144 sps:$4 sm:$0xff]  }
 0x17b   :  { %1987 = vmatprep.subr.bf16.mxu0 %v5886_v60  ;;  %2030 = vmatprep.subr.bf16.mxu1 %v5889_v61  ;;  %v5976_v60 = vld [vmem:[%s8112_s3 + $0x704] ss:$144 sps:$4 sm:$0xff]   ;;  %v5979_v61 = vld [vmem:[%s8112_s3 + $0x70c] ss:$144 sps:$4 sm:$0xff]  }
 0x17e   :  { %1988 = vmatpush1.bf16.msra.mxu0 %v5884_v62  ;;  %2031 = vmatpush1.bf16.msra.mxu1 %v5887_v63  ;;  %v5974_v62 = vld [vmem:[%s8112_s3 + $0x700] ss:$144 sps:$4 sm:$0xff]   ;;  %v5977_v63 = vld [vmem:[%s8112_s3 + $0x708] ss:$144 sps:$4 sm:$0xff]  }
 0x17f   :  { %2059 = vmatprep.subr.bf16.mxu0 %v5892_v3  ;;  %2102 = vmatprep.subr.bf16.mxu1 %v5895_v4  ;;  %v5982_v3 = vld [vmem:[%s8112_s3 + $0x824] ss:$144 sps:$4 sm:$0xff]   ;;  %v5985_v4 = vld [vmem:[%s8112_s3 + $0x82c] ss:$144 sps:$4 sm:$0xff]  }
 0x181   :  { %2006 = vmatmul.mubr.bf16.vlgmr.msra.gmra.mrb[8].mxu0 %v6554_v0  ;;  %2049 = vmatmul.mubr.bf16.vlgmr.msra.gmra.mrb[8].mxu1 %v6554_v0 }
 0x182   :  { %2060 = vmatpush1.bf16.msra.mxu0 %v5890_v5  ;;  %2103 = vmatpush1.bf16.msra.mxu1 %v5893_v6  ;;  %v5980_v5 = vld [vmem:[%s8112_s3 + $0x820] ss:$144 sps:$4 sm:$0xff]   ;;  %v5983_v6 = vld [vmem:[%s8112_s3 + $0x828] ss:$144 sps:$4 sm:$0xff]  }
 0x183   :  { %2061 = vmatprep.subr.bf16.mxu0 %v5898_v7  ;;  %2104 = vmatprep.subr.bf16.mxu1 %v5901_v8  ;;  %v5988_v7 = vld [vmem:[%s8112_s3 + $0x54] ss:$144 sps:$4 sm:$0xff]   ;;  %v5991_v8 = vld [vmem:[%s8112_s3 + $0x5c] ss:$144 sps:$4 sm:$0xff]  }
 0x184   :  { %2091 = vmatprep.mubr.bf16.mxu0 %v6374_v45  ;;  %2134 = vmatprep.mubr.bf16.mxu1 %v6374_v45 }
 0x186   :  { %2062 = vmatpush1.bf16.msra.mxu0 %v5896_v9  ;;  %2105 = vmatpush1.bf16.msra.mxu1 %v5899_v10  ;;  %v5986_v9 = vld [vmem:[%s8112_s3 + $0x50] ss:$144 sps:$4 sm:$0xff]   ;;  %v5989_v10 = vld [vmem:[%s8112_s3 + $0x58] ss:$144 sps:$4 sm:$0xff]  }
 0x187   :  { %2063 = vmatprep.subr.bf16.mxu0 %v5904_v11  ;;  %2106 = vmatprep.subr.bf16.mxu1 %v5907_v12  ;;  %v5994_v11 = vld [vmem:[%s8112_s3 + $0x174] ss:$144 sps:$4 sm:$0xff]   ;;  %v5997_v12 = vld [vmem:[%s8112_s3 + $0x17c] ss:$144 sps:$4 sm:$0xff]  }
 0x18a   :  { %2064 = vmatpush1.bf16.msra.mxu0 %v5902_v13  ;;  %2107 = vmatpush1.bf16.msra.mxu1 %v5905_v14  ;;  %v5992_v13 = vld [vmem:[%s8112_s3 + $0x170] ss:$144 sps:$4 sm:$0xff]   ;;  %v5995_v14 = vld [vmem:[%s8112_s3 + $0x178] ss:$144 sps:$4 sm:$0xff]  }
 0x18b   :  { %2065 = vmatprep.subr.bf16.mxu0 %v5910_v15  ;;  %2108 = vmatprep.subr.bf16.mxu1 %v5913_v16  ;;  %v6000_v15 = vld [vmem:[%s8112_s3 + $0x294] ss:$144 sps:$4 sm:$0xff]   ;;  %v6003_v16 = vld [vmem:[%s8112_s3 + $0x29c] ss:$144 sps:$4 sm:$0xff]  }
 0x18e   :  { %2066 = vmatpush1.bf16.msra.mxu0 %v5908_v17  ;;  %2109 = vmatpush1.bf16.msra.mxu1 %v5911_v18  ;;  %v5998_v17 = vld [vmem:[%s8112_s3 + $0x290] ss:$144 sps:$4 sm:$0xff]   ;;  %v6001_v18 = vld [vmem:[%s8112_s3 + $0x298] ss:$144 sps:$4 sm:$0xff]  }
 0x18f   :  { %2067 = vmatprep.subr.bf16.mxu0 %v5916_v19  ;;  %2110 = vmatprep.subr.bf16.mxu1 %v5919_v20  ;;  %v6006_v19 = vld [vmem:[%s8112_s3 + $0x3b4] ss:$144 sps:$4 sm:$0xff]   ;;  %v6009_v20 = vld [vmem:[%s8112_s3 + $0x3bc] ss:$144 sps:$4 sm:$0xff]  }
 0x192   :  { %2068 = vmatpush1.bf16.msra.mxu0 %v5914_v21  ;;  %2111 = vmatpush1.bf16.msra.mxu1 %v5917_v22  ;;  %v6004_v21 = vld [vmem:[%s8112_s3 + $0x3b0] ss:$144 sps:$4 sm:$0xff]   ;;  %v6007_v22 = vld [vmem:[%s8112_s3 + $0x3b8] ss:$144 sps:$4 sm:$0xff]  }
 0x193   :  { %2069 = vmatprep.subr.bf16.mxu0 %v5922_v23  ;;  %2112 = vmatprep.subr.bf16.mxu1 %v5925_v24  ;;  %v6012_v23 = vld [vmem:[%s8112_s3 + $0x4d4] ss:$144 sps:$4 sm:$0xff]   ;;  %v6015_v24 = vld [vmem:[%s8112_s3 + $0x4dc] ss:$144 sps:$4 sm:$0xff]  }
 0x196   :  { %2070 = vmatpush1.bf16.msra.mxu0 %v5920_v25  ;;  %2113 = vmatpush1.bf16.msra.mxu1 %v5923_v26  ;;  %v6010_v25 = vld [vmem:[%s8112_s3 + $0x4d0] ss:$144 sps:$4 sm:$0xff]   ;;  %v6013_v26 = vld [vmem:[%s8112_s3 + $0x4d8] ss:$144 sps:$4 sm:$0xff]  }
 0x197   :  { %2071 = vmatprep.subr.bf16.mxu0 %v5928_v27  ;;  %2114 = vmatprep.subr.bf16.mxu1 %v5931_v28  ;;  %v6018_v27 = vld [vmem:[%s8112_s3 + $0x5f4] ss:$144 sps:$4 sm:$0xff]   ;;  %v6021_v28 = vld [vmem:[%s8112_s3 + $0x5fc] ss:$144 sps:$4 sm:$0xff]  }
 0x19a   :  { %2072 = vmatpush1.bf16.msra.mxu0 %v5926_v29  ;;  %2115 = vmatpush1.bf16.msra.mxu1 %v5929_v30  ;;  %v6016_v29 = vld [vmem:[%s8112_s3 + $0x5f0] ss:$144 sps:$4 sm:$0xff]   ;;  %v6019_v30 = vld [vmem:[%s8112_s3 + $0x5f8] ss:$144 sps:$4 sm:$0xff]  }
 0x19b   :  { %2073 = vmatprep.subr.bf16.mxu0 %v5934_v31  ;;  %2116 = vmatprep.subr.bf16.mxu1 %v5937_v32  ;;  %v6024_v31 = vld [vmem:[%s8112_s3 + $0x714] ss:$144 sps:$4 sm:$0xff]   ;;  %v6027_v32 = vld [vmem:[%s8112_s3 + $0x71c] ss:$144 sps:$4 sm:$0xff]  }
 0x19e   :  { %2074 = vmatpush1.bf16.msra.mxu0 %v5932_v33  ;;  %2117 = vmatpush1.bf16.msra.mxu1 %v5935_v34  ;;  %v6022_v33 = vld [vmem:[%s8112_s3 + $0x710] ss:$144 sps:$4 sm:$0xff]   ;;  %v6025_v34 = vld [vmem:[%s8112_s3 + $0x718] ss:$144 sps:$4 sm:$0xff]  }
 0x19f   :  { %2145 = vmatprep.subr.bf16.mxu0 %v5940_v35  ;;  %2188 = vmatprep.subr.bf16.mxu1 %v5943_v36  ;;  %v6030_v35 = vld [vmem:[%s8112_s3 + $0x834] ss:$144 sps:$4 sm:$0xff]   ;;  %v6033_v36 = vld [vmem:[%s8112_s3 + $0x83c] ss:$144 sps:$4 sm:$0xff]  }
 0x1a1   :  { %2092 = vmatmul.mubr.bf16.vlgmr.msra.gmra.mrb[12].mxu0 %v6554_v0  ;;  %2135 = vmatmul.mubr.bf16.vlgmr.msra.gmra.mrb[12].mxu1 %v6554_v0 }
 0x1a2   :  { %2146 = vmatpush1.bf16.msra.mxu0 %v5938_v37  ;;  %2189 = vmatpush1.bf16.msra.mxu1 %v5941_v38  ;;  %v6028_v37 = vld [vmem:[%s8112_s3 + $0x830] ss:$144 sps:$4 sm:$0xff]   ;;  %v6031_v38 = vld [vmem:[%s8112_s3 + $0x838] ss:$144 sps:$4 sm:$0xff]  }
 0x1a3   :  { %2147 = vmatprep.subr.bf16.mxu0 %v5946_v39  ;;  %2190 = vmatprep.subr.bf16.mxu1 %v5949_v40  ;;  %v6036_v39 = vld [vmem:[%s8112_s3 + $0x64] ss:$144 sps:$4 sm:$0xff]   ;;  %v6039_v40 = vld [vmem:[%s8112_s3 + $0x6c] ss:$144 sps:$4 sm:$0xff]  }
 0x1a4   :  { %2177 = vmatprep.mubr.bf16.mxu0 %v6374_v45  ;;  %2220 = vmatprep.mubr.bf16.mxu1 %v6374_v45 }
 0x1a6   :  { %2148 = vmatpush1.bf16.msra.mxu0 %v5944_v41  ;;  %2191 = vmatpush1.bf16.msra.mxu1 %v5947_v42  ;;  %v6034_v41 = vld [vmem:[%s8112_s3 + $0x60] ss:$144 sps:$4 sm:$0xff]   ;;  %v6037_v42 = vld [vmem:[%s8112_s3 + $0x68] ss:$144 sps:$4 sm:$0xff]  }
 0x1a7   :  { %2149 = vmatprep.subr.bf16.mxu0 %v5952_v43  ;;  %2192 = vmatprep.subr.bf16.mxu1 %v5955_v44  ;;  %v6042_v43 = vld [vmem:[%s8112_s3 + $0x184] ss:$144 sps:$4 sm:$0xff]   ;;  %v6045_v44 = vld [vmem:[%s8112_s3 + $0x18c] ss:$144 sps:$4 sm:$0xff]  }
 0x1aa   :  { %2150 = vmatpush1.bf16.msra.mxu0 %v5950_v46  ;;  %2193 = vmatpush1.bf16.msra.mxu1 %v5953_v47  ;;  %v6040_v46 = vld [vmem:[%s8112_s3 + $0x180] ss:$144 sps:$4 sm:$0xff]   ;;  %v6043_v47 = vld [vmem:[%s8112_s3 + $0x188] ss:$144 sps:$4 sm:$0xff]  }
 0x1ab   :  { %2151 = vmatprep.subr.bf16.mxu0 %v5958_v48  ;;  %2194 = vmatprep.subr.bf16.mxu1 %v5961_v49  ;;  %v6048_v48 = vld [vmem:[%s8112_s3 + $0x2a4] ss:$144 sps:$4 sm:$0xff]   ;;  %v6051_v49 = vld [vmem:[%s8112_s3 + $0x2ac] ss:$144 sps:$4 sm:$0xff]  }
 0x1ae   :  { %2152 = vmatpush1.bf16.msra.mxu0 %v5956_v50  ;;  %2195 = vmatpush1.bf16.msra.mxu1 %v5959_v51  ;;  %v6046_v50 = vld [vmem:[%s8112_s3 + $0x2a0] ss:$144 sps:$4 sm:$0xff]   ;;  %v6049_v51 = vld [vmem:[%s8112_s3 + $0x2a8] ss:$144 sps:$4 sm:$0xff]  }
 0x1af   :  { %2153 = vmatprep.subr.bf16.mxu0 %v5964_v52  ;;  %2196 = vmatprep.subr.bf16.mxu1 %v5967_v53  ;;  %v6054_v52 = vld [vmem:[%s8112_s3 + $0x3c4] ss:$144 sps:$4 sm:$0xff]   ;;  %v6057_v53 = vld [vmem:[%s8112_s3 + $0x3cc] ss:$144 sps:$4 sm:$0xff]  }
 0x1b2   :  { %2154 = vmatpush1.bf16.msra.mxu0 %v5962_v54  ;;  %2197 = vmatpush1.bf16.msra.mxu1 %v5965_v55  ;;  %v6052_v54 = vld [vmem:[%s8112_s3 + $0x3c0] ss:$144 sps:$4 sm:$0xff]   ;;  %v6055_v55 = vld [vmem:[%s8112_s3 + $0x3c8] ss:$144 sps:$4 sm:$0xff]  }
 0x1b3   :  { %2155 = vmatprep.subr.bf16.mxu0 %v5970_v56  ;;  %2198 = vmatprep.subr.bf16.mxu1 %v5973_v57  ;;  %v6060_v56 = vld [vmem:[%s8112_s3 + $0x4e4] ss:$144 sps:$4 sm:$0xff]   ;;  %v6063_v57 = vld [vmem:[%s8112_s3 + $0x4ec] ss:$144 sps:$4 sm:$0xff]  }
 0x1b6   :  { %2156 = vmatpush1.bf16.msra.mxu0 %v5968_v58  ;;  %2199 = vmatpush1.bf16.msra.mxu1 %v5971_v59  ;;  %v6058_v58 = vld [vmem:[%s8112_s3 + $0x4e0] ss:$144 sps:$4 sm:$0xff]   ;;  %v6061_v59 = vld [vmem:[%s8112_s3 + $0x4e8] ss:$144 sps:$4 sm:$0xff]  }
 0x1b7   :  { %2157 = vmatprep.subr.bf16.mxu0 %v5976_v60  ;;  %2200 = vmatprep.subr.bf16.mxu1 %v5979_v61  ;;  %v6066_v60 = vld [vmem:[%s8112_s3 + $0x604] ss:$144 sps:$4 sm:$0xff]   ;;  %v6069_v61 = vld [vmem:[%s8112_s3 + $0x60c] ss:$144 sps:$4 sm:$0xff]  }
 0x1ba   :  { %2158 = vmatpush1.bf16.msra.mxu0 %v5974_v62  ;;  %2201 = vmatpush1.bf16.msra.mxu1 %v5977_v63  ;;  %v6064_v62 = vld [vmem:[%s8112_s3 + $0x600] ss:$144 sps:$4 sm:$0xff]   ;;  %v6067_v63 = vld [vmem:[%s8112_s3 + $0x608] ss:$144 sps:$4 sm:$0xff]  }
 0x1bb   :  { %2159 = vmatprep.subr.bf16.mxu0 %v5982_v3  ;;  %2202 = vmatprep.subr.bf16.mxu1 %v5985_v4  ;;  %v6072_v3 = vld [vmem:[%s8112_s3 + $0x724] ss:$144 sps:$4 sm:$0xff]   ;;  %v6075_v4 = vld [vmem:[%s8112_s3 + $0x72c] ss:$144 sps:$4 sm:$0xff]  }
 0x1be   :  { %2160 = vmatpush1.bf16.msra.mxu0 %v5980_v5  ;;  %2203 = vmatpush1.bf16.msra.mxu1 %v5983_v6  ;;  %v6070_v5 = vld [vmem:[%s8112_s3 + $0x720] ss:$144 sps:$4 sm:$0xff]   ;;  %v6073_v6 = vld [vmem:[%s8112_s3 + $0x728] ss:$144 sps:$4 sm:$0xff]  }
 0x1bf   :  { %2231 = vmatprep.subr.bf16.mxu0 %v5988_v7  ;;  %2274 = vmatprep.subr.bf16.mxu1 %v5991_v8  ;;  %v6078_v7 = vld [vmem:[%s8112_s3 + $0x844] ss:$144 sps:$4 sm:$0xff]   ;;  %v6081_v8 = vld [vmem:[%s8112_s3 + $0x84c] ss:$144 sps:$4 sm:$0xff]  }
 0x1c1   :  { %2178 = vmatmul.mubr.bf16.vlgmr.msra.gmra.mrb[16].mxu0 %v6554_v0  ;;  %2221 = vmatmul.mubr.bf16.vlgmr.msra.gmra.mrb[16].mxu1 %v6554_v0 }
 0x1c2   :  { %2232 = vmatpush1.bf16.msra.mxu0 %v5986_v9  ;;  %2275 = vmatpush1.bf16.msra.mxu1 %v5989_v10  ;;  %v6076_v9 = vld [vmem:[%s8112_s3 + $0x840] ss:$144 sps:$4 sm:$0xff]   ;;  %v6079_v10 = vld [vmem:[%s8112_s3 + $0x848] ss:$144 sps:$4 sm:$0xff]  }
 0x1c3   :  { %2233 = vmatprep.subr.bf16.mxu0 %v5994_v11  ;;  %2276 = vmatprep.subr.bf16.mxu1 %v5997_v12  ;;  %v6084_v11 = vld [vmem:[%s8112_s3 + $0x74] ss:$144 sps:$4 sm:$0xff]   ;;  %v6087_v12 = vld [vmem:[%s8112_s3 + $0x7c] ss:$144 sps:$4 sm:$0xff]  }
 0x1c4   :  { %2263 = vmatprep.mubr.bf16.mxu0 %v6374_v45  ;;  %2306 = vmatprep.mubr.bf16.mxu1 %v6374_v45 }
 0x1c6   :  { %2234 = vmatpush1.bf16.msra.mxu0 %v5992_v13  ;;  %2277 = vmatpush1.bf16.msra.mxu1 %v5995_v14  ;;  %v6082_v13 = vld [vmem:[%s8112_s3 + $0x70] ss:$144 sps:$4 sm:$0xff]   ;;  %v6085_v14 = vld [vmem:[%s8112_s3 + $0x78] ss:$144 sps:$4 sm:$0xff]  }
 0x1c7   :  { %2235 = vmatprep.subr.bf16.mxu0 %v6000_v15  ;;  %2278 = vmatprep.subr.bf16.mxu1 %v6003_v16  ;;  %v6090_v15 = vld [vmem:[%s8112_s3 + $0x194] ss:$144 sps:$4 sm:$0xff]   ;;  %v6093_v16 = vld [vmem:[%s8112_s3 + $0x19c] ss:$144 sps:$4 sm:$0xff]  }
 0x1ca   :  { %2236 = vmatpush1.bf16.msra.mxu0 %v5998_v17  ;;  %2279 = vmatpush1.bf16.msra.mxu1 %v6001_v18  ;;  %v6088_v17 = vld [vmem:[%s8112_s3 + $0x190] ss:$144 sps:$4 sm:$0xff]   ;;  %v6091_v18 = vld [vmem:[%s8112_s3 + $0x198] ss:$144 sps:$4 sm:$0xff]  }
 0x1cb   :  { %2237 = vmatprep.subr.bf16.mxu0 %v6006_v19  ;;  %2280 = vmatprep.subr.bf16.mxu1 %v6009_v20  ;;  %v6096_v19 = vld [vmem:[%s8112_s3 + $0x2b4] ss:$144 sps:$4 sm:$0xff]   ;;  %v6099_v20 = vld [vmem:[%s8112_s3 + $0x2bc] ss:$144 sps:$4 sm:$0xff]  }
 0x1ce   :  { %2238 = vmatpush1.bf16.msra.mxu0 %v6004_v21  ;;  %2281 = vmatpush1.bf16.msra.mxu1 %v6007_v22  ;;  %v6094_v21 = vld [vmem:[%s8112_s3 + $0x2b0] ss:$144 sps:$4 sm:$0xff]   ;;  %v6097_v22 = vld [vmem:[%s8112_s3 + $0x2b8] ss:$144 sps:$4 sm:$0xff]  }
 0x1cf   :  { %2239 = vmatprep.subr.bf16.mxu0 %v6012_v23  ;;  %2282 = vmatprep.subr.bf16.mxu1 %v6015_v24  ;;  %v6102_v23 = vld [vmem:[%s8112_s3 + $0x3d4] ss:$144 sps:$4 sm:$0xff]   ;;  %v6105_v24 = vld [vmem:[%s8112_s3 + $0x3dc] ss:$144 sps:$4 sm:$0xff]  }
 0x1d2   :  { %2240 = vmatpush1.bf16.msra.mxu0 %v6010_v25  ;;  %2283 = vmatpush1.bf16.msra.mxu1 %v6013_v26  ;;  %v6100_v25 = vld [vmem:[%s8112_s3 + $0x3d0] ss:$144 sps:$4 sm:$0xff]   ;;  %v6103_v26 = vld [vmem:[%s8112_s3 + $0x3d8] ss:$144 sps:$4 sm:$0xff]  }
 0x1d3   :  { %2241 = vmatprep.subr.bf16.mxu0 %v6018_v27  ;;  %2284 = vmatprep.subr.bf16.mxu1 %v6021_v28  ;;  %v6108_v27 = vld [vmem:[%s8112_s3 + $0x4f4] ss:$144 sps:$4 sm:$0xff]   ;;  %v6111_v28 = vld [vmem:[%s8112_s3 + $0x4fc] ss:$144 sps:$4 sm:$0xff]  }
 0x1d6   :  { %2242 = vmatpush1.bf16.msra.mxu0 %v6016_v29  ;;  %2285 = vmatpush1.bf16.msra.mxu1 %v6019_v30  ;;  %v6106_v29 = vld [vmem:[%s8112_s3 + $0x4f0] ss:$144 sps:$4 sm:$0xff]   ;;  %v6109_v30 = vld [vmem:[%s8112_s3 + $0x4f8] ss:$144 sps:$4 sm:$0xff]  }
 0x1d7   :  { %2243 = vmatprep.subr.bf16.mxu0 %v6024_v31  ;;  %2286 = vmatprep.subr.bf16.mxu1 %v6027_v32  ;;  %v6114_v31 = vld [vmem:[%s8112_s3 + $0x614] ss:$144 sps:$4 sm:$0xff]   ;;  %v6117_v32 = vld [vmem:[%s8112_s3 + $0x61c] ss:$144 sps:$4 sm:$0xff]  }
 0x1da   :  { %2244 = vmatpush1.bf16.msra.mxu0 %v6022_v33  ;;  %2287 = vmatpush1.bf16.msra.mxu1 %v6025_v34  ;;  %v6112_v33 = vld [vmem:[%s8112_s3 + $0x610] ss:$144 sps:$4 sm:$0xff]   ;;  %v6115_v34 = vld [vmem:[%s8112_s3 + $0x618] ss:$144 sps:$4 sm:$0xff]  }
 0x1db   :  { %2245 = vmatprep.subr.bf16.mxu0 %v6030_v35  ;;  %2288 = vmatprep.subr.bf16.mxu1 %v6033_v36  ;;  %v6120_v35 = vld [vmem:[%s8112_s3 + $0x734] ss:$144 sps:$4 sm:$0xff]   ;;  %v6123_v36 = vld [vmem:[%s8112_s3 + $0x73c] ss:$144 sps:$4 sm:$0xff]  }
 0x1de   :  { %2246 = vmatpush1.bf16.msra.mxu0 %v6028_v37  ;;  %2289 = vmatpush1.bf16.msra.mxu1 %v6031_v38 }
 0x1df   :  { %2317 = vmatprep.subr.bf16.mxu0 %v6036_v39  ;;  %2360 = vmatprep.subr.bf16.mxu1 %v6039_v40 }
 0x1e1   :  { %2264 = vmatmul.mubr.bf16.vlgmr.msra.gmra.mrb[20].mxu0 %v6554_v0  ;;  %2307 = vmatmul.mubr.bf16.vlgmr.msra.gmra.mrb[20].mxu1 %v6554_v0 }
 0x1e2   :  { %2318 = vmatpush1.bf16.msra.mxu0 %v6034_v41  ;;  %2361 = vmatpush1.bf16.msra.mxu1 %v6037_v42 }
 0x1e3   :  { %2319 = vmatprep.subr.bf16.mxu0 %v6042_v43  ;;  %2362 = vmatprep.subr.bf16.mxu1 %v6045_v44  ;;  %v6118_v43 = vld [vmem:[%s8112_s3 + $0x730] ss:$144 sps:$4 sm:$0xff]   ;;  %v6121_v44 = vld [vmem:[%s8112_s3 + $0x738] ss:$144 sps:$4 sm:$0xff]  }
 0x1e4   :  { %2349 = vmatprep.mubr.bf16.mxu0 %v6374_v45  ;;  %2392 = vmatprep.mubr.bf16.mxu1 %v6374_v45 }
 0x1e6   :  { %2320 = vmatpush1.bf16.msra.mxu0 %v6040_v46  ;;  %2363 = vmatpush1.bf16.msra.mxu1 %v6043_v47 }
 0x1e7   :  { %2321 = vmatprep.subr.bf16.mxu0 %v6048_v48  ;;  %2364 = vmatprep.subr.bf16.mxu1 %v6051_v49 }
 0x1ea   :  { %2322 = vmatpush1.bf16.msra.mxu0 %v6046_v50  ;;  %2365 = vmatpush1.bf16.msra.mxu1 %v6049_v51  ;;  %v6126_v50 = vld [vmem:[%s8112_s3 + $0x854] ss:$144 sps:$4 sm:$0xff]   ;;  %v6129_v51 = vld [vmem:[%s8112_s3 + $0x85c] ss:$144 sps:$4 sm:$0xff]  }
 0x1eb   :  { %2323 = vmatprep.subr.bf16.mxu0 %v6054_v52  ;;  %2366 = vmatprep.subr.bf16.mxu1 %v6057_v53 }
 0x1ee   :  { %2324 = vmatpush1.bf16.msra.mxu0 %v6052_v54  ;;  %2367 = vmatpush1.bf16.msra.mxu1 %v6055_v55  ;;  %v6124_v54 = vld [vmem:[%s8112_s3 + $0x850] ss:$144 sps:$4 sm:$0xff]   ;;  %v6127_v55 = vld [vmem:[%s8112_s3 + $0x858] ss:$144 sps:$4 sm:$0xff]  }
 0x1ef   :  { %2325 = vmatprep.subr.bf16.mxu0 %v6060_v56  ;;  %2368 = vmatprep.subr.bf16.mxu1 %v6063_v57  ;;  %v6132_v56 = vld [vmem:[%s8112_s3 + $0x84] ss:$144 sps:$4 sm:$0xff]   ;;  %v6135_v57 = vld [vmem:[%s8112_s3 + $0x8c] ss:$144 sps:$4 sm:$0xff]  }
 0x1f2   :  { %2326 = vmatpush1.bf16.msra.mxu0 %v6058_v58  ;;  %2369 = vmatpush1.bf16.msra.mxu1 %v6061_v59  ;;  %v6130_v58 = vld [vmem:[%s8112_s3 + $0x80] ss:$144 sps:$4 sm:$0xff]   ;;  %v6133_v59 = vld [vmem:[%s8112_s3 + $0x88] ss:$144 sps:$4 sm:$0xff]  }
 0x1f3   :  { %2327 = vmatprep.subr.bf16.mxu0 %v6066_v60  ;;  %2370 = vmatprep.subr.bf16.mxu1 %v6069_v61  ;;  %v6138_v60 = vld [vmem:[%s8112_s3 + $0x1a4] ss:$144 sps:$4 sm:$0xff]   ;;  %v6141_v61 = vld [vmem:[%s8112_s3 + $0x1ac] ss:$144 sps:$4 sm:$0xff]  }
 0x1f6   :  { %2328 = vmatpush1.bf16.msra.mxu0 %v6064_v62  ;;  %2371 = vmatpush1.bf16.msra.mxu1 %v6067_v63  ;;  %v6136_v62 = vld [vmem:[%s8112_s3 + $0x1a0] ss:$144 sps:$4 sm:$0xff]   ;;  %v6139_v63 = vld [vmem:[%s8112_s3 + $0x1a8] ss:$144 sps:$4 sm:$0xff]  }
 0x1f7   :  { %2329 = vmatprep.subr.bf16.mxu0 %v6072_v3  ;;  %2372 = vmatprep.subr.bf16.mxu1 %v6075_v4  ;;  %v6144_v3 = vld [vmem:[%s8112_s3 + $0x2c4] ss:$144 sps:$4 sm:$0xff]   ;;  %v6147_v4 = vld [vmem:[%s8112_s3 + $0x2cc] ss:$144 sps:$4 sm:$0xff]  }
 0x1fa   :  { %2330 = vmatpush1.bf16.msra.mxu0 %v6070_v5  ;;  %2373 = vmatpush1.bf16.msra.mxu1 %v6073_v6  ;;  %v6142_v5 = vld [vmem:[%s8112_s3 + $0x2c0] ss:$144 sps:$4 sm:$0xff]   ;;  %v6145_v6 = vld [vmem:[%s8112_s3 + $0x2c8] ss:$144 sps:$4 sm:$0xff]  }
 0x1fb   :  { %2331 = vmatprep.subr.bf16.mxu0 %v6078_v7  ;;  %2374 = vmatprep.subr.bf16.mxu1 %v6081_v8  ;;  %v6150_v7 = vld [vmem:[%s8112_s3 + $0x3e4] ss:$144 sps:$4 sm:$0xff]   ;;  %v6148_v8 = vld [vmem:[%s8112_s3 + $0x3e0] ss:$144 sps:$4 sm:$0xff]  }
 0x1fe   :  { %2332 = vmatpush1.bf16.msra.mxu0 %v6076_v9  ;;  %2375 = vmatpush1.bf16.msra.mxu1 %v6079_v10  ;;  %v6151_v9 = vld [vmem:[%s8112_s3 + $0x3e8] ss:$144 sps:$4 sm:$0xff]   ;;  %v6156_v10 = vld [vmem:[%s8112_s3 + $0x504] ss:$144 sps:$4 sm:$0xff]  }
 0x1ff   :  { %2403 = vmatprep.subr.bf16.mxu0 %v6084_v11  ;;  %2446 = vmatprep.subr.bf16.mxu1 %v6087_v12  ;;  %v6159_v11 = vld [vmem:[%s8112_s3 + $0x50c] ss:$144 sps:$4 sm:$0xff]   ;;  %v6154_v12 = vld [vmem:[%s8112_s3 + $0x500] ss:$144 sps:$4 sm:$0xff]  }
 0x201   :  { %2350 = vmatmul.mubr.bf16.vlgmr.msra.gmra.mrb[24].mxu0 %v6554_v0  ;;  %2393 = vmatmul.mubr.bf16.vlgmr.msra.gmra.mrb[24].mxu1 %v6554_v0 }
 0x202   :  { %2404 = vmatpush1.bf16.msra.mxu0 %v6082_v13  ;;  %2447 = vmatpush1.bf16.msra.mxu1 %v6085_v14  ;;  %v6157_v13 = vld [vmem:[%s8112_s3 + $0x508] ss:$144 sps:$4 sm:$0xff]   ;;  %v6162_v14 = vld [vmem:[%s8112_s3 + $0x624] ss:$144 sps:$4 sm:$0xff]  }
 0x203   :  { %2405 = vmatprep.subr.bf16.mxu0 %v6090_v15  ;;  %2448 = vmatprep.subr.bf16.mxu1 %v6093_v16  ;;  %v6165_v15 = vld [vmem:[%s8112_s3 + $0x62c] ss:$144 sps:$4 sm:$0xff]   ;;  %v6160_v16 = vld [vmem:[%s8112_s3 + $0x620] ss:$144 sps:$4 sm:$0xff]  }
 0x204   :  { %2435 = vmatprep.mubr.bf16.mxu0 %v6374_v45  ;;  %2478 = vmatprep.mubr.bf16.mxu1 %v6374_v45 }
 0x206   :  { %2406 = vmatpush1.bf16.msra.mxu0 %v6088_v17  ;;  %2449 = vmatpush1.bf16.msra.mxu1 %v6091_v18  ;;  %v6163_v17 = vld [vmem:[%s8112_s3 + $0x628] ss:$144 sps:$4 sm:$0xff]   ;;  %v6168_v18 = vld [vmem:[%s8112_s3 + $0x744] ss:$144 sps:$4 sm:$0xff]  }
 0x207   :  { %2407 = vmatprep.subr.bf16.mxu0 %v6096_v19  ;;  %2450 = vmatprep.subr.bf16.mxu1 %v6099_v20  ;;  %v6171_v19 = vld [vmem:[%s8112_s3 + $0x74c] ss:$144 sps:$4 sm:$0xff]  }
 0x20a   :  { %2408 = vmatpush1.bf16.msra.mxu0 %v6094_v21  ;;  %2451 = vmatpush1.bf16.msra.mxu1 %v6097_v22 }
 0x20b   :  { %2409 = vmatprep.subr.bf16.mxu0 %v6102_v23  ;;  %2452 = vmatprep.subr.bf16.mxu1 %v6105_v24 }
 0x20e   :  { %2410 = vmatpush1.bf16.msra.mxu0 %v6100_v25  ;;  %2453 = vmatpush1.bf16.msra.mxu1 %v6103_v26  ;;  %v6166_v26 = vld [vmem:[%s8112_s3 + $0x740] ss:$144 sps:$4 sm:$0xff]  }
 0x20f   :  { %2411 = vmatprep.subr.bf16.mxu0 %v6108_v27  ;;  %2454 = vmatprep.subr.bf16.mxu1 %v6111_v28  ;;  %v6169_v27 = vld [vmem:[%s8112_s3 + $0x748] ss:$144 sps:$4 sm:$0xff]  }
 0x212   :  { %2412 = vmatpush1.bf16.msra.mxu0 %v6106_v29  ;;  %2455 = vmatpush1.bf16.msra.mxu1 %v6109_v30 }
 0x213   :  { %2413 = vmatprep.subr.bf16.mxu0 %v6114_v31  ;;  %2456 = vmatprep.subr.bf16.mxu1 %v6117_v32  ;;  %v6174_v32 = vld [vmem:[%s8112_s3 + $0x864] ss:$144 sps:$4 sm:$0xff]  }
 0x214   :  { %v7226_v37 = vpop.f32.mrb[0].mxu0  ;;  %v7228_v38 = vpop.f32.mrb[0].mxu1 }
 0x215   :  { %v7230_v39 = vpop.f32.mrb[1].mxu0  ;;  %v7232_v40 = vpop.f32.mrb[1].mxu1 }
 0x216   :  { %2414 = vmatpush1.bf16.msra.mxu0 %v6112_v33  ;;  %2457 = vmatpush1.bf16.msra.mxu1 %v6115_v34  ;;  %v7234_v41 = vpop.f32.mrb[2].mxu0  ;;  %v7236_v42 = vpop.f32.mrb[2].mxu1  ;;  %v6177_v33 = vld [vmem:[%s8112_s3 + $0x86c] ss:$144 sps:$4 sm:$0xff]  }
 0x217   :  { %v2575_v46 = vpack.c.bf16 %v7234_v41, %v7226_v37  ;;  %v2577_v47 = vpack.c.bf16 %v7236_v42, %v7228_v38  ;;  %v7248_v48 = vpop.f32.mrb[3].mxu0  ;;  %v7250_v49 = vpop.f32.mrb[3].mxu1  ;;  %2415 = vmatprep.subr.bf16.mxu0 %v6120_v35  ;;  %2458 = vmatprep.subr.bf16.mxu1 %v6123_v36  ;;  %v6172_v36 = vld [vmem:[%s8112_s3 + $0x860] ss:$144 sps:$4 sm:$0xff]  }
 0x218   :  { %v2576_v52 = vpack.c.bf16 %v7248_v48, %v7230_v39  ;;  %v2578_v53 = vpack.c.bf16 %v7250_v49, %v7232_v40 }
 0x21a   :  { %2416 = vmatpush1.bf16.msra.mxu0 %v6118_v43  ;;  %2459 = vmatpush1.bf16.msra.mxu1 %v6121_v44  ;;  %v6175_v43 = vld [vmem:[%s8112_s3 + $0x868] ss:$144 sps:$4 sm:$0xff]   ;;  %v6375_v44 = vmov 0.0  }
 0x21b   :  { %2417 = vmatprep.subr.bf16.mxu0 %v6126_v50  ;;  %2460 = vmatprep.subr.bf16.mxu1 %v6129_v51 }
 0x21e   :  { %2418 = vmatpush1.bf16.msra.mxu0 %v6124_v54  ;;  %2461 = vmatpush1.bf16.msra.mxu1 %v6127_v55 }
 0x21f   :  { %2489 = vmatprep.subr.bf16.mxu0 %v6132_v56  ;;  %2532 = vmatprep.subr.bf16.mxu1 %v6135_v57 }
 0x221   :  { %2436 = vmatmul.mubr.bf16.vlgmr.msra.gmra.mrb[28].mxu0 %v6554_v0  ;;  %2479 = vmatmul.mubr.bf16.vlgmr.msra.gmra.mrb[28].mxu1 %v6554_v0 }
 0x222   :  { %2490 = vmatpush1.bf16.msra.mxu0 %v6130_v58  ;;  %2533 = vmatpush1.bf16.msra.mxu1 %v6133_v59 }
 0x223   :  { %2491 = vmatprep.subr.bf16.mxu0 %v6138_v60  ;;  %2534 = vmatprep.subr.bf16.mxu1 %v6141_v61 }
 0x224   :  { %2521 = vmatprep.mubr.bf16.mxu0 %v6374_v45  ;;  %2564 = vmatprep.mubr.bf16.mxu1 %v6374_v45  ;;  %v6153_v45 = vld [vmem:[%s8112_s3 + $0x3ec] ss:$144 sps:$4 sm:$0xff]  }
 0x226   :  { %2492 = vmatpush1.bf16.msra.mxu0 %v6136_v62  ;;  %2535 = vmatpush1.bf16.msra.mxu1 %v6139_v63 }
 0x227   :  { %2493 = vmatprep.subr.bf16.mxu0 %v6144_v3  ;;  %2536 = vmatprep.subr.bf16.mxu1 %v6147_v4 }
 0x22a   :  { %2494 = vmatpush1.bf16.msra.mxu0 %v6142_v5  ;;  %2537 = vmatpush1.bf16.msra.mxu1 %v6145_v6 }
 0x22b   :  { %2495 = vmatprep.subr.bf16.mxu0 %v6150_v7  ;;  %2538 = vmatprep.subr.bf16.mxu1 %v6153_v45 }
 0x22e   :  { %2496 = vmatpush1.bf16.msra.mxu0 %v6148_v8  ;;  %2539 = vmatpush1.bf16.msra.mxu1 %v6151_v9 }
 0x22f   :  { %2497 = vmatprep.subr.bf16.mxu0 %v6156_v10  ;;  %2540 = vmatprep.subr.bf16.mxu1 %v6159_v11 }
 0x232   :  { %2498 = vmatpush1.bf16.msra.mxu0 %v6154_v12  ;;  %2541 = vmatpush1.bf16.msra.mxu1 %v6157_v13 }
 0x233   :  { %2499 = vmatprep.subr.bf16.mxu0 %v6162_v14  ;;  %2542 = vmatprep.subr.bf16.mxu1 %v6165_v15 }
 0x234   :  { %v7350_v20 = vpop.f32.mrb[4].mxu0  ;;  %v7352_v21 = vpop.f32.mrb[4].mxu1 }
 0x235   :  { %v7354_v22 = vpop.f32.mrb[5].mxu0  ;;  %v7356_v23 = vpop.f32.mrb[5].mxu1 }
 0x236   :  { %v7358_v24 = vpop.f32.mrb[6].mxu0  ;;  %v7360_v25 = vpop.f32.mrb[6].mxu1  ;;  %2500 = vmatpush1.bf16.msra.mxu0 %v6160_v16  ;;  %2543 = vmatpush1.bf16.msra.mxu1 %v6163_v17 }
 0x237   :  { %v2579_v28 = vpack.c.bf16 %v7358_v24, %v7350_v20  ;;  %v2581_v29 = vpack.c.bf16 %v7360_v25, %v7352_v21  ;;  %v7372_v30 = vpop.f32.mrb[7].mxu0  ;;  %v7374_v31 = vpop.f32.mrb[7].mxu1  ;;  %2501 = vmatprep.subr.bf16.mxu0 %v6168_v18  ;;  %2544 = vmatprep.subr.bf16.mxu1 %v6171_v19 }
 0x238   :  { %v2580_v34 = vpack.c.bf16 %v7372_v30, %v7354_v22  ;;  %v2582_v35 = vpack.c.bf16 %v7374_v31, %v7356_v23 }
 0x23a   :  { %2502 = vmatpush1.bf16.msra.mxu0 %v6166_v26  ;;  %2545 = vmatpush1.bf16.msra.mxu1 %v6169_v27 }
 0x23b   :  { %2503 = vmatprep.subr.bf16.mxu0 %v6174_v32  ;;  %2546 = vmatprep.subr.bf16.mxu1 %v6177_v33 }
 0x23e   :  { %2504 = vmatpush1.bf16.msra.mxu0 %v6172_v36  ;;  %2547 = vmatpush1.bf16.msra.mxu1 %v6175_v43 }
 0x23f   :  { %5599 = vmatprep.subr.bf16.mxu0 %v6375_v44  ;;  %5605 = vmatprep.subr.bf16.mxu1 %v6375_v44 }
 0x241   :  { %2522 = vmatmul.mubr.bf16.vlgmr.msra.gmra.mrb[32].mxu0 %v6554_v0  ;;  %2565 = vmatmul.mubr.bf16.vlgmr.msra.gmra.mrb[32].mxu1 %v6554_v0 }
 0x242   :  { %5601 = vmatprep.mubr.msk.bf16.mxu0 %vm6376_vm0, %v6375_v44  ;;  %5607 = vmatprep.mubr.msk.bf16.mxu1 %vm6376_vm0, %v6375_v44 }
 0x254   :  { %v7400_v50 = vpop.f32.mrb[8].mxu0  ;;  %v7402_v51 = vpop.f32.mrb[8].mxu1 }
 0x255   :  { %v7404_v54 = vpop.f32.mrb[9].mxu0  ;;  %v7406_v55 = vpop.f32.mrb[9].mxu1 }
 0x256   :  { %v7408_v56 = vpop.f32.mrb[10].mxu0  ;;  %v7410_v57 = vpop.f32.mrb[10].mxu1 }
 0x257   :  { %v2583_v0 = vpack.c.bf16 %v7408_v56, %v7400_v50  ;;  %v2585_v58 = vpack.c.bf16 %v7410_v57, %v7402_v51  ;;  %v7416_v59 = vpop.f32.mrb[11].mxu0  ;;  %v7418_v60 = vpop.f32.mrb[11].mxu1 }
 0x258   :  { %v2584_v61 = vpack.c.bf16 %v7416_v59, %v7404_v54  ;;  %v2586_v62 = vpack.c.bf16 %v7418_v60, %v7406_v55 }
 0x274   :  { %v2093_v63 = vpop.f32.mrb[12].mxu0  ;;  %v2136_v3 = vpop.f32.mrb[12].mxu1 }
 0x275   :  { %v2095_v4 = vpop.f32.mrb[13].mxu0  ;;  %v2138_v5 = vpop.f32.mrb[13].mxu1 }
 0x276   :  { %v2097_v6 = vpop.f32.mrb[14].mxu0  ;;  %v2140_v7 = vpop.f32.mrb[14].mxu1 }
 0x277   :  { %v2587_v45 = vpack.c.bf16 %v2097_v6, %v2093_v63  ;;  %v2589_v8 = vpack.c.bf16 %v2140_v7, %v2136_v3  ;;  %v2099_v9 = vpop.f32.mrb[15].mxu0  ;;  %v2142_v10 = vpop.f32.mrb[15].mxu1 }
 0x278   :  { %v2588_v11 = vpack.c.bf16 %v2099_v9, %v2095_v4  ;;  %v2590_v12 = vpack.c.bf16 %v2142_v10, %v2138_v5 }
 0x279   :  { %5600 = vmatpush3.bf16.xpose.msra.mxu0 %v2587_v45 }
 0x27a   :  { %5611 = vmatprep.subr.bf16.mxu0 %v6375_v44 }
 0x280   :  { %5602 = vmatmul.mubr.bf16.vlgmr.msra.gmra.mrb[36].mxu0 %v2575_v46 }
 0x281   :  { %5612 = vmatpush3.bf16.xpose.msra.mxu0 %v2588_v11  ;;  %5613 = vmatprep.mubr.msk.bf16.mxu0 %vm6376_vm0, %v6375_v44 }
 0x282   :  { %5623 = vmatprep.subr.bf16.mxu0 %v6375_v44 }
 0x288   :  { %5614 = vmatmul.mubr.bf16.vlgmr.msra.gmra.mrb[40].mxu0 %v2576_v52 }
 0x289   :  { %5624 = vmatpush3.bf16.xpose.msra.mxu0 %v2589_v8  ;;  %5625 = vmatprep.mubr.msk.bf16.mxu0 %vm6376_vm0, %v6375_v44 }
 0x28a   :  { %5635 = vmatprep.subr.bf16.mxu0 %v6375_v44 }
 0x290   :  { %5626 = vmatmul.mubr.bf16.vlgmr.msra.gmra.mrb[44].mxu0 %v2577_v47 }
 0x291   :  { %5636 = vmatpush3.bf16.xpose.msra.mxu0 %v2590_v12  ;;  %5637 = vmatprep.mubr.msk.bf16.mxu0 %vm6376_vm0, %v6375_v44 }
 0x292   :  { %5647 = vmatprep.subr.bf16.mxu0 %v6375_v44 }
 0x294   :  { %v2179_v37 = vpop.f32.mrb[16].mxu0  ;;  %v2222_v41 = vpop.f32.mrb[16].mxu1 }
 0x295   :  { %v2181_v39 = vpop.f32.mrb[17].mxu0  ;;  %v2224_v46 = vpop.f32.mrb[17].mxu1 }
 0x296   :  { %v2183_v48 = vpop.f32.mrb[18].mxu0  ;;  %v2226_v52 = vpop.f32.mrb[18].mxu1 }
 0x297   :  { %v2591_v13 = vpack.c.bf16 %v2183_v48, %v2179_v37  ;;  %v2593_v14 = vpack.c.bf16 %v2226_v52, %v2222_v41  ;;  %v2185_v15 = vpop.f32.mrb[19].mxu0  ;;  %v2228_v16 = vpop.f32.mrb[19].mxu1  ;;  %v7563_v37 = vld [vmem:[%s8115_s6] sm:$0xff]  ;;  %v7568_v48 = vld [vmem:[%s8115_s6 + $0x8] sm:$0xff] }
 0x298   :  { %v2592_v17 = vpack.c.bf16 %v2185_v15, %v2181_v39  ;;  %v2594_v18 = vpack.c.bf16 %v2228_v16, %v2224_v46  ;;  %5638 = vmatmul.mubr.bf16.vlgmr.msra.gmra.mrb[48].mxu0 %v2578_v53 }
 0x299   :  { %5648 = vmatpush3.bf16.xpose.msra.mxu0 %v2591_v13  ;;  %5649 = vmatprep.mubr.msk.bf16.mxu0 %vm6376_vm0, %v6375_v44 }
 0x29a   :  { %5659 = vmatprep.subr.bf16.mxu0 %v6375_v44 }
 0x2a0   :  { %5650 = vmatmul.mubr.bf16.vlgmr.msra.gmra.mrb[52].mxu0 %v2579_v28 }
 0x2a1   :  { %5660 = vmatpush3.bf16.xpose.msra.mxu0 %v2592_v17  ;;  %5661 = vmatprep.mubr.msk.bf16.mxu0 %vm6376_vm0, %v6375_v44 }
 0x2a2   :  { %5671 = vmatprep.subr.bf16.mxu0 %v6375_v44 }
 0x2a8   :  { %5662 = vmatmul.mubr.bf16.vlgmr.msra.gmra.mrb[56].mxu0 %v2580_v34 }
 0x2a9   :  { %5672 = vmatpush3.bf16.xpose.msra.mxu0 %v2593_v14  ;;  %5673 = vmatprep.mubr.msk.bf16.mxu0 %vm6376_vm0, %v6375_v44 }
 0x2aa   :  { %5683 = vmatprep.subr.bf16.mxu0 %v6375_v44 }
 0x2b0   :  { %5674 = vmatmul.mubr.bf16.vlgmr.msra.gmra.mrb[60].mxu0 %v2581_v29 }
 0x2b1   :  { %5684 = vmatpush3.bf16.xpose.msra.mxu0 %v2594_v18  ;;  %5685 = vmatprep.mubr.msk.bf16.mxu0 %vm6376_vm0, %v6375_v44 }
 0x2b2   :  { %5695 = vmatprep.subr.bf16.mxu0 %v6375_v44 }
 0x2b4   :  { %v2265_v38 = vpop.f32.mrb[20].mxu0  ;;  %v2308_v40 = vpop.f32.mrb[20].mxu1 }
 0x2b5   :  { %v2267_v42 = vpop.f32.mrb[21].mxu0  ;;  %v2310_v47 = vpop.f32.mrb[21].mxu1 }
 0x2b6   :  { %v2269_v49 = vpop.f32.mrb[22].mxu0  ;;  %v2312_v53 = vpop.f32.mrb[22].mxu1 }
 0x2b7   :  { %v2595_v19 = vpack.c.bf16 %v2269_v49, %v2265_v38  ;;  %v2597_v20 = vpack.c.bf16 %v2312_v53, %v2308_v40  ;;  %v2271_v22 = vpop.f32.mrb[23].mxu0  ;;  %v2314_v24 = vpop.f32.mrb[23].mxu1 }
 0x2b8   :  { %v2596_v26 = vpack.c.bf16 %v2271_v22, %v2267_v42  ;;  %v2598_v27 = vpack.c.bf16 %v2314_v24, %v2310_v47  ;;  %5686 = vmatmul.mubr.bf16.vlgmr.msra.gmra.mrb[64].mxu0 %v2582_v35 }
 0x2b9   :  { %5696 = vmatpush3.bf16.xpose.msra.mxu0 %v2595_v19  ;;  %5697 = vmatprep.mubr.msk.bf16.mxu0 %vm6376_vm0, %v6375_v44 }
 0x2ba   :  { %5707 = vmatprep.subr.bf16.mxu0 %v6375_v44 }
 0x2c0   :  { %5698 = vmatmul.mubr.bf16.vlgmr.msra.gmra.mrb[68].mxu0 %v2583_v0 }
 0x2c1   :  { %5708 = vmatpush3.bf16.xpose.msra.mxu0 %v2596_v26  ;;  %5709 = vmatprep.mubr.msk.bf16.mxu0 %vm6376_vm0, %v6375_v44 }
 0x2c2   :  { %5719 = vmatprep.subr.bf16.mxu0 %v6375_v44 }
 0x2c8   :  { %5710 = vmatmul.mubr.bf16.vlgmr.msra.gmra.mrb[72].mxu0 %v2584_v61 }
 0x2c9   :  { %5720 = vmatpush3.bf16.xpose.msra.mxu0 %v2597_v20  ;;  %5721 = vmatprep.mubr.msk.bf16.mxu0 %vm6376_vm0, %v6375_v44 }
 0x2ca   :  { %5731 = vmatprep.subr.bf16.mxu0 %v6375_v44 }
 0x2d0   :  { %5722 = vmatmul.mubr.bf16.vlgmr.msra.gmra.mrb[76].mxu0 %v2585_v58 }
 0x2d1   :  { %5732 = vmatpush3.bf16.xpose.msra.mxu0 %v2598_v27  ;;  %5733 = vmatprep.mubr.msk.bf16.mxu0 %vm6376_vm0, %v6375_v44 }
 0x2d4   :  { %v2351_v21 = vpop.f32.mrb[24].mxu0  ;;  %v7490_v23 = vpop.f32.mrb[24].mxu1 }
 0x2d5   :  { %v7492_v25 = vpop.f32.mrb[25].mxu0  ;;  %v7494_v28 = vpop.f32.mrb[25].mxu1 }
 0x2d6   :  { %v2355_v29 = vpop.f32.mrb[26].mxu0  ;;  %v7496_v30 = vpop.f32.mrb[26].mxu1 }
 0x2d7   :  { %v2599_v31 = vpack.c.bf16 %v2355_v29, %v2351_v21  ;;  %v7500_v33 = vpop.f32.mrb[27].mxu0  ;;  %v7502_v34 = vpop.f32.mrb[27].mxu1 }
 0x2d8   :  { %v2600_v35 = vpack.c.bf16 %v7500_v33, %v7492_v25  ;;  %5734 = vmatmul.mubr.bf16.vlgmr.msra.gmra.mrb[80].mxu0 %v2586_v62 }
 0x2d9   :  { %5606 = vmatpush3.bf16.msra.mxu1 %v2599_v31 }
 0x2da   :  { %5617 = vmatprep.subr.bf16.mxu1 %v6375_v44 }
 0x2f4   :  { %v7512_v43 = vpop.f32.mrb[28].mxu0  ;;  %v7514_v50 = vpop.f32.mrb[28].mxu1 }
 0x2f5   :  { %v7516_v51 = vpop.f32.mrb[29].mxu0  ;;  %v7518_v54 = vpop.f32.mrb[29].mxu1 }
 0x2f6   :  { %v7520_v56 = vpop.f32.mrb[30].mxu0  ;;  %v7522_v57 = vpop.f32.mrb[30].mxu1 }
 0x2f7   :  { %v7528_v58 = vpop.f32.mrb[31].mxu0  ;;  %v7530_v59 = vpop.f32.mrb[31].mxu1 }
 0x314   :  { %v7536_v62 = vpop.f32.mrb[32].mxu0  ;;  %v7538_v63 = vpop.f32.mrb[32].mxu1 }
 0x315   :  { %v7540_v3 = vpop.f32.mrb[33].mxu0  ;;  %v7542_v4 = vpop.f32.mrb[33].mxu1 }
 0x316   :  { %v7544_v5 = vpop.f32.mrb[34].mxu0  ;;  %v7546_v6 = vpop.f32.mrb[34].mxu1 }
 0x317   :  { %v7552_v8 = vpop.f32.mrb[35].mxu0  ;;  %v7554_v9 = vpop.f32.mrb[35].mxu1 }
 0x353   :  { %v2647_v12 = vpop.f32.mrb[36].mxu0 }
 0x354   :  { %v2654_v41 = vmul.f32 0.125, %v2647_v12  ;;  %v5603_v39 = vpop.f32.mrb[37].mxu0 }
 0x355   :  { %v2650_v46 = vpop.f32.mrb[38].mxu0 }
 0x356   :  { %v2655_v52 = vmul.f32 0.125, %v2650_v46  ;;  %v5604_v13 = vpop.f32.mrb[39].mxu0  ;;  %v7571_v14 = vadd.f32 %v2654_v41, %v7563_v37 }
 0x358   :  { %v2659_v15 = vsel %vm2658_vm1, %v7571_v14, -inf  ;;  %v7576_v16 = vadd.f32 %v2655_v52, %v7568_v48 }
 0x359   :  { %2660 = vmax.xlane.f32.xlu0 %v2659_v15 }
 0x35a   :  { %v2662_v17 = vsel %vm2658_vm1, %v7576_v16, -inf }
 0x35b   :  { %2663 = vmax.xlane.f32.xlu1 %v2662_v17  ;;  %v2760_v18 = vpop.f32.mrb[40].mxu0 }
 0x35c   :  { %v2767_v38 = vmul.f32 0.125, %v2760_v18  ;;  %v5615_v40 = vpop.f32.mrb[41].mxu0 }
 0x35d   :  { %v2763_v42 = vpop.f32.mrb[42].mxu0 }
 0x35e   :  { %v2768_v47 = vmul.f32 0.125, %v2763_v42  ;;  %v5616_v49 = vpop.f32.mrb[43].mxu0  ;;  %v7581_v53 = vadd.f32 %v2767_v38, %v7563_v37 }
 0x360   :  { %v2771_v19 = vsel %vm2658_vm1, %v7581_v53, -inf  ;;  %v7586_v20 = vadd.f32 %v2768_v47, %v7568_v48 }
 0x361   :  { %2772 = vmax.xlane.f32.xlu0 %v2771_v19 }
 0x362   :  { %v2774_v22 = vsel %vm2658_vm1, %v7586_v20, -inf }
 0x363   :  { %2775 = vmax.xlane.f32.xlu1 %v2774_v22  ;;  %v2872_v24 = vpop.f32.mrb[44].mxu0 }
 0x364   :  { %v2879_v26 = vmul.f32 0.125, %v2872_v24  ;;  %v5627_v27 = vpop.f32.mrb[45].mxu0 }
 0x365   :  { %v2875_v21 = vpop.f32.mrb[46].mxu0 }
 0x366   :  { %v2880_v29 = vmul.f32 0.125, %v2875_v21  ;;  %v5628_v31 = vpop.f32.mrb[47].mxu0  ;;  %v7591_v12 = vadd.f32 %v2879_v26, %v7563_v37 }
 0x368   :  { %v2883_v41 = vsel %vm2658_vm1, %v7591_v12, -inf  ;;  %v7596_v39 = vadd.f32 %v2880_v29, %v7568_v48 }
 0x369   :  { %2884 = vmax.xlane.f32.xlu0 %v2883_v41 }
 0x36a   :  { %v2886_v46 = vsel %vm2658_vm1, %v7596_v39, -inf }
 0x36b   :  { %2887 = vmax.xlane.f32.xlu1 %v2886_v46  ;;  %v2984_v52 = vpop.f32.mrb[48].mxu0 }
 0x36c   :  { %v2991_v13 = vmul.f32 0.125, %v2984_v52  ;;  %v5639_v15 = vpop.f32.mrb[49].mxu0 }
 0x36d   :  { %v2987_v17 = vpop.f32.mrb[50].mxu0 }
 0x36e   :  { %v2992_v18 = vmul.f32 0.125, %v2987_v17  ;;  %v5640_v38 = vpop.f32.mrb[51].mxu0  ;;  %v7601_v40 = vadd.f32 %v2991_v13, %v7563_v37 }
 0x370   :  { %v2995_v42 = vsel %vm2658_vm1, %v7601_v40, -inf  ;;  %v7606_v47 = vadd.f32 %v2992_v18, %v7568_v48 }
 0x371   :  { %2996 = vmax.xlane.f32.xlu0 %v2995_v42 }
 0x372   :  { %v2998_v49 = vsel %vm2658_vm1, %v7606_v47, -inf }
 0x373   :  { %2999 = vmax.xlane.f32.xlu1 %v2998_v49  ;;  %v3096_v19 = vpop.f32.mrb[52].mxu0 }
 0x374   :  { %v3103_v22 = vmul.f32 0.125, %v3096_v19  ;;  %v5651_v24 = vpop.f32.mrb[53].mxu0 }
 0x375   :  { %v3099_v26 = vpop.f32.mrb[54].mxu0 }
 0x376   :  { %v3104_v27 = vmul.f32 0.125, %v3099_v26  ;;  %v5652_v21 = vpop.f32.mrb[55].mxu0  ;;  %v7611_v29 = vadd.f32 %v3103_v22, %v7563_v37 }
 0x378   :  { %v3107_v31 = vsel %vm2658_vm1, %v7611_v29, -inf  ;;  %v7616_v41 = vadd.f32 %v3104_v27, %v7568_v48 }
 0x379   :  { %3108 = vmax.xlane.f32.xlu0 %v3107_v31 }
 0x37a   :  { %v3110_v46 = vsel %vm2658_vm1, %v7616_v41, -inf }
 0x37b   :  { %3111 = vmax.xlane.f32.xlu1 %v3110_v46  ;;  %v3208_v52 = vpop.f32.mrb[56].mxu0 }
 0x37c   :  { %v3215_v13 = vmul.f32 0.125, %v3208_v52  ;;  %v5663_v15 = vpop.f32.mrb[57].mxu0 }
 0x37d   :  { %v3211_v17 = vpop.f32.mrb[58].mxu0 }
 0x37e   :  { %v3216_v18 = vmul.f32 0.125, %v3211_v17  ;;  %v5664_v38 = vpop.f32.mrb[59].mxu0  ;;  %v7621_v42 = vadd.f32 %v3215_v13, %v7563_v37 }
 0x380   :  { %v3219_v49 = vsel %vm2658_vm1, %v7621_v42, -inf  ;;  %v7626_v19 = vadd.f32 %v3216_v18, %v7568_v48 }
 0x381   :  { %3220 = vmax.xlane.f32.xlu0 %v3219_v49 }
 0x382   :  { %v3222_v22 = vsel %vm2658_vm1, %v7626_v19, -inf }
 0x383   :  { %3223 = vmax.xlane.f32.xlu1 %v3222_v22  ;;  %v3320_v24 = vpop.f32.mrb[60].mxu0 }
 0x384   :  { %v3327_v26 = vmul.f32 0.125, %v3320_v24  ;;  %v5675_v27 = vpop.f32.mrb[61].mxu0 }
 0x385   :  { %v3323_v21 = vpop.f32.mrb[62].mxu0 }
 0x386   :  { %v3328_v31 = vmul.f32 0.125, %v3323_v21  ;;  %v5676_v46 = vpop.f32.mrb[63].mxu0  ;;  %v7631_v52 = vadd.f32 %v3327_v26, %v7563_v37 }
 0x388   :  { %v3331_v13 = vsel %vm2658_vm1, %v7631_v52, -inf  ;;  %v7636_v15 = vadd.f32 %v3328_v31, %v7568_v48 }
 0x389   :  { %3332 = vmax.xlane.f32.xlu0 %v3331_v13 }
 0x38a   :  { %v3334_v17 = vsel %vm2658_vm1, %v7636_v15, -inf }
 0x38b   :  { %3335 = vmax.xlane.f32.xlu1 %v3334_v17  ;;  %v3432_v18 = vpop.f32.mrb[64].mxu0 }
 0x38c   :  { %v3439_v38 = vmul.f32 0.125, %v3432_v18  ;;  %v5687_v49 = vpop.f32.mrb[65].mxu0 }
 0x38d   :  { %v3435_v22 = vpop.f32.mrb[66].mxu0 }
 0x38e   :  { %v3440_v24 = vmul.f32 0.125, %v3435_v22  ;;  %v5688_v27 = vpop.f32.mrb[67].mxu0  ;;  %v7641_v26 = vadd.f32 %v3439_v38, %v7563_v37 }
 0x390   :  { %v3443_v21 = vsel %vm2658_vm1, %v7641_v26, -inf  ;;  %v7646_v31 = vadd.f32 %v3440_v24, %v7568_v48 }
 0x391   :  { %3444 = vmax.xlane.f32.xlu0 %v3443_v21 }
 0x392   :  { %v3446_v46 = vsel %vm2658_vm1, %v7646_v31, -inf }
 0x393   :  { %3447 = vmax.xlane.f32.xlu1 %v3446_v46  ;;  %v3544_v13 = vpop.f32.mrb[68].mxu0 }
 0x394   :  { %v3551_v17 = vmul.f32 0.125, %v3544_v13  ;;  %v5699_v18 = vpop.f32.mrb[69].mxu0 }
 0x395   :  { %v3547_v49 = vpop.f32.mrb[70].mxu0 }
 0x396   :  { %v3552_v22 = vmul.f32 0.125, %v3547_v49  ;;  %v5700_v27 = vpop.f32.mrb[71].mxu0  ;;  %v7651_v38 = vadd.f32 %v3551_v17, %v7563_v37 }
 0x398   :  { %v3555_v11 = vsel %vm2658_vm1, %v7651_v38, -inf  ;;  %v7656_v24 = vadd.f32 %v3552_v22, %v7568_v48 }
 0x399   :  { %3556 = vmax.xlane.f32.xlu0 %v3555_v11 }
 0x39a   :  { %v3558_v21 = vsel %vm2658_vm1, %v7656_v24, -inf }
 0x39b   :  { %3559 = vmax.xlane.f32.xlu1 %v3558_v21  ;;  %v3656_v46 = vpop.f32.mrb[72].mxu0 }
 0x39c   :  { %v3663_v13 = vmul.f32 0.125, %v3656_v46  ;;  %v5711_v18 = vpop.f32.mrb[73].mxu0 }
 0x39d   :  { %v3659_v45 = vpop.f32.mrb[74].mxu0 }
 0x39e   :  { %v3664_v49 = vmul.f32 0.125, %v3659_v45  ;;  %v5712_v27 = vpop.f32.mrb[75].mxu0  ;;  %v7661_v17 = vadd.f32 %v3663_v13, %v7563_v37 }
 0x3a0   :  { %v3667_v10 = vsel %vm2658_vm1, %v7661_v17, -inf  ;;  %v7666_v22 = vadd.f32 %v3664_v49, %v7568_v48 }
 0x3a1   :  { %3668 = vmax.xlane.f32.xlu0 %v3667_v10 }
 0x3a2   :  { %v3670_v11 = vsel %vm2658_vm1, %v7666_v22, -inf }
 0x3a3   :  { %3671 = vmax.xlane.f32.xlu1 %v3670_v11  ;;  %v3768_v21 = vpop.f32.mrb[76].mxu0 }
 0x3a4   :  { %v3775_v46 = vmul.f32 0.125, %v3768_v21  ;;  %v5723_v18 = vpop.f32.mrb[77].mxu0 }
 0x3a5   :  { %v3771_v7 = vpop.f32.mrb[78].mxu0 }
 0x3a6   :  { %v3776_v45 = vmul.f32 0.125, %v3771_v7  ;;  %v5724_v27 = vpop.f32.mrb[79].mxu0  ;;  %v7671_v13 = vadd.f32 %v3775_v46, %v7563_v37 }
 0x3a8   :  { %v3779_v61 = vsel %vm2658_vm1, %v7671_v13, -inf  ;;  %v7676_v49 = vadd.f32 %v3776_v45, %v7568_v48 }
 0x3a9   :  { %3780 = vmax.xlane.f32.xlu0 %v3779_v61 }
 0x3aa   :  { %v3782_v10 = vsel %vm2658_vm1, %v7676_v49, -inf }
 0x3ab   :  { %3783 = vmax.xlane.f32.xlu1 %v3782_v10  ;;  %v3880_v11 = vpop.f32.mrb[80].mxu0 }
 0x3ac   :  { %v3887_v21 = vmul.f32 0.125, %v3880_v11  ;;  %v5735_v18 = vpop.f32.mrb[81].mxu0 }
 0x3ad   :  { %v3883_v55 = vpop.f32.mrb[82].mxu0 }
 0x3ae   :  { %v3888_v7 = vmul.f32 0.125, %v3883_v55  ;;  %v5736_v27 = vpop.f32.mrb[83].mxu0  ;;  %v7681_v46 = vadd.f32 %v3887_v21, %v7563_v37 }
 0x3b0   :  { %v3891_v60 = vsel %vm2658_vm1, %v7681_v46, -inf  ;;  %v7686_v45 = vadd.f32 %v3888_v7, %v7568_v48 }
 0x3b1   :  { %3892 = vmax.xlane.f32.xlu0 %v3891_v60 }
 0x3b2   :  { %v3894_v61 = vsel %vm2658_vm1, %v7686_v45, -inf }
 0x3b3   :  { %3895 = vmax.xlane.f32.xlu1 %v3894_v61 }
 0x3e6   :  { %v2661_v10 = vpop.xlane.xlu0 %2660 }
 0x3e7   :  { %v2665_v11 = vsub.f32 %v7571_v14, %v2661_v10 }
 0x3e8   :  { %v2664_v18 = vpop.xlane.xlu1 %2663 }
 0x3e9   :  { %v2667_v55 = vmul.f32 1.442695, %v2665_v11  ;;  %v2666_v27 = vsub.f32 %v7576_v16, %v2664_v18 }
 0x3eb   :  { %6278 = vpow2.f32 %v2667_v55  ;;  %v2669_v37 = vmul.f32 1.442695, %v2666_v27 }
 0x3ed   :  { %6280 = vpow2.f32 %v2669_v37 }
 0x3ee   :  { %v2773_v21 = vpop.xlane.xlu0 %2772 }
 0x3ef   :  { %v2777_v0 = vsub.f32 %v7581_v53, %v2773_v21 }
 0x3f0   :  { %v2776_v48 = vpop.xlane.xlu1 %2775 }
 0x3f1   :  { %v2779_v7 = vmul.f32 1.442695, %v2777_v0  ;;  %v2778_v60 = vsub.f32 %v7586_v20, %v2776_v48 }
 0x3f3   :  { %6282 = vpow2.f32 %v2779_v7  ;;  %v2781_v36 = vmul.f32 1.442695, %v2778_v60  ;;  %v8119_v7 = vpack.c.bf16 %v7496_v30, %v7490_v23  ;;  %v8120_v30 = vpack.c.bf16 %v7502_v34, %v7494_v28 }
 0x3f5   :  { %v6279_v61 = vpop.eup %6278  ;;  %6284 = vpow2.f32 %v2781_v36 }
 0x3f6   :  { %v2885_v32 = vpop.xlane.xlu0 %2884  ;;  %v2671_v14 = vsel %vm2658_vm1, %v6279_v61, 0.0 }
 0x3f7   :  { %v6281_v10 = vpop.eup %6280  ;;  %v2889_v16 = vsub.f32 %v7591_v12, %v2885_v32  ;;  %2672 = vadd.xlane.f32.xlu0 %v2671_v14 }
 0x3f8   :  { %v2888_v11 = vpop.xlane.xlu1 %2887  ;;  %v2674_v18 = vsel %vm2658_vm1, %v6281_v10, 0.0  ;;  %v2677_v55 = vpack.c.bf16 %v6281_v10, %v6279_v61 }
 0x3f9   :  { %v2891_v53 = vmul.f32 1.442695, %v2889_v16  ;;  %v2890_v0 = vsub.f32 %v7596_v39, %v2888_v11  ;;  %2675 = vadd.xlane.f32.xlu1 %v2674_v18 }
 0x3fa   :  { %5608 = vmatmul.mubr.msk.bf16.vlgmr.msra.gmra.mrb[36].mxu1 %vm2658_vm1, %v2677_v55 }
 0x3fb   :  { %v2893_v20 = vmul.f32 1.442695, %v2890_v0  ;;  %5618 = vmatpush3.bf16.msra.mxu1 %v2600_v35  ;;  %5619 = vmatprep.mubr.msk.bf16.mxu1 %vm6376_vm0, %v6375_v44  ;;  %6286 = vpow2.f32 %v2891_v53 }
 0x3fc   :  { %5629 = vmatprep.subr.bf16.mxu1 %v6375_v44 }
 0x3fd   :  { %v6283_v32 = vpop.eup %6282  ;;  %6288 = vpow2.f32 %v2893_v20 }
 0x3fe   :  { %v2997_v36 = vpop.xlane.xlu0 %2996  ;;  %v2783_v12 = vsel %vm2658_vm1, %v6283_v32, 0.0 }
 0x3ff   :  { %v6285_v39 = vpop.eup %6284  ;;  %v3001_v27 = vsub.f32 %v7601_v40, %v2997_v36  ;;  %2784 = vadd.xlane.f32.xlu0 %v2783_v12 }
 0x400   :  { %v3000_v37 = vpop.xlane.xlu1 %2999  ;;  %v2786_v21 = vsel %vm2658_vm1, %v6285_v39, 0.0  ;;  %v2789_v25 = vpack.c.bf16 %v6285_v39, %v6283_v32  ;;  %v8121_v39 = vpack.c.bf16 %v7520_v56, %v7512_v43 }
 0x401   :  { %v3003_v33 = vmul.f32 1.442695, %v3001_v27  ;;  %v3002_v35 = vsub.f32 %v7606_v47, %v3000_v37  ;;  %2787 = vadd.xlane.f32.xlu1 %v2786_v21 }
 0x402   :  { %5620 = vmatmul.mubr.msk.bf16.vlgmr.msra.gmra.mrb[40].mxu1 %vm2658_vm1, %v2789_v25 }
 0x403   :  { %6290 = vpow2.f32 %v3003_v33  ;;  %v3005_v48 = vmul.f32 1.442695, %v3002_v35  ;;  %5630 = vmatpush3.bf16.msra.mxu1 %v8119_v7  ;;  %5631 = vmatprep.mubr.msk.bf16.mxu1 %vm6376_vm0, %v6375_v44 }
 0x404   :  { %5641 = vmatprep.subr.bf16.mxu1 %v6375_v44 }
 0x405   :  { %6292 = vpow2.f32 %v3005_v48  ;;  %v6287_v40 = vpop.eup %6286 }
 0x406   :  { %v3109_v60 = vpop.xlane.xlu0 %3108  ;;  %v2895_v36 = vsel %vm2658_vm1, %v6287_v40, 0.0 }
 0x407   :  { %v6289_v61 = vpop.eup %6288  ;;  %v3113_v47 = vsub.f32 %v7611_v29, %v3109_v60 }
 0x408   :  { %v3112_v14 = vpop.xlane.xlu1 %3111  ;;  %v2901_v10 = vpack.c.bf16 %v6289_v61, %v6287_v40  ;;  %v8122_v40 = vpack.c.bf16 %v7528_v58, %v7516_v51 }
 0x409   :  { %v3115_v16 = vmul.f32 1.442695, %v3113_v47  ;;  %v3114_v11 = vsub.f32 %v7616_v41, %v3112_v14 }
 0x40a   :  { %5632 = vmatmul.mubr.msk.bf16.vlgmr.msra.gmra.mrb[44].mxu1 %vm2658_vm1, %v2901_v10 }
 0x40b   :  { %6294 = vpow2.f32 %v3115_v16  ;;  %v3117_v23 = vmul.f32 1.442695, %v3114_v11  ;;  %5642 = vmatpush3.bf16.msra.mxu1 %v8120_v30  ;;  %5643 = vmatprep.mubr.msk.bf16.mxu1 %vm6376_vm0, %v6375_v44 }
 0x40c   :  { %5653 = vmatprep.subr.bf16.mxu1 %v6375_v44 }
 0x40d   :  { %v6291_v18 = vpop.eup %6290  ;;  %6296 = vpow2.f32 %v3117_v23  ;;  %v8123_v23 = vpack.c.bf16 %v7522_v57, %v7514_v50  ;;  %v8124_v57 = vpack.c.bf16 %v7530_v59, %v7518_v54 }
 0x40e   :  { %v3221_v29 = vpop.xlane.xlu0 %3220  ;;  %v3007_v55 = vsel %vm2658_vm1, %v6291_v18, 0.0 }
 0x40f   :  { %v6293_v53 = vpop.eup %6292  ;;  %v3225_v41 = vsub.f32 %v7621_v42, %v3221_v29  ;;  %3008 = vadd.xlane.f32.xlu0 %v3007_v55  ;;  %v2898_v42 = vsel %vm2658_vm1, %v6289_v61, 0.0 }
 0x410   :  { %v3224_v0 = vpop.xlane.xlu1 %3223  ;;  %v3010_v20 = vsel %vm2658_vm1, %v6293_v53, 0.0  ;;  %v3013_v32 = vpack.c.bf16 %v6293_v53, %v6291_v18 }
 0x411   :  { %v3227_v28 = vmul.f32 1.442695, %v3225_v41  ;;  %v3226_v34 = vsub.f32 %v7626_v19, %v3224_v0  ;;  %3011 = vadd.xlane.f32.xlu1 %v3010_v20 }
 0x412   :  { %5644 = vmatmul.mubr.msk.bf16.vlgmr.msra.gmra.mrb[48].mxu1 %vm2658_vm1, %v3013_v32 }
 0x413   :  { %6298 = vpow2.f32 %v3227_v28  ;;  %v3229_v12 = vmul.f32 1.442695, %v3226_v34  ;;  %5654 = vmatpush3.bf16.msra.mxu1 %v8121_v39  ;;  %2896 = vadd.xlane.f32.xlu0 %v2895_v36 }
 0x414   :  { %5655 = vmatprep.mubr.msk.bf16.mxu1 %vm6376_vm0, %v6375_v44  ;;  %5665 = vmatprep.subr.bf16.mxu1 %v6375_v44 }
 0x415   :  { %v6295_v19 = vpop.eup %6294  ;;  %6300 = vpow2.f32 %v3229_v12  ;;  %2899 = vadd.xlane.f32.xlu1 %v2898_v42  ;;  %v8125_v42 = vpack.c.bf16 %v7544_v5, %v7536_v62 }
 0x416   :  { %v3333_v27 = vpop.xlane.xlu0 %3332  ;;  %v3119_v37 = vsel %vm2658_vm1, %v6295_v19, 0.0 }
 0x417   :  { %v6297_v21 = vpop.eup %6296  ;;  %v3337_v25 = vsub.f32 %v7631_v52, %v3333_v27  ;;  %3120 = vadd.xlane.f32.xlu0 %v3119_v37 }
 0x418   :  { %v3336_v43 = vpop.xlane.xlu1 %3335  ;;  %v3122_v56 = vsel %vm2658_vm1, %v6297_v21, 0.0  ;;  %v3125_v33 = vpack.c.bf16 %v6297_v21, %v6295_v19 }
 0x419   :  { %v3339_v35 = vmul.f32 1.442695, %v3337_v25  ;;  %v3338_v48 = vsub.f32 %v7636_v15, %v3336_v43  ;;  %3123 = vadd.xlane.f32.xlu1 %v3122_v56 }
 0x41a   :  { %5656 = vmatmul.mubr.msk.bf16.vlgmr.msra.gmra.mrb[52].mxu1 %vm2658_vm1, %v3125_v33 }
 0x41b   :  { %v3341_v7 = vmul.f32 1.442695, %v3338_v48  ;;  %5666 = vmatpush3.bf16.msra.mxu1 %v8122_v40  ;;  %5667 = vmatprep.mubr.msk.bf16.mxu1 %vm6376_vm0, %v6375_v44  ;;  %6302 = vpow2.f32 %v3339_v35  ;;  %v8126_v35 = vpack.c.bf16 %v7552_v8, %v7540_v3 }
 0x41c   :  { %5677 = vmatprep.subr.bf16.mxu1 %v6375_v44 }
 0x41d   :  { %v6299_v52 = vpop.eup %6298  ;;  %6304 = vpow2.f32 %v3341_v7 }
 0x41e   :  { %v3445_v60 = vpop.xlane.xlu0 %3444  ;;  %v3231_v61 = vsel %vm2658_vm1, %v6299_v52, 0.0 }
 0x41f   :  { %v6301_v15 = vpop.eup %6300  ;;  %v3449_v47 = vsub.f32 %v7641_v26, %v3445_v60  ;;  %3232 = vadd.xlane.f32.xlu0 %v3231_v61 }
 0x420   :  { %v3448_v14 = vpop.xlane.xlu1 %3447  ;;  %v3234_v10 = vsel %vm2658_vm1, %v6301_v15, 0.0  ;;  %v3237_v51 = vpack.c.bf16 %v6301_v15, %v6299_v52  ;;  %v6180_v15 = vld [vmem:[%s8116_s4 + $0x48] sm:$0xff]  }
 0x421   :  { %v3451_v58 = vmul.f32 1.442695, %v3449_v47  ;;  %v3450_v16 = vsub.f32 %v7646_v31, %v3448_v14  ;;  %3235 = vadd.xlane.f32.xlu1 %v3234_v10  ;;  %v6181_v10 = vld [vmem:[%s8116_s4 + $0x8] sm:$0xff]  }
 0x422   :  { %5668 = vmatmul.mubr.msk.bf16.vlgmr.msra.gmra.mrb[56].mxu1 %vm2658_vm1, %v3237_v51  ;;  %v8127_v51 = vpack.c.bf16 %v7546_v6, %v7538_v63  ;;  %v6184_v63 = vld [vmem:[%s8116_s4 + $0x58] sm:$0xff]  }
 0x423   :  { %6306 = vpow2.f32 %v3451_v58  ;;  %v3453_v11 = vmul.f32 1.442695, %v3450_v16  ;;  %5678 = vmatpush3.bf16.msra.mxu1 %v8123_v23  ;;  %5679 = vmatprep.mubr.msk.bf16.mxu1 %vm6376_vm0, %v6375_v44  ;;  %v6183_v58 = vld [vmem:[%s8116_s4 + $0x10] sm:$0xff]   ;;  %v6185_v23 = vld [vmem:[%s8116_s4 + $0x18] sm:$0xff]  }
 0x424   :  { %5689 = vmatprep.subr.bf16.mxu1 %v6375_v44 }
 0x425   :  { %6308 = vpow2.f32 %v3453_v11  ;;  %v6303_v26 = vpop.eup %6302 }
 0x426   :  { %v3557_v30 = vpop.xlane.xlu0 %3556  ;;  %v3343_v12 = vsel %vm2658_vm1, %v6303_v26, 0.0 }
 0x427   :  { %v6305_v18 = vpop.eup %6304  ;;  %v3561_v31 = vsub.f32 %v7651_v38, %v3557_v30  ;;  %v6186_v30 = vld [vmem:[%s8116_s4 + $0x60] sm:$0xff]  }
 0x428   :  { %v3560_v29 = vpop.xlane.xlu1 %3559  ;;  %v3349_v55 = vpack.c.bf16 %v6305_v18, %v6303_v26  ;;  %v8128_v26 = vpack.c.bf16 %v7554_v9, %v7542_v4 }
 0x429   :  { %v3563_v53 = vmul.f32 1.442695, %v3561_v31  ;;  %v3562_v41 = vsub.f32 %v7656_v24, %v3560_v29  ;;  %v6188_v29 = vld [vmem:[%s8116_s4 + $0x20] sm:$0xff]  }
 0x42a   :  { %5680 = vmatmul.mubr.msk.bf16.vlgmr.msra.gmra.mrb[60].mxu1 %vm2658_vm1, %v3349_v55 }
 0x42b   :  { %6310 = vpow2.f32 %v3563_v53  ;;  %v3565_v50 = vmul.f32 1.442695, %v3562_v41  ;;  %5690 = vmatpush3.bf16.msra.mxu1 %v8124_v57  ;;  %5691 = vmatprep.mubr.msk.bf16.mxu1 %vm6376_vm0, %v6375_v44  ;;  %v6190_v41 = vld [vmem:[%s8116_s4 + $0x68] sm:$0xff]  }
 0x42c   :  { %5701 = vmatprep.subr.bf16.mxu1 %v6375_v44 }
 0x42d   :  { %v6307_v0 = vpop.eup %6306  ;;  %6312 = vpow2.f32 %v3565_v50  ;;  %v6191_v50 = vld [vmem:[%s8116_s4 + $0xc8] sm:$0xff]  }
 0x42e   :  { %v3669_v38 = vpop.xlane.xlu0 %3668  ;;  %v3455_v20 = vsel %vm2658_vm1, %v6307_v0, 0.0 }
 0x42f   :  { %v6309_v32 = vpop.eup %6308  ;;  %v3673_v24 = vsub.f32 %v7661_v17, %v3669_v38  ;;  %3456 = vadd.xlane.f32.xlu0 %v3455_v20  ;;  %v3346_v17 = vsel %vm2658_vm1, %v6305_v18, 0.0  ;;  %v6187_v18 = vld [vmem:[%s8116_s4 + $0xc0] sm:$0xff]   ;;  %v6193_v38 = vld [vmem:[%s8116_s4 + $0x88] sm:$0xff]  }
 0x430   :  { %v3672_v28 = vpop.xlane.xlu1 %3671  ;;  %v3458_v34 = vsel %vm2658_vm1, %v6309_v32, 0.0  ;;  %v3461_v36 = vpack.c.bf16 %v6309_v32, %v6307_v0  ;;  %v6192_v0 = vld [vmem:[%s8116_s4 + $0x28] sm:$0xff]   ;;  %v6194_v32 = vld [vmem:[%s8116_s4 + $0x70] sm:$0xff]  }
 0x431   :  { %v3675_v54 = vmul.f32 1.442695, %v3673_v24  ;;  %v3674_v59 = vsub.f32 %v7666_v22, %v3672_v28  ;;  %3459 = vadd.xlane.f32.xlu1 %v3458_v34  ;;  %v6195_v24 = vld [vmem:[%s8116_s4 + $0xd0] sm:$0xff]  }
 0x432   :  { %5692 = vmatmul.mubr.msk.bf16.vlgmr.msra.gmra.mrb[64].mxu1 %vm2658_vm1, %v3461_v36  ;;  %v6196_v28 = vld [vmem:[%s8116_s4 + $0x30] sm:$0xff]   ;;  %v6198_v36 = vld [vmem:[%s8116_s4 + $0x78] sm:$0xff]  }
 0x433   :  { %6314 = vpow2.f32 %v3675_v54  ;;  %v3677_v39 = vmul.f32 1.442695, %v3674_v59  ;;  %5702 = vmatpush3.bf16.msra.mxu1 %v8125_v42  ;;  %3344 = vadd.xlane.f32.xlu0 %v3343_v12  ;;  %v6197_v34 = vld [vmem:[%s8116_s4 + $0x90] sm:$0xff]   ;;  %v6199_v54 = vld [vmem:[%s8116_s4 + $0xd8] sm:$0xff]   ;;  %v6203_v42 = vld [vmem:[%s8116_s4 + $0x140] sm:$0xff]  }
 0x434   :  { %5703 = vmatprep.mubr.msk.bf16.mxu1 %vm6376_vm0, %v6375_v44  ;;  %5713 = vmatprep.subr.bf16.mxu1 %v6375_v44  ;;  %v6200_v59 = vld [vmem:[%s8116_s4 + $0x38] sm:$0xff]  }
 0x435   :  { %v6311_v22 = vpop.eup %6310  ;;  %6316 = vpow2.f32 %v3677_v39  ;;  %3347 = vadd.xlane.f32.xlu1 %v3346_v17  ;;  %v6201_v12 = vld [vmem:[%s8116_s4 + $0x98] sm:$0xff]   ;;  %v6202_v39 = vld [vmem:[%s8116_s4 + $0xe0] sm:$0xff]  }
 0x436   :  { %v3781_v19 = vpop.xlane.xlu0 %3780  ;;  %v3567_v27 = vsel %vm2658_vm1, %v6311_v22, 0.0  ;;  %v6205_v17 = vld [vmem:[%s8116_s4 + $0xa0] sm:$0xff]  }
 0x437   :  { %v6313_v37 = vpop.eup %6312  ;;  %v3785_v21 = vsub.f32 %v7671_v13, %v3781_v19  ;;  %3568 = vadd.xlane.f32.xlu0 %v3567_v27  ;;  %v6178_v13 = vld [vmem:[%s8116_s4 + $0x40] sm:$0xff]   ;;  %v6209_v19 = vld [vmem:[%s8116_s4 + $0xa8] sm:$0xff]   ;;  %v6210_v27 = vld [vmem:[%s8116_s4 + $0xf0] sm:$0xff]  }
 0x438   :  { %v3784_v62 = vpop.xlane.xlu1 %3783  ;;  %v3570_v5 = vsel %vm2658_vm1, %v6313_v37, 0.0  ;;  %v3573_v25 = vpack.c.bf16 %v6313_v37, %v6311_v22  ;;  %5467 = vmatprep.subr.bf16.mxu0 %v6178_v13  ;;  %v6206_v22 = vld [vmem:[%s8116_s4 + $0xe8] sm:$0xff]   ;;  %v6212_v37 = vld [vmem:[%s8116_s4 + $0xb0] sm:$0xff]  }
 0x439   :  { %v3787_v43 = vmul.f32 1.442695, %v3785_v21  ;;  %v3786_v56 = vsub.f32 %v7676_v49, %v3784_v62  ;;  %3571 = vadd.xlane.f32.xlu1 %v3570_v5  ;;  %v6179_v49 = vld [vmem:[%s8116_s4] sm:$0xff]   ;;  %v6214_v21 = vld [vmem:[%s8116_s4 + $0xf8] sm:$0xff]  }
 0x43a   :  { %5704 = vmatmul.mubr.msk.bf16.vlgmr.msra.gmra.mrb[68].mxu1 %vm2658_vm1, %v3573_v25  ;;  %5468 = vmatpush3.bf16.msra.mxu0 %v6179_v49  ;;  %v6216_v62 = vld [vmem:[%s8116_s4 + $0xb8] sm:$0xff]   ;;  %v6219_v5 = vld [vmem:[%s8116_s4 + $0x1c0] sm:$0xff]  }
 0x43b   :  { %v3789_v33 = vmul.f32 1.442695, %v3786_v56  ;;  %5714 = vmatpush3.bf16.msra.mxu1 %v8126_v35  ;;  %5715 = vmatprep.mubr.msk.bf16.mxu1 %vm6376_vm0, %v6375_v44  ;;  %6318 = vpow2.f32 %v3787_v43 }
 0x43c   :  { %5725 = vmatprep.subr.bf16.mxu1 %v6375_v44  ;;  %5469 = vmatprep.subr.bf16.mxu0 %v6180_v15 }
 0x43d   :  { %v6315_v48 = vpop.eup %6314  ;;  %6320 = vpow2.f32 %v3789_v33 }
 0x43e   :  { %v3893_v7 = vpop.xlane.xlu0 %3892  ;;  %v3679_v3 = vsel %vm2658_vm1, %v6315_v48, 0.0  ;;  %5470 = vmatpush3.bf16.msra.mxu0 %v6181_v10 }
 0x43f   :  { %v6317_v8 = vpop.eup %6316  ;;  %v3897_v40 = vsub.f32 %v7681_v46, %v3893_v7  ;;  %3680 = vadd.xlane.f32.xlu0 %v3679_v3 }
 0x440   :  { %v3896_v52 = vpop.xlane.xlu1 %3895  ;;  %v3682_v60 = vsel %vm2658_vm1, %v6317_v8, 0.0  ;;  %v3685_v61 = vpack.c.bf16 %v6317_v8, %v6315_v48 }
 0x441   :  { %v3899_v47 = vmul.f32 1.442695, %v3897_v40  ;;  %v3898_v14 = vsub.f32 %v7686_v45, %v3896_v52  ;;  %3683 = vadd.xlane.f32.xlu1 %v3682_v60  ;;  %v6182_v45 = vld [vmem:[%s8116_s4 + $0x50] sm:$0xff]  }
 0x442   :  { %5716 = vmatmul.mubr.msk.bf16.vlgmr.msra.gmra.mrb[72].mxu1 %vm2658_vm1, %v3685_v61  ;;  %5471 = vmatprep.subr.bf16.mxu0 %v6182_v45 }
 0x443   :  { %6322 = vpow2.f32 %v3899_v47  ;;  %v3901_v46 = vmul.f32 1.442695, %v3898_v14  ;;  %5726 = vmatpush3.bf16.msra.mxu1 %v8127_v51  ;;  %5727 = vmatprep.mubr.msk.bf16.mxu1 %vm6376_vm0, %v6375_v44 }
 0x444   :  { %5737 = vmatprep.subr.bf16.mxu1 %v6375_v44  ;;  %5472 = vmatpush3.bf16.msra.mxu0 %v6183_v58 }
 0x445   :  { %6324 = vpow2.f32 %v3901_v46  ;;  %v6319_v16 = vpop.eup %6318  ;;  %5473 = vmatprep.subr.bf16.mxu0 %v6184_v63 }
 0x446   :  { %v3791_v57 = vsel %vm2658_vm1, %v6319_v16, 0.0 }
 0x447   :  { %v6321_v11 = vpop.eup %6320 }
 0x448   :  { %v3797_v6 = vpack.c.bf16 %v6321_v11, %v6319_v16  ;;  %5474 = vmatpush3.bf16.msra.mxu0 %v6185_v23  ;;  %v3794_v20 = vsel %vm2658_vm1, %v6321_v11, 0.0  ;;  %v6207_v23 = vld [vmem:[%s8116_s4 + $0x148] sm:$0xff]  }
 0x449   :  { %5475 = vmatprep.subr.bf16.mxu0 %v6186_v30 }
 0x44a   :  { %5728 = vmatmul.mubr.msk.bf16.vlgmr.msra.gmra.mrb[76].mxu1 %vm2658_vm1, %v3797_v6  ;;  %v6204_v6 = vld [vmem:[%s8116_s4 + $0x100] sm:$0xff]  }
 0x44b   :  { %5738 = vmatpush3.bf16.msra.mxu1 %v8128_v26  ;;  %5739 = vmatprep.mubr.msk.bf16.mxu1 %vm6376_vm0, %v6375_v44  ;;  %v6189_v44 = vld [vmem:[%s8116_s4 + $0x80] sm:$0xff]  }
 0x44c   :  { %5489 = vmatprep.subr.bf16.mxu1 %v6187_v18  ;;  %5476 = vmatpush3.bf16.msra.mxu0 %v6188_v29 }
 0x44d   :  { %v6323_v31 = vpop.eup %6322  ;;  %5477 = vmatprep.subr.bf16.mxu0 %v6190_v41 }
 0x44e   :  { %v3903_v4 = vsel %vm2658_vm1, %v6323_v31, 0.0 }
 0x44f   :  { %v6325_v9 = vpop.eup %6324  ;;  %3904 = vadd.xlane.f32.xlu0 %v3903_v4 }
 0x450   :  { %v3906_v55 = vsel %vm2658_vm1, %v6325_v9, 0.0  ;;  %v3909_v53 = vpack.c.bf16 %v6325_v9, %v6323_v31  ;;  %5478 = vmatpush3.bf16.msra.mxu0 %v6192_v0  ;;  %v6208_v31 = vld [vmem:[%s8116_s4 + $0x108] sm:$0xff]   ;;  %v6213_v0 = vld [vmem:[%s8116_s4 + $0x110] sm:$0xff]  }
 0x451   :  { %3907 = vadd.xlane.f32.xlu1 %v3906_v55  ;;  %5479 = vmatprep.subr.bf16.mxu0 %v6194_v32 }
 0x452   :  { %5740 = vmatmul.mubr.msk.bf16.vlgmr.msra.gmra.mrb[80].mxu1 %vm2658_vm1, %v3909_v53 }
 0x453   :  { %3792 = vadd.xlane.f32.xlu0 %v3791_v57  ;;  %5490 = vmatpush3.bf16.msra.mxu1 %v6189_v44  ;;  %v6211_v44 = vld [vmem:[%s8116_s4 + $0x150] sm:$0xff]  }
 0x454   :  { %5491 = vmatprep.subr.bf16.mxu1 %v6191_v50  ;;  %5480 = vmatpush3.bf16.msra.mxu0 %v6196_v28  ;;  %v6217_v28 = vld [vmem:[%s8116_s4 + $0x118] sm:$0xff]  }
 0x455   :  { %3795 = vadd.xlane.f32.xlu1 %v3794_v20  ;;  %5481 = vmatprep.subr.bf16.mxu0 %v6198_v36 }
 0x457   :  { %5492 = vmatpush3.bf16.msra.mxu1 %v6193_v38  ;;  %v6215_v38 = vld [vmem:[%s8116_s4 + $0x158] sm:$0xff]  }
 0x458   :  { %5493 = vmatprep.subr.bf16.mxu1 %v6195_v24  ;;  %5482 = vmatpush3.bf16.msra.mxu0 %v6200_v59  ;;  %v6218_v59 = vld [vmem:[%s8116_s4 + $0x160] sm:$0xff]  }
 0x459   :  { %5511 = vmatprep.subr.bf16.mxu0 %v6203_v42 }
 0x45b   :  { %5494 = vmatpush3.bf16.msra.mxu1 %v6197_v34 }
 0x45c   :  { %5495 = vmatprep.subr.bf16.mxu1 %v6199_v54 }
 0x45f   :  { %5496 = vmatpush3.bf16.msra.mxu1 %v6201_v12 }
 0x460   :  { %5497 = vmatprep.subr.bf16.mxu1 %v6202_v39 }
 0x463   :  { %5498 = vmatpush3.bf16.msra.mxu1 %v6205_v17 }
 0x464   :  { %5499 = vmatprep.subr.bf16.mxu1 %v6206_v22 }
 0x467   :  { %5500 = vmatpush3.bf16.msra.mxu1 %v6209_v19  ;;  %v6220_v19 = vld [vmem:[%s8116_s4 + $0x120] sm:$0xff]  }
 0x468   :  { %5501 = vmatprep.subr.bf16.mxu1 %v6210_v27  ;;  %v6221_v27 = vld [vmem:[%s8116_s4 + $0x180] sm:$0xff]  }
 0x46b   :  { %5502 = vmatpush3.bf16.msra.mxu1 %v6212_v37 }
 0x46c   :  { %5503 = vmatprep.subr.bf16.mxu1 %v6214_v21  ;;  %v6222_v21 = vld [vmem:[%s8116_s4 + $0x168] sm:$0xff]  }
 0x46f   :  { %5504 = vmatpush3.bf16.msra.mxu1 %v6216_v62  ;;  %v6223_v62 = vld [vmem:[%s8116_s4 + $0x1c8] sm:$0xff]  }
 0x470   :  { %5533 = vmatprep.subr.bf16.mxu1 %v6219_v5 }
 0x484   :  { %v2673_v25 = vpop.xlane.xlu0 %2672 }
 0x485   :  { %6326 = vrcp.f32 %v2673_v25 }
 0x486   :  { %v2676_v43 = vpop.xlane.xlu1 %2675 }
 0x487   :  { %6328 = vrcp.f32 %v2676_v43 }
 0x48c   :  { %v2785_v56 = vpop.xlane.xlu0 %2784 }
 0x48d   :  { %6330 = vrcp.f32 %v2785_v56 }
 0x48e   :  { %v2788_v33 = vpop.xlane.xlu1 %2787 }
 0x48f   :  { %6332 = vrcp.f32 %v2788_v33  ;;  %v6327_v49 = vpop.eup %6326  ;;  %v6224_v33 = vld [vmem:[%s8116_s4 + $0x128] sm:$0xff]  }
 0x491   :  { %v6329_v3 = vpop.eup %6328 }
 0x497   :  { %v6331_v10 = vpop.eup %6330 }
 0x499   :  { %v6333_v51 = vpop.eup %6332 }
 0x49c   :  { %v3009_v35 = vpop.xlane.xlu0 %3008 }
 0x49e   :  { %v3012_v13 = vpop.xlane.xlu1 %3011 }
 0x4a0   :  { %v2897_v61 = vpop.xlane.xlu0 %2896 }
 0x4a1   :  { %6334 = vrcp.f32 %v2897_v61 }
 0x4a2   :  { %v2900_v15 = vpop.xlane.xlu1 %2899 }
 0x4a3   :  { %6336 = vrcp.f32 %v2900_v15  ;;  %v6228_v15 = vld [vmem:[%s8116_s4 + $0x130] sm:$0xff]  }
 0x4a4   :  { %6338 = vrcp.f32 %v3009_v35  ;;  %v3121_v41 = vpop.xlane.xlu0 %3120  ;;  %v6225_v35 = vld [vmem:[%s8116_s4 + $0x188] sm:$0xff]  }
 0x4a5   :  { %6340 = vrcp.f32 %v3012_v13 }
 0x4a6   :  { %v3124_v50 = vpop.xlane.xlu1 %3123  ;;  %6342 = vrcp.f32 %v3121_v41 }
 0x4a7   :  { %6344 = vrcp.f32 %v3124_v50  ;;  %v6240_v50 = vld [vmem:[%s8116_s4 + $0x1a8] sm:$0xff]  }
 0x4ab   :  { %v6335_v30 = vpop.eup %6334 }
 0x4ac   :  { %v3233_v36 = vpop.xlane.xlu0 %3232 }
 0x4ad   :  { %v6337_v29 = vpop.eup %6336  ;;  %6346 = vrcp.f32 %v3233_v36 }
 0x4ae   :  { %v6339_v32 = vpop.eup %6338  ;;  %v3236_v12 = vpop.xlane.xlu1 %3235 }
 0x4af   :  { %v6341_v34 = vpop.eup %6340  ;;  %6348 = vrcp.f32 %v3236_v12  ;;  %v6244_v12 = vld [vmem:[%s8116_s4 + $0x1b0] sm:$0xff]  }
 0x4b0   :  { %v6343_v43 = vpop.eup %6342 }
 0x4b1   :  { %v6345_v13 = vpop.eup %6344 }
 0x4bc   :  { %v3457_v37 = vpop.xlane.xlu0 %3456 }
 0x4be   :  { %v3460_v5 = vpop.xlane.xlu1 %3459 }
 0x4cd   :  { %v2715_v48 = vpop.f32.mrb[36].mxu1 }
 0x4ce   :  { %v5609_v7 = vpop.f32.mrb[37].mxu1  ;;  %v2724_v40 = vmul.f32 %v6327_v49, %v2715_v48  ;;  %v6226_v49 = vld [vmem:[%s8116_s4 + $0x170] sm:$0xff]  }
 0x4cf   :  { %v2718_v8 = vpop.f32.mrb[38].mxu1  ;;  %v6227_v7 = vld [vmem:[%s8116_s4 + $0x1d0] sm:$0xff]  }
 0x4d0   :  { %v2725_v52 = vmul.f32 %v6329_v3, %v2718_v8  ;;  %v5610_v60 = vpop.f32.mrb[39].mxu1 }
 0x4d1   :  { %v3348_v60 = vpop.xlane.xlu1 %3347 }
 0x4d2   :  { %v3958_v47 = vpack.c.bf16 %v2725_v52, %v2724_v40  ;;  %v3345_v52 = vpop.xlane.xlu0 %3344 }
 0x4d3   :  { %6350 = vrcp.f32 %v3345_v52  ;;  %v6255_v52 = vld [vmem:[%s8116_s4 + $0x2c8] sm:$0xff]  }
 0x4d4   :  { %6352 = vrcp.f32 %v3348_v60 }
 0x4d5   :  { %v2827_v14 = vpop.f32.mrb[40].mxu1  ;;  %6354 = vrcp.f32 %v3457_v37  ;;  %v6248_v37 = vld [vmem:[%s8116_s4 + $0x1b8] sm:$0xff]  }
 0x4d6   :  { %v5621_v46 = vpop.f32.mrb[41].mxu1  ;;  %v2836_v58 = vmul.f32 %v6331_v10, %v2827_v14  ;;  %v6230_v14 = vld [vmem:[%s8116_s4 + $0x178] sm:$0xff]   ;;  %6356 = vrcp.f32 %v3460_v5  ;;  %v3569_v36 = vpop.xlane.xlu0 %3568 }
 0x4d7   :  { %v2830_v45 = vpop.f32.mrb[42].mxu1  ;;  %v6231_v10 = vld [vmem:[%s8116_s4 + $0x1d8] sm:$0xff]   ;;  %6358 = vrcp.f32 %v3569_v36 }
 0x4d8   :  { %v2837_v16 = vmul.f32 %v6333_v51, %v2830_v45  ;;  %v5622_v11 = vpop.f32.mrb[43].mxu1  ;;  %v6347_v51 = vpop.eup %6346 }
 0x4d9   :  { %v6349_v11 = vpop.eup %6348 }
 0x4da   :  { %v3959_v63 = vpack.c.bf16 %v2837_v16, %v2836_v58  ;;  %v6232_v58 = vld [vmem:[%s8116_s4 + $0x138] sm:$0xff]   ;;  %v3681_v5 = vpop.xlane.xlu0 %3680 }
 0x4db   :  { %v6233_v16 = vld [vmem:[%s8116_s4 + $0x198] sm:$0xff]  }
 0x4dc   :  { %4777 = vmatprep.mubr.bf16.mxu0 %v3959_v63 }
 0x4dd   :  { %v2939_v26 = vpop.f32.mrb[44].mxu1  ;;  %4778 = vmatmul.mubr.bf16.vlgmr.msra.gmra.mrb[84].mxu0 %v3958_v47  ;;  %v6229_v47 = vld [vmem:[%s8116_s4 + $0x190] sm:$0xff]  }
 0x4de   :  { %v5633_v18 = vpop.f32.mrb[45].mxu1  ;;  %5512 = vmatpush3.bf16.msra.mxu0 %v6204_v6  ;;  %v2948_v9 = vmul.f32 %v6335_v30, %v2939_v26  ;;  %v6234_v6 = vld [vmem:[%s8116_s4 + $0x1e0] sm:$0xff]  }
 0x4df   :  { %v2942_v4 = vpop.f32.mrb[46].mxu1  ;;  %5513 = vmatprep.subr.bf16.mxu0 %v6207_v23  ;;  %v6235_v23 = vld [vmem:[%s8116_s4 + $0x240] sm:$0xff]  }
 0x4e0   :  { %v2949_v55 = vmul.f32 %v6337_v29, %v2942_v4  ;;  %v5634_v53 = vpop.f32.mrb[47].mxu1  ;;  %v6236_v29 = vld [vmem:[%s8116_s4 + $0x1a0] sm:$0xff]  }
 0x4e1   :  { %v6237_v4 = vld [vmem:[%s8116_s4 + $0x200] sm:$0xff]   ;;  %v6351_v53 = vpop.eup %6350 }
 0x4e2   :  { %v3960_v57 = vpack.c.bf16 %v2949_v55, %v2948_v9  ;;  %5514 = vmatpush3.bf16.msra.mxu0 %v6208_v31  ;;  %v6239_v9 = vld [vmem:[%s8116_s4 + $0x248] sm:$0xff]  }
 0x4e3   :  { %5515 = vmatprep.subr.bf16.mxu0 %v6211_v44  ;;  %v6238_v44 = vld [vmem:[%s8116_s4 + $0x1e8] sm:$0xff]  }
 0x4e5   :  { %v3051_v20 = vpop.f32.mrb[48].mxu1 }
 0x4e6   :  { %v5645_v24 = vpop.f32.mrb[49].mxu1  ;;  %5516 = vmatpush3.bf16.msra.mxu0 %v6213_v0  ;;  %v3060_v39 = vmul.f32 %v6339_v32, %v3051_v20  ;;  %v6353_v0 = vpop.eup %6352  ;;  %v6242_v20 = vld [vmem:[%s8116_s4 + $0x1f0] sm:$0xff]  }
 0x4e7   :  { %v3054_v54 = vpop.f32.mrb[50].mxu1  ;;  %5517 = vmatprep.subr.bf16.mxu0 %v6215_v38  ;;  %v6243_v32 = vld [vmem:[%s8116_s4 + $0x250] sm:$0xff]  }
 0x4e8   :  { %v3061_v42 = vmul.f32 %v6341_v34, %v3054_v54  ;;  %v5646_v17 = vpop.f32.mrb[51].mxu1  ;;  %v3572_v54 = vpop.xlane.xlu1 %3571 }
 0x4e9   :  { %v6247_v17 = vld [vmem:[%s8116_s4 + $0x258] sm:$0xff]   ;;  %6360 = vrcp.f32 %v3572_v54 }
 0x4ea   :  { %v3961_v22 = vpack.c.bf16 %v3061_v42, %v3060_v39  ;;  %5518 = vmatpush3.bf16.msra.mxu0 %v6217_v28  ;;  %v6245_v39 = vld [vmem:[%s8116_s4 + $0x210] sm:$0xff]   ;;  %v6246_v42 = vld [vmem:[%s8116_s4 + $0x1f8] sm:$0xff]   ;;  %6362 = vrcp.f32 %v3681_v5 }
 0x4eb   :  { %5519 = vmatprep.subr.bf16.mxu0 %v6218_v59 }
 0x4ec   :  { %4818 = vmatprep.mubr.bf16.mxu1 %v3961_v22 }
 0x4ed   :  { %v3163_v25 = vpop.f32.mrb[52].mxu1  ;;  %4819 = vmatmul.mubr.bf16.vlgmr.msra.gmra.mrb[84].mxu1 %v3960_v57  ;;  %v6241_v57 = vld [vmem:[%s8116_s4 + $0x208] sm:$0xff]  }
 0x4ee   :  { %v5657_v56 = vpop.f32.mrb[53].mxu1  ;;  %5520 = vmatpush3.bf16.msra.mxu0 %v6220_v19  ;;  %5534 = vmatpush3.bf16.msra.mxu1 %v6221_v27  ;;  %v3172_v3 = vmul.f32 %v6343_v43, %v3163_v25  ;;  %v6355_v19 = vpop.eup %6354  ;;  %v6250_v43 = vld [vmem:[%s8116_s4 + $0x260] sm:$0xff]  }
 0x4ef   :  { %v3166_v48 = vpop.f32.mrb[54].mxu1  ;;  %5521 = vmatprep.subr.bf16.mxu0 %v6222_v21  ;;  %5535 = vmatprep.subr.bf16.mxu1 %v6223_v62  ;;  %v6249_v21 = vld [vmem:[%s8116_s4 + $0x218] sm:$0xff]   ;;  %v6357_v62 = vpop.eup %6356  ;;  %v6251_v56 = vld [vmem:[%s8116_s4 + $0x2c0] sm:$0xff]  }
 0x4f0   :  { %v3173_v8 = vmul.f32 %v6345_v13, %v3166_v48  ;;  %v5658_v40 = vpop.f32.mrb[55].mxu1 }
 0x4f1   :  { %v6254_v40 = vld [vmem:[%s8116_s4 + $0x268] sm:$0xff]  }
 0x4f2   :  { %v3962_v61 = vpack.c.bf16 %v3173_v8, %v3172_v3  ;;  %5522 = vmatpush3.bf16.msra.mxu0 %v6224_v33  ;;  %5536 = vmatpush3.bf16.msra.mxu1 %v6225_v35  ;;  %v3684_v33 = vpop.xlane.xlu1 %3683  ;;  %v6253_v3 = vld [vmem:[%s8116_s4 + $0x280] sm:$0xff]   ;;  %v3905_v8 = vpop.xlane.xlu0 %3904 }
 0x4f3   :  { %5523 = vmatprep.subr.bf16.mxu0 %v6226_v49  ;;  %5537 = vmatprep.subr.bf16.mxu1 %v6227_v7  ;;  %v6252_v7 = vld [vmem:[%s8116_s4 + $0x220] sm:$0xff]   ;;  %6364 = vrcp.f32 %v3684_v33 }
 0x4f5   :  { %v3275_v46 = vpop.f32.mrb[56].mxu1 }
 0x4f6   :  { %v5669_v45 = vpop.f32.mrb[57].mxu1  ;;  %5524 = vmatpush3.bf16.msra.mxu0 %v6228_v15  ;;  %5538 = vmatpush3.bf16.msra.mxu1 %v6229_v47  ;;  %v3284_v26 = vmul.f32 %v6347_v51, %v3275_v46  ;;  %v3908_v60 = vpop.xlane.xlu1 %3907 }
 0x4f7   :  { %v3278_v63 = vpop.f32.mrb[58].mxu1  ;;  %5525 = vmatprep.subr.bf16.mxu0 %v6230_v14  ;;  %5539 = vmatprep.subr.bf16.mxu1 %v6231_v10  ;;  %v6359_v15 = vpop.eup %6358  ;;  %v6256_v14 = vld [vmem:[%s8116_s4 + $0x228] sm:$0xff]   ;;  %v6258_v45 = vld [vmem:[%s8116_s4 + $0x270] sm:$0xff]  }
 0x4f8   :  { %v3285_v30 = vmul.f32 %v6349_v11, %v3278_v63  ;;  %v5670_v18 = vpop.f32.mrb[59].mxu1  ;;  %v6257_v10 = vld [vmem:[%s8116_s4 + $0x288] sm:$0xff]   ;;  %v6361_v46 = vpop.eup %6360 }
 0x4f9   :  { %v6261_v18 = vld [vmem:[%s8116_s4 + $0x290] sm:$0xff]  }
 0x4fa   :  { %v3963_v31 = vpack.c.bf16 %v3285_v30, %v3284_v26  ;;  %5526 = vmatpush3.bf16.msra.mxu0 %v6232_v58  ;;  %5540 = vmatpush3.bf16.msra.mxu1 %v6233_v16  ;;  %v6259_v58 = vld [vmem:[%s8116_s4 + $0x2d0] sm:$0xff]  }
 0x4fb   :  { %5541 = vmatprep.subr.bf16.mxu1 %v6234_v6  ;;  %5555 = vmatprep.subr.bf16.mxu0 %v6235_v23  ;;  %v3793_v6 = vpop.xlane.xlu0 %3792  ;;  %v3796_v23 = vpop.xlane.xlu1 %3795  ;;  %v6260_v30 = vld [vmem:[%s8116_s4 + $0x230] sm:$0xff]  }
 0x4fc   :  { %4859 = vmatprep.mubr.bf16.mxu0 %v3963_v31  ;;  %v6262_v31 = vld [vmem:[%s8116_s4 + $0x278] sm:$0xff]   ;;  %6366 = vrcp.f32 %v3793_v6 }
 0x4fd   :  { %v3387_v55 = vpop.f32.mrb[60].mxu1  ;;  %4860 = vmatmul.mubr.bf16.vlgmr.msra.gmra.mrb[88].mxu0 %v3962_v61  ;;  %6368 = vrcp.f32 %v3796_v23 }
 0x4fe   :  { %v5681_v41 = vpop.f32.mrb[61].mxu1  ;;  %5542 = vmatpush3.bf16.msra.mxu1 %v6236_v29  ;;  %5556 = vmatpush3.bf16.msra.mxu0 %v6237_v4  ;;  %v3396_v24 = vmul.f32 %v6351_v53, %v3387_v55  ;;  %v6263_v29 = vld [vmem:[%s8116_s4 + $0x2d8] sm:$0xff]   ;;  %6370 = vrcp.f32 %v3905_v8 }
 0x4ff   :  { %v3390_v38 = vpop.f32.mrb[62].mxu1  ;;  %5543 = vmatprep.subr.bf16.mxu1 %v6238_v44  ;;  %5557 = vmatprep.subr.bf16.mxu0 %v6239_v9  ;;  %v6363_v44 = vpop.eup %6362  ;;  %v6264_v55 = vld [vmem:[%s8116_s4 + $0x238] sm:$0xff]   ;;  %6372 = vrcp.f32 %v3908_v60 }
 0x500   :  { %v3397_v28 = vmul.f32 %v6353_v0, %v3390_v38  ;;  %v5682_v34 = vpop.f32.mrb[63].mxu1  ;;  %v6265_v53 = vld [vmem:[%s8116_s4 + $0x298] sm:$0xff]   ;;  %v6365_v41 = vpop.eup %6364 }
 0x502   :  { %v3964_v59 = vpack.c.bf16 %v3397_v28, %v3396_v24  ;;  %5544 = vmatpush3.bf16.msra.mxu1 %v6240_v50  ;;  %5558 = vmatpush3.bf16.msra.mxu0 %v6241_v57  ;;  %v6266_v57 = vld [vmem:[%s8116_s4 + $0x2e0] sm:$0xff]   ;;  %v6268_v28 = vld [vmem:[%s8116_s4 + $0x2e8] sm:$0xff]  }
 0x503   :  { %5545 = vmatprep.subr.bf16.mxu1 %v6242_v20  ;;  %5559 = vmatprep.subr.bf16.mxu0 %v6243_v32  ;;  %v6267_v24 = vld [vmem:[%s8116_s4 + $0x2a0] sm:$0xff]  }
 0x505   :  { %v3499_v22 = vpop.f32.mrb[64].mxu1 }
 0x506   :  { %v5693_v27 = vpop.f32.mrb[65].mxu1  ;;  %5546 = vmatpush3.bf16.msra.mxu1 %v6244_v12  ;;  %5560 = vmatpush3.bf16.msra.mxu0 %v6245_v39  ;;  %v3508_v35 = vmul.f32 %v6355_v19, %v3499_v22  ;;  %v6367_v36 = vpop.eup %6366 }
 0x507   :  { %v3502_v25 = vpop.f32.mrb[66].mxu1  ;;  %5547 = vmatprep.subr.bf16.mxu1 %v6246_v42  ;;  %5561 = vmatprep.subr.bf16.mxu0 %v6247_v17  ;;  %v6369_v12 = vpop.eup %6368  ;;  %v6270_v42 = vld [vmem:[%s8116_s4 + $0x2f0] sm:$0xff]  }
 0x508   :  { %v3509_v13 = vmul.f32 %v6357_v62, %v3502_v25  ;;  %v5694_v48 = vpop.f32.mrb[67].mxu1  ;;  %v6371_v5 = vpop.eup %6370 }
 0x50a   :  { %v3965_v49 = vpack.c.bf16 %v3509_v13, %v3508_v35  ;;  %5548 = vmatpush3.bf16.msra.mxu1 %v6248_v37  ;;  %5562 = vmatpush3.bf16.msra.mxu0 %v6249_v21  ;;  %v6271_v37 = vld [vmem:[%s8116_s4 + $0x2b0] sm:$0xff]   ;;  %v6272_v21 = vld [vmem:[%s8116_s4 + $0x2f8] sm:$0xff]  }
 0x50b   :  { %5563 = vmatprep.subr.bf16.mxu0 %v6250_v43  ;;  %5577 = vmatprep.subr.bf16.mxu1 %v6251_v56  ;;  %v6273_v43 = vld [vmem:[%s8116_s4 + $0x2b8] sm:$0xff]   ;;  %v6373_v56 = vpop.eup %6372 }
 0x50c   :  { %4900 = vmatprep.mubr.bf16.mxu1 %v3965_v49 }
 0x50d   :  { %v3611_v61 = vpop.f32.mrb[68].mxu1  ;;  %4901 = vmatmul.mubr.bf16.vlgmr.msra.gmra.mrb[88].mxu1 %v3964_v59  ;;  %v6269_v59 = vld [vmem:[%s8116_s4 + $0x2a8] sm:$0xff]  }
 0x50e   :  { %v5705_v47 = vpop.f32.mrb[69].mxu1  ;;  %5564 = vmatpush3.bf16.msra.mxu0 %v6252_v7  ;;  %5578 = vmatpush3.bf16.msra.mxu1 %v6253_v3  ;;  %v3620_v16 = vmul.f32 %v6359_v15, %v3611_v61  ;;  %v5309_v61 = vld [vmem:[%s8117_s5] ss:$0 sm:$0xff] }
 0x50f   :  { %v3614_v51 = vpop.f32.mrb[70].mxu1  ;;  %5565 = vmatprep.subr.bf16.mxu0 %v6254_v40  ;;  %5579 = vmatprep.subr.bf16.mxu1 %v6255_v52 }
 0x510   :  { %v3621_v11 = vmul.f32 %v6361_v46, %v3614_v51  ;;  %v5706_v63 = vpop.f32.mrb[71].mxu1 }
 0x512   :  { %v3966_v26 = vpack.c.bf16 %v3621_v11, %v3620_v16  ;;  %5566 = vmatpush3.bf16.msra.mxu0 %v6256_v14  ;;  %5580 = vmatpush3.bf16.msra.mxu1 %v6257_v10 }
 0x513   :  { %5567 = vmatprep.subr.bf16.mxu0 %v6258_v45  ;;  %5581 = vmatprep.subr.bf16.mxu1 %v6259_v58 }
 0x515   :  { %v3723_v4 = vpop.f32.mrb[72].mxu1 }
 0x516   :  { %v5717_v9 = vpop.f32.mrb[73].mxu1  ;;  %5568 = vmatpush3.bf16.msra.mxu0 %v6260_v30  ;;  %5582 = vmatpush3.bf16.msra.mxu1 %v6261_v18  ;;  %v3732_v0 = vmul.f32 %v6363_v44, %v3723_v4 }
 0x517   :  { %v3726_v50 = vpop.f32.mrb[74].mxu1  ;;  %5569 = vmatprep.subr.bf16.mxu0 %v6262_v31  ;;  %5583 = vmatprep.subr.bf16.mxu1 %v6263_v29 }
 0x518   :  { %v3733_v38 = vmul.f32 %v6365_v41, %v3726_v50  ;;  %v5718_v20 = vpop.f32.mrb[75].mxu1 }
 0x51a   :  { %v3967_v32 = vpack.c.bf16 %v3733_v38, %v3732_v0  ;;  %5570 = vmatpush3.bf16.msra.mxu0 %v6264_v55  ;;  %5584 = vmatpush3.bf16.msra.mxu1 %v6265_v53 }
 0x51b   :  { %5585 = vmatprep.subr.bf16.mxu1 %v6266_v57 }
 0x51c   :  { %4941 = vmatprep.mubr.bf16.mxu0 %v3967_v32 }
 0x51d   :  { %v3835_v34 = vpop.f32.mrb[76].mxu1  ;;  %4942 = vmatmul.mubr.bf16.vlgmr.msra.gmra.mrb[92].mxu0 %v3966_v26 }
 0x51e   :  { %v5729_v54 = vpop.f32.mrb[77].mxu1  ;;  %5586 = vmatpush3.bf16.msra.mxu1 %v6267_v24  ;;  %v3844_v17 = vmul.f32 %v6367_v36, %v3835_v34 }
 0x51f   :  { %v3838_v39 = vpop.f32.mrb[78].mxu1  ;;  %5587 = vmatprep.subr.bf16.mxu1 %v6268_v28 }
 0x520   :  { %v3845_v22 = vmul.f32 %v6369_v12, %v3838_v39  ;;  %v5730_v19 = vpop.f32.mrb[79].mxu1 }
 0x522   :  { %v3968_v27 = vpack.c.bf16 %v3845_v22, %v3844_v17  ;;  %5588 = vmatpush3.bf16.msra.mxu1 %v6269_v59 }
 0x523   :  { %5589 = vmatprep.subr.bf16.mxu1 %v6270_v42 }
 0x525   :  { %v3947_v62 = vpop.f32.mrb[80].mxu1 }
 0x526   :  { %v5741_v25 = vpop.f32.mrb[81].mxu1  ;;  %5590 = vmatpush3.bf16.msra.mxu1 %v6271_v37  ;;  %v3956_v35 = vmul.f32 %v6371_v5, %v3947_v62 }
 0x527   :  { %v3950_v33 = vpop.f32.mrb[82].mxu1  ;;  %5591 = vmatprep.subr.bf16.mxu1 %v6272_v21 }
 0x528   :  { %v3957_v13 = vmul.f32 %v6373_v56, %v3950_v33  ;;  %v5742_v48 = vpop.f32.mrb[83].mxu1 }
 0x52a   :  { %v3969_v49 = vpack.c.bf16 %v3957_v13, %v3956_v35  ;;  %5592 = vmatpush3.bf16.msra.mxu1 %v6273_v43 }
 0x52c   :  { %4982 = vmatprep.mubr.bf16.mxu1 %v3969_v49 }
 0x52d   :  { %4983 = vmatmul.mubr.bf16.vlgmr.msra.gmra.mrb[92].mxu1 %v3968_v27 }
 0x5b0   :  { %v5483_v7 = vpop.f32.mrb[84].mxu0 }
 0x5b1   :  { %v5484_v3 = vpop.f32.mrb[85].mxu0 }
 0x5b2   :  { %v5485_v8 = vadd.f32 %v5484_v3, %v5483_v7  ;;  %v5486_v40 = vpop.f32.mrb[86].mxu0 }
 0x5b3   :  { %v5487_v52 = vpop.f32.mrb[87].mxu0 }
 0x5b4   :  { %v5488_v60 = vadd.f32 %v5487_v52, %v5486_v40  ;;  %v4780_v14 = vadd.f32 %v5485_v8, %v5309_v61 }
 0x5b6   :  { %v4783_v45 = vadd.f32 %v5488_v60, %v5309_v61 }
 0x5c0   :  { %v5505_v15 = vpop.f32.mrb[84].mxu1 }
 0x5c1   :  { %v5506_v47 = vpop.f32.mrb[85].mxu1 }
 0x5c2   :  { %v5507_v10 = vadd.f32 %v5506_v47, %v5505_v15  ;;  %v5508_v46 = vpop.f32.mrb[86].mxu1 }
 0x5c3   :  { %v5509_v51 = vpop.f32.mrb[87].mxu1 }
 0x5c4   :  { %v4821_v58 = vadd.f32 %v5507_v10, %v4780_v14  ;;  %v5510_v16 = vadd.f32 %v5509_v51, %v5508_v46 }
 0x5c6   :  { %v4824_v11 = vadd.f32 %v5510_v16, %v4783_v45 }
 0x5d0   :  { %v5527_v63 = vpop.f32.mrb[88].mxu0 }
 0x5d1   :  { %v5528_v6 = vpop.f32.mrb[89].mxu0 }
 0x5d2   :  { %v5529_v23 = vadd.f32 %v5528_v6, %v5527_v63  ;;  %v5530_v26 = vpop.f32.mrb[90].mxu0 }
 0x5d3   :  { %v5531_v30 = vpop.f32.mrb[91].mxu0 }
 0x5d4   :  { %v4862_v18 = vadd.f32 %v5529_v23, %v4821_v58  ;;  %v5532_v31 = vadd.f32 %v5531_v30, %v5530_v26 }
 0x5d6   :  { %v4865_v29 = vadd.f32 %v5532_v31, %v4824_v11 }
 0x5e0   :  { %v5549_v4 = vpop.f32.mrb[88].mxu1 }
 0x5e1   :  { %v5550_v44 = vpop.f32.mrb[89].mxu1 }
 0x5e2   :  { %v5551_v9 = vadd.f32 %v5550_v44, %v5549_v4  ;;  %v5552_v55 = vpop.f32.mrb[90].mxu1 }
 0x5e3   :  { %v5553_v53 = vpop.f32.mrb[91].mxu1 }
 0x5e4   :  { %v4903_v41 = vadd.f32 %v5551_v9, %v4862_v18  ;;  %v5554_v50 = vadd.f32 %v5553_v53, %v5552_v55 }
 0x5e6   :  { %v4906_v57 = vadd.f32 %v5554_v50, %v4865_v29 }
 0x5f0   :  { %v5571_v0 = vpop.f32.mrb[92].mxu0 }
 0x5f1   :  { %v5572_v38 = vpop.f32.mrb[93].mxu0 }
 0x5f2   :  { %v5573_v20 = vadd.f32 %v5572_v38, %v5571_v0  ;;  %v5574_v32 = vpop.f32.mrb[94].mxu0 }
 0x5f3   :  { %v5575_v24 = vpop.f32.mrb[95].mxu0 }
 0x5f4   :  { %v4944_v28 = vadd.f32 %v5573_v20, %v4903_v41  ;;  %v5576_v34 = vadd.f32 %v5575_v24, %v5574_v32 }
 0x5f6   :  { %v4947_v36 = vadd.f32 %v5576_v34, %v4906_v57 }
 0x600   :  { %v5593_v54 = vpop.f32.mrb[92].mxu1 }
 0x601   :  { %v5594_v59 = vpop.f32.mrb[93].mxu1 }
 0x602   :  { %v5595_v12 = vadd.f32 %v5594_v59, %v5593_v54  ;;  %v5596_v39 = vpop.f32.mrb[94].mxu1 }
 0x603   :  { %v5597_v42 = vpop.f32.mrb[95].mxu1 }
 0x604   :  { %v4985_v17 = vadd.f32 %v5595_v12, %v4944_v28  ;;  %v5598_v22 = vadd.f32 %v5597_v42, %v5596_v39 }
 0x606   :  { %v4988_v19 = vadd.f32 %v5598_v22, %v4947_v36  ;;  %v4991_v27 = vadd.f32 %v6420_v1, %v4985_v17 }
 0x608   :  { %v4992_v37 = vadd.f32 %v6423_v2, %v4988_v19 }
 0x60a   :  { %v5417_v21 = vpack.c.bf16 %v4992_v37, %v4991_v27 }
 0x60c   :  { %5418 = vst [vmem:[%s8118_s7] sm:$0xff] %v5417_v21  }

</bundles_post_ra>
